<compile_context>
chip_gen: v5e
topology: v5e:2x2
jax: 0.10.0
libtpu: 0.0.40
codegen_flags: <defaults>
</compile_context>

<pallas_src>
import jax
import jax.numpy as jnp
from jax.experimental import pallas as pl
from jax.experimental.pallas import tpu as pltpu


def _round_up(x, m):
    return (x + m - 1) // m * m


def _pick_n2_tile(n2p):
    # 2-5 lane-dense tiles of the output columns (all candidates are k*128).
    for t in (640, 512, 384, 256, 128):
        if t <= n2p and n2p % t == 0:
            return t
    return n2p


def _default_weight_dtype():
    """int8 on v5*/v6* (native int MXU), fp8-e4m3 on v7x, bf16 otherwise."""
    fp8 = getattr(jnp, "float8_e4m3fn", None)
    try:
        kind = jax.devices()[0].device_kind.lower()
    except Exception:
        return jnp.bfloat16
    if "v7" in kind or "7x" in kind:
        return fp8 if fp8 is not None else jnp.bfloat16
    if "v5" in kind or "v6" in kind:
        return jnp.int8
    return jnp.bfloat16


def _quantize_cols(w, wdtype):
    """w: (K, N) f32 (already padded). Symmetric per-output-column quant."""
    if wdtype == jnp.bfloat16:
        return w.astype(jnp.bfloat16), jnp.ones((1, w.shape[1]), jnp.float32)
    amax = jnp.max(jnp.abs(w), axis=0, keepdims=True)
    if wdtype == jnp.int8:
        scale = jnp.where(amax > 0, amax / 127.0, 1.0)
        q = jnp.clip(jnp.round(w / scale), -127.0, 127.0).astype(jnp.int8)
    else:  # fp8 e4m3 (max normal ~448)
        scale = jnp.where(amax > 0, amax / 448.0, 1.0)
        q = (w / scale).astype(wdtype)
    return q, scale.astype(jnp.float32)


# ---------------------------------------------------------------------------
# Pallas kernel: per output-column tile j:
#   linear1 (full) -> SiLU -> linear2 (columns of tile j)
# linear1 is recomputed per tile: it is tiny (~8 MFLOP) and hides entirely
# under the streamed w2 DMA, and it keeps grid steps independent ("parallel").
# ---------------------------------------------------------------------------
def _time_embedding_kernel(x_ref, w1_ref, s1_ref, b1_ref,
                           w2_ref, s2_ref, b2_ref, o_ref):
    # linear1: (Mp, Kp) @ (Kp, N1p) on the MXU, f32 accumulation.
    h = jnp.dot(x_ref[...], w1_ref[...].astype(jnp.bfloat16),
                preferred_element_type=jnp.float32)
    h = h * s1_ref[...] + b1_ref[...]            # per-channel dequant + bias (f32)
    h = h * jax.nn.sigmoid(h)                    # SiLU in f32 (EUP/VPU)
    # linear2 tile: (Mp, N1p) @ (N1p, TN2) on the MXU, f32 accumulation.
    out = jnp.dot(h.astype(jnp.bfloat16), w2_ref[...].astype(jnp.bfloat16),
                  preferred_element_type=jnp.float32)
    o_ref[...] = (out * s2_ref[...] + b2_ref[...]).astype(o_ref.dtype)


# ---------------------------------------------------------------------------
# Parameter init (PyTorch nn.Linear layout: w (fout, fin), b (fout,))
# ---------------------------------------------------------------------------
def init_time_embedding(key, n_embd):
    k1, k2, k3, k4 = jax.random.split(key, 4)
    lim1 = 1.0 / (n_embd ** 0.5)
    lim2 = 1.0 / ((4 * n_embd) ** 0.5)
    return {
        'w1': jax.random.uniform(k1, (4 * n_embd, n_embd), jnp.float32,
                                 -lim1, lim1),
        'b1': jax.random.uniform(k2, (4 * n_embd,), jnp.float32, -lim1, lim1),
        'w2': jax.random.uniform(k3, (4 * n_embd, 4 * n_embd), jnp.float32,
                                 -lim2, lim2),
        'b2': jax.random.uniform(k4, (4 * n_embd,), jnp.float32, -lim2, lim2),
    }


# ---------------------------------------------------------------------------
# Wrapper: one-time weight layout/quant, returns (forward, reference)
# `reference` is a pure-JAX f32 fn over the exact (dequantized) weights the
# kernel consumes, for a tight kernel-correctness check.
# ---------------------------------------------------------------------------
def make_time_embedding(params, *, weight_dtype=None):
    if weight_dtype is None:
        weight_dtype = _default_weight_dtype()

    w1, b1, w2, b2 = params['w1'], params['b1'], params['w2'], params['b2']
    N1, K = w1.shape                 # (4*n_embd, n_embd)
    N2 = w2.shape[0]                 # 4*n_embd
    Kp = _round_up(K, 128)
    N1p = _round_up(N1, 128)
    N2p = _round_up(N2, 128)
    TN2 = _pick_n2_tile(N2p)
    nj = N2p // TN2

    # One-time: transpose to (K, N), pad to lane multiples, quantize/cast.
    w1_t = jnp.pad(w1.T.astype(jnp.float32), ((0, Kp - K), (0, N1p - N1)))
    w2_t = jnp.pad(w2.T.astype(jnp.float32), ((0, N1p - N1), (0, N2p - N2)))
    w1_q, s1 = _quantize_cols(w1_t, weight_dtype)
    w2_q, s2 = _quantize_cols(w2_t, weight_dtype)
    b1_p = jnp.pad(b1, (0, N1p - N1)).reshape(1, N1p).astype(jnp.float32)
    b2_p = jnp.pad(b2, (0, N2p - N2)).reshape(1, N2p).astype(jnp.float32)

    def forward(x):
        M = x.shape[0]
        Mp = _round_up(max(M, 16), 16)   # 16 sublanes: clean bf16 MXU operand
        x_p = jnp.pad(x, ((0, Mp - M), (0, Kp - K))).astype(jnp.bfloat16)

        out = pl.pallas_call(
            _time_embedding_kernel,
            out_shape=jax.ShapeDtypeStruct((Mp, N2p), jnp.float32),
            grid=(nj,),
            in_specs=[
                pl.BlockSpec((Mp, Kp),   lambda j: (0, 0)),   # x   (resident)
                pl.BlockSpec((Kp, N1p),  lambda j: (0, 0)),   # w1  (resident)
                pl.BlockSpec((1, N1p),   lambda j: (0, 0)),   # s1
                pl.BlockSpec((1, N1p),   lambda j: (0, 0)),   # b1
                pl.BlockSpec((N1p, TN2), lambda j: (0, j)),   # w2  (streamed)
                pl.BlockSpec((1, TN2),   lambda j: (0, j)),   # s2
                pl.BlockSpec((1, TN2),   lambda j: (0, j)),   # b2
            ],
            out_specs=pl.BlockSpec((Mp, TN2), lambda j: (0, j)),
            compiler_params=pltpu.CompilerParams(
                dimension_semantics=("parallel",)),           # v7x: 2 TCs
        )(x_p, w1_q, s1, b1_p, w2_q, s2, b2_p)
        return out[:M, :N2]

    # f32 reference over the exact dequantized weights the kernel loads.
    w1_deq = (w1_q.astype(jnp.float32) * s1)[:K, :N1]
    w2_deq = (w2_q.astype(jnp.float32) * s2)[:N1, :N2]

    def reference(x):
        h = jnp.dot(x.astype(jnp.float32), w1_deq,
                    precision=jax.lax.Precision.HIGHEST) + b1
        h = h * jax.nn.sigmoid(h)
        return jnp.dot(h, w2_deq, precision=jax.lax.Precision.HIGHEST) + b2

    return forward, reference


# ---------------------------------------------------------------------------
# Entry point
# ---------------------------------------------------------------------------
if __name__ == "__main__":
    n_embd = 320          # Stable-Diffusion time-embedding width
    B = 1                 # `time` is (1, n_embd) in the SD UNet
    # TODO(synk): batching several timesteps (M -> 128+) amortizes the weight
    # read; left at the module's canonical B=1 here.

    key = jax.random.PRNGKey(0)
    kp, kx = jax.random.split(key)
    params = init_time_embedding(kp, n_embd)
    x = jax.random.normal(kx, (B, n_embd), jnp.float32)

    fwd, ref_fn = make_time_embedding(params)
    out = jax.block_until_ready(jax.jit(fwd)(x))

    assert out.shape == (B, 4 * n_embd), out.shape
    assert bool(jnp.all(jnp.isfinite(out)))

    # (a) Kernel vs f32 reference over the exact weights the kernel consumes
    #     (only bf16 activation casts / accumulation order differ).
    ref_q = ref_fn(x)
    assert bool(jnp.allclose(out, ref_q, atol=2e-2, rtol=2e-2)), \
        float(jnp.max(jnp.abs(out - ref_q)))

    # (b) Loose check vs the original full-f32 module (guards against gross
    #     quantization/scale bugs; slack covers int8/fp8 weight quant noise).
    ref = x @ params['w1'].T + params['b1']
    ref = ref * jax.nn.sigmoid(ref)
    ref = ref @ params['w2'].T + params['b2']
    assert bool(jnp.allclose(out, ref, atol=1.5e-1, rtol=1.5e-1)), \
        float(jnp.max(jnp.abs(out - ref)))

    print("KERNEL_OK")
</pallas_src>

<mosaic_0001>
module attributes {stable_mosaic.version = 11 : i64} {
  func.func @_time_embedding_kernel(%arg0: i32, %arg1: memref<16x384xbf16, #tpu.memory_space<vmem>>, %arg2: memref<384x1280xbf16, #tpu.memory_space<vmem>>, %arg3: memref<1x1280xf32, #tpu.memory_space<vmem>>, %arg4: memref<1x1280xf32, #tpu.memory_space<vmem>>, %arg5: memref<1280x640xbf16, #tpu.memory_space<vmem>>, %arg6: memref<1x640xf32, #tpu.memory_space<vmem>>, %arg7: memref<1x640xf32, #tpu.memory_space<vmem>>, %arg8: memref<16x640xf32, #tpu.memory_space<vmem>>) attributes {dimension_semantics = [#tpu.dimension_semantics<parallel>], iteration_bounds = array<i64: 2>, scalar_prefetch = 0 : i64, scratch_operands = 0 : i64, tpu.core_type = #tpu.core_type<tc>, window_params = [{pipeline_mode = #tpu.pipeline_mode<synchronous>, transform_indices = @transform_0, window_bounds = array<i64: 16, 384>}, {pipeline_mode = #tpu.pipeline_mode<synchronous>, transform_indices = @transform_1, window_bounds = array<i64: 384, 1280>}, {pipeline_mode = #tpu.pipeline_mode<synchronous>, transform_indices = @transform_2, window_bounds = array<i64: 1, 1280>}, {pipeline_mode = #tpu.pipeline_mode<synchronous>, transform_indices = @transform_3, window_bounds = array<i64: 1, 1280>}, {transform_indices = @transform_4, window_bounds = array<i64: 1280, 640>}, {transform_indices = @transform_5, window_bounds = array<i64: 1, 640>}, {transform_indices = @transform_6, window_bounds = array<i64: 1, 640>}, {transform_indices = @transform_7, window_bounds = array<i64: 16, 640>}]} {
    %c0 = arith.constant 0 : index
    %c0_0 = arith.constant 0 : index
    %0 = vector.load %arg1[%c0, %c0_0] : memref<16x384xbf16, #tpu.memory_space<vmem>>, vector<16x384xbf16>
    %c0_1 = arith.constant 0 : index
    %c0_2 = arith.constant 0 : index
    %1 = vector.load %arg2[%c0_1, %c0_2] : memref<384x1280xbf16, #tpu.memory_space<vmem>>, vector<384x1280xbf16>
    %cst = arith.constant dense<0.000000e+00> : vector<16x1280xf32>
    %2 = tpu.matmul %0, %1, %cst {dimension_numbers = #tpu.dot_dimension_numbers<[1], [0], [0], [1], [0, 0, 1, 1], [], []>} : vector<16x384xbf16>, vector<384x1280xbf16>, vector<16x1280xf32> -> vector<16x1280xf32>
    %c0_3 = arith.constant 0 : index
    %c0_4 = arith.constant 0 : index
    %3 = vector.load %arg3[%c0_3, %c0_4] : memref<1x1280xf32, #tpu.memory_space<vmem>>, vector<1x1280xf32>
    %4 = vector.broadcast %3 : vector<1x1280xf32> to vector<16x1280xf32>
    %5 = arith.mulf %2, %4 : vector<16x1280xf32>
    %c0_5 = arith.constant 0 : index
    %c0_6 = arith.constant 0 : index
    %6 = vector.load %arg4[%c0_5, %c0_6] : memref<1x1280xf32, #tpu.memory_space<vmem>>, vector<1x1280xf32>
    %7 = vector.broadcast %6 : vector<1x1280xf32> to vector<16x1280xf32>
    %8 = arith.addf %5, %7 : vector<16x1280xf32>
    %9 = arith.negf %8 : vector<16x1280xf32>
    %10 = math.exp %9 : vector<16x1280xf32>
    %cst_7 = arith.constant 1.000000e+00 : f32
    %11 = vector.broadcast %cst_7 : f32 to vector<16x1280xf32>
    %12 = arith.addf %11, %10 : vector<16x1280xf32>
    %13 = arith.divf %11, %12 : vector<16x1280xf32>
    %14 = arith.mulf %8, %13 : vector<16x1280xf32>
    %15 = arith.truncf %14 : vector<16x1280xf32> to vector<16x1280xbf16>
    %c0_8 = arith.constant 0 : index
    %c0_9 = arith.constant 0 : index
    %16 = vector.load %arg5[%c0_8, %c0_9] : memref<1280x640xbf16, #tpu.memory_space<vmem>>, vector<1280x640xbf16>
    %cst_10 = arith.constant dense<0.000000e+00> : vector<16x640xf32>
    %17 = tpu.matmul %15, %16, %cst_10 {dimension_numbers = #tpu.dot_dimension_numbers<[1], [0], [0], [1], [0, 0, 1, 1], [], []>} : vector<16x1280xbf16>, vector<1280x640xbf16>, vector<16x640xf32> -> vector<16x640xf32>
    %c0_11 = arith.constant 0 : index
    %c0_12 = arith.constant 0 : index
    %18 = vector.load %arg6[%c0_11, %c0_12] : memref<1x640xf32, #tpu.memory_space<vmem>>, vector<1x640xf32>
    %19 = vector.broadcast %18 : vector<1x640xf32> to vector<16x640xf32>
    %20 = arith.mulf %17, %19 : vector<16x640xf32>
    %c0_13 = arith.constant 0 : index
    %c0_14 = arith.constant 0 : index
    %21 = vector.load %arg7[%c0_13, %c0_14] : memref<1x640xf32, #tpu.memory_space<vmem>>, vector<1x640xf32>
    %22 = vector.broadcast %21 : vector<1x640xf32> to vector<16x640xf32>
    %23 = arith.addf %20, %22 : vector<16x640xf32>
    %c0_15 = arith.constant 0 : index
    %c0_16 = arith.constant 0 : index
    %24 = vector.load %arg8[%c0_15, %c0_16] : memref<16x640xf32, #tpu.memory_space<vmem>>, vector<16x640xf32>
    tpu.vector_store %arg8[%c0_15, %c0_16], %23 {strides = array<i32>} : memref<16x640xf32, #tpu.memory_space<vmem>>, vector<16x640xf32>,
    return
  }
  func.func @transform_0(%arg0: i32) -> (i32, i32) {
    %c0_i32 = arith.constant 0 : i32
    %c0_i32_0 = arith.constant 0 : i32
    %c0_i32_1 = arith.constant 0 : i32
    return %c0_i32, %c0_i32_0 : i32, i32
  }
  func.func @transform_1(%arg0: i32) -> (i32, i32) {
    %c0_i32 = arith.constant 0 : i32
    %c0_i32_0 = arith.constant 0 : i32
    %c0_i32_1 = arith.constant 0 : i32
    return %c0_i32, %c0_i32_0 : i32, i32
  }
  func.func @transform_2(%arg0: i32) -> (i32, i32) {
    %c0_i32 = arith.constant 0 : i32
    %c0_i32_0 = arith.constant 0 : i32
    %c0_i32_1 = arith.constant 0 : i32
    return %c0_i32, %c0_i32_0 : i32, i32
  }
  func.func @transform_3(%arg0: i32) -> (i32, i32) {
    %c0_i32 = arith.constant 0 : i32
    %c0_i32_0 = arith.constant 0 : i32
    %c0_i32_1 = arith.constant 0 : i32
    return %c0_i32, %c0_i32_0 : i32, i32
  }
  func.func @transform_4(%arg0: i32) -> (i32, i32) {
    %c0_i32 = arith.constant 0 : i32
    %c0_i32_0 = arith.constant 0 : i32
    return %c0_i32, %arg0 : i32, i32
  }
  func.func @transform_5(%arg0: i32) -> (i32, i32) {
    %c0_i32 = arith.constant 0 : i32
    %c0_i32_0 = arith.constant 0 : i32
    return %c0_i32, %arg0 : i32, i32
  }
  func.func @transform_6(%arg0: i32) -> (i32, i32) {
    %c0_i32 = arith.constant 0 : i32
    %c0_i32_0 = arith.constant 0 : i32
    return %c0_i32, %arg0 : i32, i32
  }
  func.func @transform_7(%arg0: i32) -> (i32, i32) {
    %c0_i32 = arith.constant 0 : i32
    %c0_i32_0 = arith.constant 0 : i32
    return %c0_i32, %arg0 : i32, i32
  }
}

</mosaic_0001>

<bundles_post_ra>
// kernel: forward.1
= control target key start
LH: loop header
LB: loop body
LE: loop exit
PB: predicated region body
PF: predicated region fallthrough
CT: control target
= control target key end

     0   :  { %s12021_s0 = inlined_call_operand.vmem [shape: bf16[16,384], index: 0, kind: input, shape index: {}]   ;;  %s12022_s1 = inlined_call_operand.hbm [shape: bf16[384,1280], index: 1, kind: input, shape index: {}]   ;;  %s12023_s2 = inlined_call_operand.vmem [shape: f32[1,1280], index: 2, kind: input, shape index: {}, may-alias: {2,5}]   ;;  %s12024_s3 = inlined_call_operand.hbm [shape: f32[1,1280], index: 3, kind: input, shape index: {}]   ;;  %s12025_s4 = inlined_call_operand.hbm [shape: bf16[1280,1280], index: 4, kind: input, shape index: {}]   ;;  %s12026_s5 = inlined_call_operand.vmem [shape: f32[1,1280], index: 5, kind: input, shape index: {}, may-alias: {2,5}]   ;;  %s12027_s6 = inlined_call_operand.hbm [shape: f32[1,1280], index: 6, kind: input, shape index: {}]   ;;  %s12028_s7 = inlined_call_operand.vmem [shape: f32[16,1280], index: 7, kind: output, shape index: {}]  }
   0x1   :  { %12032 = sst [smem:[#allocation15_spill]] %s12022_s1 }
   0x2   :  { %12033 = sst [smem:[#allocation16_spill]] %s12025_s4 }
   0x3   :  { %12034 = sst [smem:[#allocation17_spill]] %s12028_s7 }
   0x4   :  { %12 = vsyncpa [#allocation3], 0 }
   0x5   :  { %13 = vsyncpa [#allocation5], 0  ;;  %s9846_s24 = smov 0   ;;  %s9848_s25 = smov 0  }
   0x6   :  { %s9850_s26 = smov 0   ;;  %s9852_s27 = smov 0  }
   0x7 LB: > { %s9865_s28 = sadd.s32 4294967295, %s9798_s27   ;;  %s9868_s29 = sadd.s32 1, %s9798_s27   ;;  %s9798_s27 = sphi %s9852_s27, %s12118_s27   ;;  %s9794_s26 = sphi %s9850_s26, %s12122_s26   ;;  %s9790_s25 = sphi %s9848_s25, %s12121_s25   ;;  %s9786_s24 = sphi %s9846_s24, %s12120_s24  }
   0x8   : > { %12035 = sst [smem:[#allocation12_spill]] %s9868_s29  ;;  %s107_s30 = ssub.s32 %s9798_s27, %s9868_s29 }
   0x9   : > { %s110_s8 = sadd.s32 1, %s9794_s26  ;;  %p108_p0 = scmp.eq.s32.totalorder %s107_s30, 0 }
   0xa   : > { %p117_p1 = scmp.ne.s32.totalorder %s9794_s26, %s9790_s25  ;;  %p118_p2 = scmp.eq.s32.totalorder %s9798_s27, 0 }
   0xb   : > { %p123_p3 = scmp.ne.s32.totalorder %s9790_s25, %s9786_s24  ;;  %p124_p5 = scmp.eq.s32.totalorder %s9865_s28, 0 }
   0xc   : > { %s9878_s9 = scalar_select %p108_p0, %s9794_s26, %s110_s8  }
   0xd   : > { %p9880_p4 = por %p118_p2, %p117_p1  ;;  %p199_p6 = scmp.eq.s32.totalorder %s9865_s28, 1 }
   0xe   : > { %12036 = sst [smem:[#allocation13_spill]] %s9878_s9  ;;  %p6230_p7 = scmp.ge.s32.totalorder %s9798_s27, 1 }
   0xf   : > { %p9889_p8 = por %p124_p5, %p123_p3  ;;  %p212_p9 = scmp.lt.s32.totalorder %s9798_s27, 3 }
  0x10   : > { %p9894_p10 = por %p199_p6, %p117_p1  ;;  %s12042_s1 = sld [smem:[#allocation15_spill]] }
  0x11   : > { %p9898_p11 = pnand %p6230_p7, %p212_p9  ;;  %s9800_s17 = smov [#allocation2]  }
  0x12   : > { %s12039_s12 = scalar_select %p9894_p10, 1, 0 }
  0x13   : > { %p9495_p12 = pneg %p9898_p11  ;;  %s228_s18 = sshll.u32 %s9800_s17, 4  ;;  %s229_s18 = int_to_ptr.vmem [resolvable:$true] %s228_s18 }
  0x14   : > { %12040 = sst [smem:[#allocation14_spill]] %s12039_s12  ;;  %p9511_p0 = scmp.lt.s32.totalorder %s9798_s27, 2 }
  0x15   : > { %p9909_p13 = pnand %p9495_p12, %p124_p5  ;;  %s257_s20 = sand.u32 1, %s9798_s27  }
  0x16   : > { %s226_s16 = sshll.u32 %s12042_s1, 4  ;;  %s9801_s21 = smov 640   ;;  %s227_s16 = int_to_ptr.hbm [resolvable:$true] %s226_s16 }
  0x17   : > { %s9802_s22 = smov 40   ;;  %p9921_p1 = pnand %p9511_p0, %p9880_p4 }
  0x18   : > { %9498 = dma.hbm_to_vmem [thread:$0]  (!%p9909_p13), %s227_s16, 30720, %s229_s18, [#allocation3], %s9801_s21, %s9801_s21, %s9802_s22  }
  0x19   : > { %s259_s24 = sand.u32 1, %s9794_s26   ;;  %s8833_s30 = smul.u32 20, %s9798_s27 }
  0x1a   : > { %s9478_s8 = smul.u32 3200, %s259_s24  ;;  %s12045_s4 = sld [smem:[#allocation16_spill]] }
  0x1b   : > { %s9932_s10 = scalar_lea.sflag [#allocation3], %s257_s20  ;;  %p9670_p3 = pneg %p9921_p1 }
  0x1c   : > { %s261_s9 = scalar_lea.vmem [#allocation6], %s9478_s8 }
  0x1d   : > { %s269_s29 = sshll.u32 %s261_s9, 4  ;;  %s270_s29 = int_to_ptr.vmem [resolvable:$true] %s269_s29 }
  0x20   : > { %s266_s17 = scalar_lea.hbm %s12045_s4, %s8833_s30  ;;  %s9673_s30 = scalar_lea.hbm %s12045_s4, 6400 }
  0x21   : > { %s267_s1 = sshll.u32 %s266_s17, 4  ;;  %s268_s1 = int_to_ptr.hbm [resolvable:$true] %s267_s1 }
  0x22   : > { %s9666_s16 = sshra.s32 %s268_s1, 4  ;;  %s9667_s16 = int_to_ptr.hbm [resolvable:$true] %s9666_s16 }
  0x23   : > { %s9668_s18 = scalar_lea.hbm %s9667_s16, 3200  ;;  %p9674_p7 = scmp.lt.s32.totalorder %s9667_s16, %s12045_s4 }
  0x24   : > { %p9669_p2 = scmp.ne.s32.totalorder %s9667_s16, %s9668_s18  ;;  %p9675_p9 = scmp.lt.s32.totalorder %s9673_s30, %s9668_s18 }
  0x26   : > { %p9671_p4 = pnand %p9670_p3, %p9669_p2  ;;  %p9676_p12 = por %p9675_p9, %p9674_p7 }
  0x28   : > { %p9672_p6 = pneg %p9671_p4 }
  0x2a   : > { %p9677_p0 = pnand %p9676_p12, %p9672_p6 }
  0x2c   : > { %9680 = shalt.err (!%p9677_p0)
}
  0x2d   : > { %s9803_s9 = smov 320   ;;  %s9804_s20 = smov 20  }
  0x2e   : > { %9505 = dma.hbm_to_vmem [thread:$0]  (!%p9921_p1), %s268_s1, 51200, %s270_s29, %s9932_s10, %s9801_s21, %s9803_s9, %s9804_s20  }
  0x2f   : > { %s244_s14 = sshll.u32 %s12024_s3, 4  ;;  %s9805_s16 = smov [#allocation4]   ;;  %s245_s14 = int_to_ptr.hbm [resolvable:$true] %s244_s14 }
  0x30   : > { %s246_s18 = sshll.u32 %s9805_s16, 4  ;;  %s9479_s30 = smul.u32 5, %s259_s24  ;;  %s247_s18 = int_to_ptr.vmem [resolvable:$true] %s246_s18 }
  0x31   : > { %9501 = dma.hbm_to_vmem [thread:$0]  (!%p9909_p13), %s245_s14, 160, %s247_s18, [#allocation5]  }
  0x32   : > { %s292_s15 = smul.u32 5, %s9798_s27  ;;  %s291_s8 = scalar_lea.vmem [#allocation7], %s9479_s30 }
  0x33   : > { %s299_s4 = sshll.u32 %s291_s8, 4  ;;  %s9733_s27 = scalar_lea.hbm %s12027_s6, 10  ;;  %s300_s4 = int_to_ptr.vmem [resolvable:$true] %s299_s4 }
  0x34   : > { %s295_s1 = scalar_lea.hbm %s12027_s6, %s292_s15 }
  0x35   : > { %s297_s29 = sshll.u32 %s295_s1, 4  ;;  %s298_s29 = int_to_ptr.hbm [resolvable:$true] %s297_s29 }
  0x36   : > { %s9726_s21 = sshra.s32 %s298_s29, 4  ;;  %s9727_s21 = int_to_ptr.hbm [resolvable:$true] %s9726_s21 }
  0x37   : > { %s9728_s9 = scalar_lea.hbm %s9727_s21, 5  ;;  %p9734_p13 = scmp.lt.s32.totalorder %s9727_s21, %s12027_s6 }
  0x38   : > { %p9729_p2 = scmp.ne.s32.totalorder %s9727_s21, %s9728_s9  ;;  %p9735_p7 = scmp.lt.s32.totalorder %s9733_s27, %s9728_s9 }
  0x3a   : > { %p9731_p4 = pnand %p9729_p2, %p9670_p3  ;;  %p9736_p9 = por %p9735_p7, %p9734_p13 }
  0x3c   : > { %p9732_p6 = pneg %p9731_p4 }
  0x3e   : > { %p9737_p12 = pnand %p9736_p9, %p9732_p6 }
  0x40   : > { %9740 = shalt.err (!%p9737_p12)
}
  0x41   : > { %9508 = dma.hbm_to_vmem [thread:$0]  (!%p9921_p1), %s298_s29, 80, %s300_s4, %s9932_s10  }
  0x42   : > { %308 = sbr.rel (%p9898_p11) target bundleno = 955 (0x3bb), region = 48 }
  0x47   : > { %9773 = dma.done.wait (%p124_p5), [#allocation3], 30720  }
  0x48   : > { %9775 = vsyncadd (%p124_p5), [#allocation3], 4294936576 }
  0x49   : > { %9777 = dma.done.wait (%p124_p5), [#allocation5], 160  }
  0x4a   : > { %9779 = vsyncadd (%p124_p5), [#allocation5], 4294967136  ;;  %s320_s7 = sand.u32 1, %s9865_s28   ;;  %s9984_s4 = sand.u32 1, %s9790_s25  }
  0x4b   : > { %s9480_s12 = smul.u32 3200, %s9984_s4  ;;  %s321_s13 = scalar_lea.sflag [#allocation3], %s320_s7 }
  0x4d   : > { %s9987_s23 = scalar_lea.vmem [#allocation6], %s9480_s12 }
  0x4e   : > { %9781 = dma.done.wait (%p9889_p8), %s321_s13, 51280  }
  0x4f   : > { %9783 = vsyncadd (%p9889_p8), %s321_s13, 4294916016  ;;  %v6532_v0 = vld [vmem:[#allocation2 + $0x230] sm:$0xf]  ;;  %v8912_v1 = vld [vmem:[#allocation2 + $0x254] sm:$0xf0]  ;;  %s375_s7 = smul.u32 5, %s9865_s28 }
  0x50   : > { %v6852_v2 = vld [vmem:[#allocation2 + $0x4b0] sm:$0xf]  ;;  %v6533_v3 = vor.u32 %v8912_v1, %v6532_v0  ;;  %v8992_v4 = vld [vmem:[#allocation2 + $0x4d4] sm:$0xf0]  ;;  %v8907_v9 = vld [vmem:[#allocation2 + $0x234] sm:$0xf] }
  0x51   : > { %v7172_v5 = vld [vmem:[#allocation2 + $0x730] sm:$0xf]  ;;  %v9072_v6 = vld [vmem:[#allocation2 + $0x754] sm:$0xf0]  ;;  %v6853_v7 = vor.u32 %v8992_v4, %v6852_v2  ;;  %v6534_v10 = vld [vmem:[#allocation2 + $0x258] sm:$0xf0] }
  0x52   : > { %v7173_v8 = vor.u32 %v9072_v6, %v7172_v5  ;;  %v6492_v11 = vld [vmem:[#allocation2 + $0x1e0] sm:$0xf]  ;;  %1842 = vmatpush.bf16.msra.mxu0 %v6533_v3  ;;  %v6537_v12 = vor.u32 %v8907_v9, %v6534_v10  ;;  %v8902_v13 = vld [vmem:[#allocation2 + $0x204] sm:$0xf0]  ;;  %v8897_v20 = vld [vmem:[#allocation2 + $0x1e4] sm:$0xf] }
  0x53   : > { %v6812_v14 = vld [vmem:[#allocation2 + $0x460] sm:$0xf]  ;;  %v8982_v15 = vld [vmem:[#allocation2 + $0x484] sm:$0xf0]  ;;  %1856 = vmatpush.bf16.msra.mxu1 %v6853_v7  ;;  %v6493_v16 = vor.u32 %v8902_v13, %v6492_v11  ;;  %v6494_v22 = vld [vmem:[#allocation2 + $0x208] sm:$0xf0] }
  0x54   : > { %1870 = vmatpush.bf16.msra.mxu2 %v7173_v8  ;;  %v6813_v17 = vor.u32 %v8982_v15, %v6812_v14  ;;  %v7132_v18 = vld [vmem:[#allocation2 + $0x6e0] sm:$0xf]  ;;  %v9062_v19 = vld [vmem:[#allocation2 + $0x704] sm:$0xf0]  ;;  %1884 = vmatpush.bf16.msra.mxu3 %v6537_v12  ;;  %v6452_v23 = vld [vmem:[#allocation2 + $0x190] sm:$0xf]  ;;  %v6497_v25 = vor.u32 %v8897_v20, %v6494_v22 }
  0x55   : > { %v7133_v21 = vor.u32 %v9062_v19, %v7132_v18  ;;  %v8892_v24 = vld [vmem:[#allocation2 + $0x1b4] sm:$0xf0]  ;;  %v6772_v26 = vld [vmem:[#allocation2 + $0x410] sm:$0xf]  ;;  %v8887_v31 = vld [vmem:[#allocation2 + $0x194] sm:$0xf] }
  0x56   : > { %v8972_v27 = vld [vmem:[#allocation2 + $0x434] sm:$0xf0]  ;;  %v7092_v28 = vld [vmem:[#allocation2 + $0x690] sm:$0xf]  ;;  %1843 = vmatpush.bf16.msra.mxu0 %v6493_v16  ;;  %v6453_v29 = vor.u32 %v8892_v24, %v6452_v23  ;;  %v6454_v32 = vld [vmem:[#allocation2 + $0x1b8] sm:$0xf0] }
  0x57   : > { %v9052_v30 = vld [vmem:[#allocation2 + $0x6b4] sm:$0xf0]  ;;  %1857 = vmatpush.bf16.msra.mxu1 %v6813_v17  ;;  %v6773_v33 = vor.u32 %v8972_v27, %v6772_v26  ;;  %v6412_v35 = vld [vmem:[#allocation2 + $0x140] sm:$0xf]  ;;  %v8882_v36 = vld [vmem:[#allocation2 + $0x164] sm:$0xf0]  ;;  %v6457_v38 = vor.u32 %v8887_v31, %v6454_v32 }
  0x58   : > { %1871 = vmatpush.bf16.msra.mxu2 %v7133_v21  ;;  %v7093_v34 = vor.u32 %v9052_v30, %v7092_v28  ;;  %v6732_v37 = vld [vmem:[#allocation2 + $0x3c0] sm:$0xf]  ;;  %1885 = vmatpush.bf16.msra.mxu3 %v6497_v25  ;;  %v8962_v39 = vld [vmem:[#allocation2 + $0x3e4] sm:$0xf0]  ;;  %v8877_v42 = vld [vmem:[#allocation2 + $0x144] sm:$0xf]  ;;  %v6413_v44 = vor.u32 %v8882_v36, %v6412_v35 }
  0x59   : > { %v7052_v40 = vld [vmem:[#allocation2 + $0x640] sm:$0xf]  ;;  %v9042_v41 = vld [vmem:[#allocation2 + $0x664] sm:$0xf0]  ;;  %v6414_v43 = vld [vmem:[#allocation2 + $0x168] sm:$0xf0]  ;;  %v6733_v45 = vor.u32 %v8962_v39, %v6732_v37 }
  0x5a   : > { %1844 = vmatpush.bf16.msra.mxu0 %v6453_v29  ;;  %v7053_v46 = vor.u32 %v9042_v41, %v7052_v40  ;;  %v6372_v47 = vld [vmem:[#allocation2 + $0xf0] sm:$0xf]  ;;  %v8872_v48 = vld [vmem:[#allocation2 + $0x114] sm:$0xf0]  ;;  %v6417_v50 = vor.u32 %v8877_v42, %v6414_v43  ;;  %v8867_v54 = vld [vmem:[#allocation2 + $0xf4] sm:$0xf] }
  0x5b   : > { %1858 = vmatpush.bf16.msra.mxu1 %v6773_v33  ;;  %v6692_v49 = vld [vmem:[#allocation2 + $0x370] sm:$0xf]  ;;  %v8952_v51 = vld [vmem:[#allocation2 + $0x394] sm:$0xf0]  ;;  %v6374_v55 = vld [vmem:[#allocation2 + $0x118] sm:$0xf0]  ;;  %v6373_v56 = vor.u32 %v8872_v48, %v6372_v47 }
  0x5c   : > { %1872 = vmatpush.bf16.msra.mxu2 %v7093_v34  ;;  %1886 = vmatpush.bf16.msra.mxu3 %v6457_v38  ;;  %v7012_v52 = vld [vmem:[#allocation2 + $0x5f0] sm:$0xf]  ;;  %v9032_v53 = vld [vmem:[#allocation2 + $0x614] sm:$0xf0]  ;;  %v6693_v57 = vor.u32 %v8952_v51, %v6692_v49  ;;  %v6332_v59 = vld [vmem:[#allocation2 + $0xa0] sm:$0xf]  ;;  %v6377_v62 = vor.u32 %v8867_v54, %v6374_v55 }
  0x5d   : > { %v7013_v58 = vor.u32 %v9032_v53, %v7012_v52  ;;  %v8862_v60 = vld [vmem:[#allocation2 + $0xc4] sm:$0xf0]  ;;  %v6652_v61 = vld [vmem:[#allocation2 + $0x320] sm:$0xf]  ;;  %v8857_v2 = vld [vmem:[#allocation2 + $0xa4] sm:$0xf] }
  0x5e   : > { %1845 = vmatpush.bf16.msra.mxu0 %v6413_v44  ;;  %v8942_v63 = vld [vmem:[#allocation2 + $0x344] sm:$0xf0]  ;;  %v6972_v0 = vld [vmem:[#allocation2 + $0x5a0] sm:$0xf]  ;;  %v6334_v3 = vld [vmem:[#allocation2 + $0xc8] sm:$0xf0]  ;;  %v6333_v4 = vor.u32 %v8862_v60, %v6332_v59 }
  0x5f   : > { %1859 = vmatpush.bf16.msra.mxu1 %v6733_v45  ;;  %v9022_v1 = vld [vmem:[#allocation2 + $0x5c4] sm:$0xf0]  ;;  %v6653_v5 = vor.u32 %v8942_v63, %v6652_v61  ;;  %v6292_v7 = vld [vmem:[#allocation2 + $0x50] sm:$0xf]  ;;  %v8852_v8 = vld [vmem:[#allocation2 + $0x74] sm:$0xf0]  ;;  %v6337_v10 = vor.u32 %v8857_v2, %v6334_v3 }
  0x60   : > { %1873 = vmatpush.bf16.msra.mxu2 %v7053_v46  ;;  %1887 = vmatpush.bf16.msra.mxu3 %v6417_v50  ;;  %v6973_v6 = vor.u32 %v9022_v1, %v6972_v0  ;;  %v6612_v9 = vld [vmem:[#allocation2 + $0x2d0] sm:$0xf]  ;;  %v8932_v11 = vld [vmem:[#allocation2 + $0x2f4] sm:$0xf0]  ;;  %v8847_v14 = vld [vmem:[#allocation2 + $0x54] sm:$0xf]  ;;  %v6293_v17 = vor.u32 %v8852_v8, %v6292_v7 }
  0x61   : > { %v6932_v12 = vld [vmem:[#allocation2 + $0x550] sm:$0xf]  ;;  %v9012_v13 = vld [vmem:[#allocation2 + $0x574] sm:$0xf0]  ;;  %v6294_v15 = vld [vmem:[#allocation2 + $0x78] sm:$0xf0]  ;;  %v6613_v21 = vor.u32 %v8932_v11, %v6612_v9 }
  0x62   : > { %1846 = vmatpush.bf16.msra.mxu0 %v6373_v56  ;;  %v6252_v16 = vld [vmem:[#allocation2] sm:$0xf]  ;;  %v8842_v18 = vld [vmem:[#allocation2 + $0x24] sm:$0xf0]  ;;  %v6933_v22 = vor.u32 %v9012_v13, %v6932_v12  ;;  %v8837_v25 = vld [vmem:[#allocation2 + $0x4] sm:$0xf]  ;;  %v6297_v26 = vor.u32 %v8847_v14, %v6294_v15 }
  0x63   : > { %1860 = vmatpush.bf16.msra.mxu1 %v6693_v57  ;;  %v6572_v19 = vld [vmem:[#allocation2 + $0x280] sm:$0xf]  ;;  %v8922_v20 = vld [vmem:[#allocation2 + $0x2a4] sm:$0xf0]  ;;  %v6254_v27 = vld [vmem:[#allocation2 + $0x28] sm:$0xf0]  ;;  %v6253_v33 = vor.u32 %v8842_v18, %v6252_v16 }
  0x64   : > { %1874 = vmatpush.bf16.msra.mxu2 %v7013_v58  ;;  %1888 = vmatpush.bf16.msra.mxu3 %v6377_v62  ;;  %v6892_v23 = vld [vmem:[#allocation2 + $0x500] sm:$0xf]  ;;  %v9002_v24 = vld [vmem:[#allocation2 + $0x524] sm:$0xf0]  ;;  %v8987_v28 = vld [vmem:[#allocation2 + $0x4b4] sm:$0xf]  ;;  %v6573_v37 = vor.u32 %v8922_v20, %v6572_v19  ;;  %v6257_v42 = vor.u32 %v8837_v25, %v6254_v27 }
  0x65   : > { %v6854_v29 = vld [vmem:[#allocation2 + $0x4d8] sm:$0xf0]  ;;  %v9067_v30 = vld [vmem:[#allocation2 + $0x734] sm:$0xf]  ;;  %v6540_v32 = vld [vmem:[#allocation2 + $0x238] sm:$0xf]  ;;  %v6893_v38 = vor.u32 %v9002_v24, %v6892_v23 }
  0x66   : > { %1847 = vmatpush.bf16.msra.mxu0 %v6333_v4  ;;  %v7174_v31 = vld [vmem:[#allocation2 + $0x758] sm:$0xf0]  ;;  %v8913_v34 = vld [vmem:[#allocation2 + $0x25c] sm:$0xf0]  ;;  %v6860_v35 = vld [vmem:[#allocation2 + $0x4b8] sm:$0xf]  ;;  %v6857_v43 = vor.u32 %v8987_v28, %v6854_v29 }
  0x67   : > { %1861 = vmatpush.bf16.msra.mxu1 %v6653_v5  ;;  %v8993_v36 = vld [vmem:[#allocation2 + $0x4dc] sm:$0xf0]  ;;  %v6248_v39 = vld [vmem:[%s12021_s0 + $0x8] sm:$0xf]  ;;  %v8836_v40 = vld [vmem:[%s12021_s0 + $0x10] sm:$0xf0]  ;;  %v7177_v47 = vor.u32 %v9067_v30, %v7174_v31  ;;  %v6541_v48 = vor.u32 %v8913_v34, %v6540_v32 }
  0x68   : > { %1875 = vmatpush.bf16.msra.mxu2 %v6973_v6  ;;  %1889 = vmatpush.bf16.msra.mxu3 %v6337_v10  ;;  %v6240_v41 = vld [vmem:[%s12021_s0] sm:$0xf]  ;;  %v8835_v44 = vld [vmem:[%s12021_s0 + $0x8] sm:$0xf0]  ;;  %v8834_v45 = vld [vmem:[%s12021_s0 + $0x4] sm:$0xf]  ;;  %v6861_v52 = vor.u32 %v8993_v36, %v6860_v35  ;;  %v10011_v53 = vor.u32 %v8836_v40, %v6248_v39 }
  0x69   : > { %v6242_v46 = vld [vmem:[%s12021_s0 + $0xc] sm:$0xf0]  ;;  %v8977_v49 = vld [vmem:[#allocation2 + $0x464] sm:$0xf]  ;;  %v6814_v50 = vld [vmem:[#allocation2 + $0x488] sm:$0xf0]  ;;  %v10013_v59 = vor.u32 %v8835_v44, %v6240_v41 }
  0x6a   : > { %1848 = vmatpush.bf16.msra.mxu0 %v6293_v17  ;;  %v9057_v51 = vld [vmem:[#allocation2 + $0x6e4] sm:$0xf]  ;;  %v7134_v54 = vld [vmem:[#allocation2 + $0x708] sm:$0xf0]  ;;  %v6500_v55 = vld [vmem:[#allocation2 + $0x1e8] sm:$0xf]  ;;  %v10015_v60 = vor.u32 %v8834_v45, %v6242_v46  ;;  %v6817_v61 = vor.u32 %v8977_v49, %v6814_v50 }
  0x6b   : > { %1862 = vmatpush.bf16.msra.mxu1 %v6613_v21  ;;  %v8903_v56 = vld [vmem:[#allocation2 + $0x20c] sm:$0xf0]  ;;  %v6820_v57 = vld [vmem:[#allocation2 + $0x468] sm:$0xf]  ;;  %v7137_v62 = vor.u32 %v9057_v51, %v7134_v54  ;;  %v8967_v0 = vld [vmem:[#allocation2 + $0x414] sm:$0xf] }
  0x6c   : > { %1876 = vmatpush.bf16.msra.mxu2 %v6933_v22  ;;  %1890 = vmatpush.bf16.msra.mxu3 %v6297_v26  ;;  %v8983_v58 = vld [vmem:[#allocation2 + $0x48c] sm:$0xf0]  ;;  %v6501_v63 = vor.u32 %v8903_v56, %v6500_v55  ;;  %v6774_v1 = vld [vmem:[#allocation2 + $0x438] sm:$0xf0]  ;;  %v9047_v2 = vld [vmem:[#allocation2 + $0x694] sm:$0xf] }
  0x6d   : > { %v6821_v3 = vor.u32 %v8983_v58, %v6820_v57  ;;  %v7094_v4 = vld [vmem:[#allocation2 + $0x6b8] sm:$0xf0]  ;;  %v6460_v5 = vld [vmem:[#allocation2 + $0x198] sm:$0xf]  ;;  %v8893_v6 = vld [vmem:[#allocation2 + $0x1bc] sm:$0xf0]  ;;  %v6777_v9 = vor.u32 %v8967_v0, %v6774_v1 }
  0x6e   : > { %1849 = vmatpush.bf16.msra.mxu0 %v6253_v33  ;;  %v6780_v7 = vld [vmem:[#allocation2 + $0x418] sm:$0xf]  ;;  %v8973_v8 = vld [vmem:[#allocation2 + $0x43c] sm:$0xf0]  ;;  %v7097_v10 = vor.u32 %v9047_v2, %v7094_v4  ;;  %v6461_v11 = vor.u32 %v8893_v6, %v6460_v5  ;;  %v8957_v12 = vld [vmem:[#allocation2 + $0x3c4] sm:$0xf] }
  0x6f   : > { %1863 = vmatpush.bf16.msra.mxu1 %v6573_v37  ;;  %v6734_v13 = vld [vmem:[#allocation2 + $0x3e8] sm:$0xf0]  ;;  %v9037_v14 = vld [vmem:[#allocation2 + $0x644] sm:$0xf]  ;;  %v6781_v15 = vor.u32 %v8973_v8, %v6780_v7  ;;  %v6420_v17 = vld [vmem:[#allocation2 + $0x148] sm:$0xf] }
  0x70   : > { %1877 = vmatpush.bf16.msra.mxu2 %v6893_v38  ;;  %1891 = vmatpush.bf16.msra.mxu3 %v6257_v42  ;;  %v7054_v16 = vld [vmem:[#allocation2 + $0x668] sm:$0xf0]  ;;  %v8883_v18 = vld [vmem:[#allocation2 + $0x16c] sm:$0xf0]  ;;  %v6740_v19 = vld [vmem:[#allocation2 + $0x3c8] sm:$0xf]  ;;  %v6737_v21 = vor.u32 %v8957_v12, %v6734_v13 }
  0x71   : > { %1850 = vmatmul.bf16.vlgmr.msra.gmra.mxu0 %v10013_v59  ;;  %v8963_v20 = vld [vmem:[#allocation2 + $0x3ec] sm:$0xf0]  ;;  %v7057_v22 = vor.u32 %v9037_v14, %v7054_v16  ;;  %v6421_v23 = vor.u32 %v8883_v18, %v6420_v17  ;;  %v8947_v24 = vld [vmem:[#allocation2 + $0x374] sm:$0xf]  ;;  %v6694_v25 = vld [vmem:[#allocation2 + $0x398] sm:$0xf0] }
  0x72   : > { %1898 = vmatpush.bf16.msrb.mxu0 %v6857_v43  ;;  %1864 = vmatmul.bf16.vlgmr.msra.gmra.mxu1 %v10015_v60  ;;  %v9027_v26 = vld [vmem:[#allocation2 + $0x5f4] sm:$0xf]  ;;  %v6741_v27 = vor.u32 %v8963_v20, %v6740_v19  ;;  %v7014_v28 = vld [vmem:[#allocation2 + $0x618] sm:$0xf0]  ;;  %v6380_v29 = vld [vmem:[#allocation2 + $0xf8] sm:$0xf]  ;;  %v6697_v33 = vor.u32 %v8947_v24, %v6694_v25 }
  0x73   : > { %1912 = vmatpush.bf16.msrb.mxu1 %v7177_v47  ;;  %1878 = vmatmul.bf16.vlgmr.msra.gmra.mxu2 %v10011_v53  ;;  %v8873_v30 = vld [vmem:[#allocation2 + $0x11c] sm:$0xf0]  ;;  %v6700_v31 = vld [vmem:[#allocation2 + $0x378] sm:$0xf]  ;;  %v7017_v34 = vor.u32 %v9027_v26, %v7014_v28  ;;  %v8937_v36 = vld [vmem:[#allocation2 + $0x324] sm:$0xf] }
  0x74   : > { %1926 = vmatpush.bf16.msrb.mxu2 %v6541_v48  ;;  %1940 = vmatpush.bf16.msrb.mxu3 %v6861_v52  ;;  %v8953_v32 = vld [vmem:[#allocation2 + $0x39c] sm:$0xf0]  ;;  %v6381_v35 = vor.u32 %v8873_v30, %v6380_v29  ;;  %v6654_v37 = vld [vmem:[#allocation2 + $0x348] sm:$0xf0]  ;;  %v9017_v38 = vld [vmem:[#allocation2 + $0x5a4] sm:$0xf] }
  0x75   : > { %1892 = vmatmul.bf16.vlgmr.msra.gmra.mxu3 %v10013_v59  ;;  %v6701_v39 = vor.u32 %v8953_v32, %v6700_v31  ;;  %v6974_v40 = vld [vmem:[#allocation2 + $0x5c8] sm:$0xf0]  ;;  %v6340_v41 = vld [vmem:[#allocation2 + $0xa8] sm:$0xf]  ;;  %v8863_v42 = vld [vmem:[#allocation2 + $0xcc] sm:$0xf0]  ;;  %v6657_v45 = vor.u32 %v8937_v36, %v6654_v37 }
  0x76   : > { %1899 = vmatpush.bf16.msrb.mxu0 %v6817_v61  ;;  %v6660_v43 = vld [vmem:[#allocation2 + $0x328] sm:$0xf]  ;;  %v8943_v44 = vld [vmem:[#allocation2 + $0x34c] sm:$0xf0]  ;;  %v6977_v46 = vor.u32 %v9017_v38, %v6974_v40  ;;  %v6341_v47 = vor.u32 %v8863_v42, %v6340_v41  ;;  %v8927_v48 = vld [vmem:[#allocation2 + $0x2d4] sm:$0xf] }
  0x77   : > { %1913 = vmatpush.bf16.msrb.mxu1 %v7137_v62  ;;  %v6614_v49 = vld [vmem:[#allocation2 + $0x2f8] sm:$0xf0]  ;;  %v9007_v50 = vld [vmem:[#allocation2 + $0x554] sm:$0xf]  ;;  %v6661_v51 = vor.u32 %v8943_v44, %v6660_v43  ;;  %v6300_v54 = vld [vmem:[#allocation2 + $0x58] sm:$0xf] }
  0x78   : > { %1927 = vmatpush.bf16.msrb.mxu2 %v6501_v63  ;;  %1941 = vmatpush.bf16.msrb.mxu3 %v6821_v3  ;;  %v6934_v52 = vld [vmem:[#allocation2 + $0x578] sm:$0xf0]  ;;  %v8853_v55 = vld [vmem:[#allocation2 + $0x7c] sm:$0xf0]  ;;  %v6620_v56 = vld [vmem:[#allocation2 + $0x2d8] sm:$0xf]  ;;  %v6617_v58 = vor.u32 %v8927_v48, %v6614_v49 }
  0x79   : > { %v8933_v57 = vld [vmem:[#allocation2 + $0x2fc] sm:$0xf0]  ;;  %v8917_v61 = vld [vmem:[#allocation2 + $0x284] sm:$0xf]  ;;  %v6574_v62 = vld [vmem:[#allocation2 + $0x2a8] sm:$0xf0]  ;;  %v6937_v63 = vor.u32 %v9007_v50, %v6934_v52  ;;  %v6301_v0 = vor.u32 %v8853_v55, %v6300_v54 }
  0x7a   : > { %1900 = vmatpush.bf16.msrb.mxu0 %v6777_v9  ;;  %v8997_v1 = vld [vmem:[#allocation2 + $0x504] sm:$0xf]  ;;  %v6894_v2 = vld [vmem:[#allocation2 + $0x528] sm:$0xf0]  ;;  %v6260_v3 = vld [vmem:[#allocation2 + $0x8] sm:$0xf]  ;;  %v6621_v4 = vor.u32 %v8933_v57, %v6620_v56 }
  0x7b   : > { %1914 = vmatpush.bf16.msrb.mxu1 %v7097_v10  ;;  %v8843_v5 = vld [vmem:[#allocation2 + $0x2c] sm:$0xf0]  ;;  %v6580_v6 = vld [vmem:[#allocation2 + $0x288] sm:$0xf]  ;;  %v7180_v8 = vld [vmem:[#allocation2 + $0x738] sm:$0xf] }
  0x7c   : > { %1928 = vmatpush.bf16.msrb.mxu2 %v6461_v11  ;;  %1942 = vmatpush.bf16.msrb.mxu3 %v6781_v15  ;;  %v8923_v7 = vld [vmem:[#allocation2 + $0x2ac] sm:$0xf0]  ;;  %v9073_v9 = vld [vmem:[#allocation2 + $0x75c] sm:$0xf0]  ;;  %v8908_v10 = vld [vmem:[#allocation2 + $0x23c] sm:$0xf]  ;;  %v6577_v11 = vor.u32 %v8917_v61, %v6574_v62  ;;  %v6897_v15 = vor.u32 %v8997_v1, %v6894_v2  ;;  %v6261_v16 = vor.u32 %v8843_v5, %v6260_v3 }
  0x7d   : > { %v6542_v12 = vld [vmem:[#allocation2 + $0x260] sm:$0xf0]  ;;  %v8988_v13 = vld [vmem:[#allocation2 + $0x4bc] sm:$0xf]  ;;  %v6581_v19 = vor.u32 %v8923_v7, %v6580_v6  ;;  %v7181_v20 = vor.u32 %v9073_v9, %v7180_v8  ;;  %v9063_v24 = vld [vmem:[#allocation2 + $0x70c] sm:$0xf0] }
  0x7e   : > { %1901 = vmatpush.bf16.msrb.mxu0 %v6737_v21  ;;  %v6862_v14 = vld [vmem:[#allocation2 + $0x4e0] sm:$0xf0]  ;;  %v9068_v17 = vld [vmem:[#allocation2 + $0x73c] sm:$0xf]  ;;  %v6545_v21 = vor.u32 %v8908_v10, %v6542_v12  ;;  %v8898_v25 = vld [vmem:[#allocation2 + $0x1ec] sm:$0xf] }
  0x7f   : > { %1915 = vmatpush.bf16.msrb.mxu1 %v7057_v22  ;;  %v7182_v18 = vld [vmem:[#allocation2 + $0x760] sm:$0xf0]  ;;  %v6865_v22 = vor.u32 %v8988_v13, %v6862_v14  ;;  %v8978_v28 = vld [vmem:[#allocation2 + $0x46c] sm:$0xf]  ;;  %v6822_v29 = vld [vmem:[#allocation2 + $0x490] sm:$0xf0] }
  0x80   : > { %1929 = vmatpush.bf16.msrb.mxu2 %v6421_v23  ;;  %1943 = vmatpush.bf16.msrb.mxu3 %v6741_v27  ;;  %v7140_v23 = vld [vmem:[#allocation2 + $0x6e8] sm:$0xf]  ;;  %v7185_v26 = vor.u32 %v9068_v17, %v7182_v18  ;;  %v6502_v27 = vld [vmem:[#allocation2 + $0x210] sm:$0xf0]  ;;  %v9058_v30 = vld [vmem:[#allocation2 + $0x6ec] sm:$0xf] }
  0x81   : > { %v7142_v31 = vld [vmem:[#allocation2 + $0x710] sm:$0xf0]  ;;  %v7141_v32 = vor.u32 %v9063_v24, %v7140_v23  ;;  %v9053_v36 = vld [vmem:[#allocation2 + $0x6bc] sm:$0xf0]  ;;  %v8888_v37 = vld [vmem:[#allocation2 + $0x19c] sm:$0xf] }
  0x82   : > { %1902 = vmatpush.bf16.msrb.mxu0 %v6697_v33  ;;  %v6505_v33 = vor.u32 %v8898_v25, %v6502_v27  ;;  %v7145_v38 = vor.u32 %v9058_v30, %v7142_v31  ;;  %v8968_v40 = vld [vmem:[#allocation2 + $0x41c] sm:$0xf]  ;;  %v6782_v41 = vld [vmem:[#allocation2 + $0x440] sm:$0xf0]  ;;  %v9043_v48 = vld [vmem:[#allocation2 + $0x66c] sm:$0xf0] }
  0x83   : > { %1916 = vmatpush.bf16.msrb.mxu1 %v7017_v34  ;;  %v6825_v34 = vor.u32 %v8978_v28, %v6822_v29  ;;  %v9048_v42 = vld [vmem:[#allocation2 + $0x69c] sm:$0xf]  ;;  %v7102_v43 = vld [vmem:[#allocation2 + $0x6c0] sm:$0xf0]  ;;  %v8878_v49 = vld [vmem:[#allocation2 + $0x14c] sm:$0xf] }
  0x84   : > { %1930 = vmatpush.bf16.msrb.mxu2 %v6381_v35  ;;  %1944 = vmatpush.bf16.msrb.mxu3 %v6701_v39  ;;  %v7100_v35 = vld [vmem:[#allocation2 + $0x698] sm:$0xf]  ;;  %v6462_v39 = vld [vmem:[#allocation2 + $0x1c0] sm:$0xf0]  ;;  %v7105_v50 = vor.u32 %v9048_v42, %v7102_v43  ;;  %v8958_v52 = vld [vmem:[#allocation2 + $0x3cc] sm:$0xf] }
  0x85   : > { %v7101_v44 = vor.u32 %v9053_v36, %v7100_v35  ;;  %v6742_v54 = vld [vmem:[#allocation2 + $0x3f0] sm:$0xf0]  ;;  %v9038_v55 = vld [vmem:[#allocation2 + $0x64c] sm:$0xf]  ;;  %v7020_v62 = vld [vmem:[#allocation2 + $0x5f8] sm:$0xf] }
  0x86   : > { %1903 = vmatpush.bf16.msrb.mxu0 %v6657_v45  ;;  %v6465_v45 = vor.u32 %v8888_v37, %v6462_v39  ;;  %v7062_v56 = vld [vmem:[#allocation2 + $0x670] sm:$0xf0]  ;;  %v6745_v61 = vor.u32 %v8958_v52, %v6742_v54  ;;  %v6382_v2 = vld [vmem:[#allocation2 + $0x120] sm:$0xf0]  ;;  %v8948_v3 = vld [vmem:[#allocation2 + $0x37c] sm:$0xf] }
  0x87   : > { %1917 = vmatpush.bf16.msrb.mxu1 %v6977_v46  ;;  %v6785_v46 = vor.u32 %v8968_v40, %v6782_v41  ;;  %v7065_v1 = vor.u32 %v9038_v55, %v7062_v56  ;;  %v9028_v5 = vld [vmem:[#allocation2 + $0x5fc] sm:$0xf]  ;;  %v7022_v6 = vld [vmem:[#allocation2 + $0x620] sm:$0xf0]  ;;  %v6980_v10 = vld [vmem:[#allocation2 + $0x5a8] sm:$0xf] }
  0x88   : > { %1931 = vmatpush.bf16.msrb.mxu2 %v6341_v47  ;;  %1945 = vmatpush.bf16.msrb.mxu3 %v6661_v51  ;;  %v7060_v47 = vld [vmem:[#allocation2 + $0x648] sm:$0xf]  ;;  %v6422_v51 = vld [vmem:[#allocation2 + $0x170] sm:$0xf0]  ;;  %v8858_v12 = vld [vmem:[#allocation2 + $0xac] sm:$0xf]  ;;  %v7025_v13 = vor.u32 %v9028_v5, %v7022_v6 }
  0x89   : > { %v7061_v57 = vor.u32 %v9043_v48, %v7060_v47  ;;  %v6342_v14 = vld [vmem:[#allocation2 + $0xd0] sm:$0xf0]  ;;  %v9018_v17 = vld [vmem:[#allocation2 + $0x5ac] sm:$0xf]  ;;  %v9013_v23 = vld [vmem:[#allocation2 + $0x57c] sm:$0xf0] }
  0x8a   : > { %1904 = vmatpush.bf16.msrb.mxu0 %v6617_v58  ;;  %v6425_v58 = vor.u32 %v8878_v49, %v6422_v51  ;;  %v6982_v18 = vld [vmem:[#allocation2 + $0x5d0] sm:$0xf0]  ;;  %v8848_v24 = vld [vmem:[#allocation2 + $0x5c] sm:$0xf]  ;;  %v6622_v28 = vld [vmem:[#allocation2 + $0x300] sm:$0xf0] }
  0x8b   : > { %1918 = vmatpush.bf16.msrb.mxu1 %v6937_v63  ;;  %v9033_v63 = vld [vmem:[#allocation2 + $0x61c] sm:$0xf0]  ;;  %v6985_v25 = vor.u32 %v9018_v17, %v6982_v18  ;;  %v8928_v27 = vld [vmem:[#allocation2 + $0x2dc] sm:$0xf]  ;;  %v6942_v30 = vld [vmem:[#allocation2 + $0x580] sm:$0xf0] }
  0x8c   : > { %1932 = vmatpush.bf16.msrb.mxu2 %v6301_v0  ;;  %1946 = vmatpush.bf16.msrb.mxu3 %v6621_v4  ;;  %v8868_v0 = vld [vmem:[#allocation2 + $0xfc] sm:$0xf]  ;;  %v6702_v4 = vld [vmem:[#allocation2 + $0x3a0] sm:$0xf0]  ;;  %v7021_v7 = vor.u32 %v9033_v63, %v7020_v62  ;;  %v6625_v35 = vor.u32 %v8928_v27, %v6622_v28  ;;  %v8838_v36 = vld [vmem:[#allocation2 + $0xc] sm:$0xf] }
  0x8d   : > { %v6385_v8 = vor.u32 %v8868_v0, %v6382_v2  ;;  %v6705_v9 = vor.u32 %v8948_v3, %v6702_v4  ;;  %v9008_v29 = vld [vmem:[#allocation2 + $0x55c] sm:$0xf]  ;;  %v6262_v37 = vld [vmem:[#allocation2 + $0x30] sm:$0xf0]  ;;  %v8998_v41 = vld [vmem:[#allocation2 + $0x50c] sm:$0xf] }
  0x8e   : > { %1905 = vmatpush.bf16.msrb.mxu0 %v6577_v11  ;;  %v9023_v11 = vld [vmem:[#allocation2 + $0x5cc] sm:$0xf0]  ;;  %v6945_v39 = vor.u32 %v9008_v29, %v6942_v30  ;;  %v6582_v40 = vld [vmem:[#allocation2 + $0x2b0] sm:$0xf0]  ;;  %v6548_v43 = vld [vmem:[#allocation2 + $0x240] sm:$0xf] }
  0x8f   : > { %1919 = vmatpush.bf16.msrb.mxu1 %v6897_v15  ;;  %v8938_v15 = vld [vmem:[#allocation2 + $0x32c] sm:$0xf]  ;;  %v6902_v42 = vld [vmem:[#allocation2 + $0x530] sm:$0xf0]  ;;  %v8994_v47 = vld [vmem:[#allocation2 + $0x4e4] sm:$0xf0] }
  0x90   : > { %1933 = vmatpush.bf16.msrb.mxu2 %v6261_v16  ;;  %1947 = vmatpush.bf16.msrb.mxu3 %v6581_v19  ;;  %v6662_v16 = vld [vmem:[#allocation2 + $0x350] sm:$0xf0]  ;;  %v6981_v19 = vor.u32 %v9023_v11, %v6980_v10  ;;  %v7188_v48 = vld [vmem:[#allocation2 + $0x740] sm:$0xf]  ;;  %v9074_v49 = vld [vmem:[#allocation2 + $0x764] sm:$0xf0]  ;;  %v6905_v55 = vor.u32 %v8998_v41, %v6902_v42 }
  0x91   : > { %1906 = vmatmul.bf16.vlgmr.msrb.gmra.mxu0 %v10015_v60  ;;  %v8909_v52 = vld [vmem:[#allocation2 + $0x244] sm:$0xf]  ;;  %v6550_v54 = vld [vmem:[#allocation2 + $0x268] sm:$0xf0]  ;;  %v8904_v62 = vld [vmem:[#allocation2 + $0x214] sm:$0xf0] }
  0x92   : > { %1954 = vmatpush.bf16.msra.mxu0 %v7181_v20  ;;  %1920 = vmatmul.bf16.vlgmr.msrb.gmra.mxu1 %v10011_v53  ;;  %v6345_v20 = vor.u32 %v8858_v12, %v6342_v14  ;;  %v6828_v63 = vld [vmem:[#allocation2 + $0x470] sm:$0xf]  ;;  %v6553_v0 = vor.u32 %v8909_v52, %v6550_v54  ;;  %v9064_v3 = vld [vmem:[#allocation2 + $0x714] sm:$0xf0]  ;;  %v8899_v4 = vld [vmem:[#allocation2 + $0x1f4] sm:$0xf] }
  0x93   : > { %1968 = vmatpush.bf16.msra.mxu1 %v6545_v21  ;;  %1934 = vmatmul.bf16.vlgmr.msrb.gmra.mxu2 %v10013_v59  ;;  %v6665_v21 = vor.u32 %v8938_v15, %v6662_v16  ;;  %v7148_v2 = vld [vmem:[#allocation2 + $0x6f0] sm:$0xf]  ;;  %v6510_v5 = vld [vmem:[#allocation2 + $0x218] sm:$0xf0]  ;;  %v8894_v10 = vld [vmem:[#allocation2 + $0x1c4] sm:$0xf0] }
  0x94   : > { %1982 = vmatpush.bf16.msra.mxu2 %v6865_v22  ;;  %1996 = vmatpush.bf16.msra.mxu3 %v7185_v26  ;;  %v6940_v22 = vld [vmem:[#allocation2 + $0x558] sm:$0xf]  ;;  %v6302_v26 = vld [vmem:[#allocation2 + $0x80] sm:$0xf0]  ;;  %v6788_v11 = vld [vmem:[#allocation2 + $0x420] sm:$0xf]  ;;  %v6513_v12 = vor.u32 %v8899_v4, %v6510_v5 }
  0x95   : > { %1948 = vmatmul.bf16.vlgmr.msrb.gmra.mxu3 %v10015_v60  ;;  %v6941_v31 = vor.u32 %v9013_v23, %v6940_v22  ;;  %v7108_v14 = vld [vmem:[#allocation2 + $0x6a0] sm:$0xf]  ;;  %v9054_v15 = vld [vmem:[#allocation2 + $0x6c4] sm:$0xf0]  ;;  %v8889_v16 = vld [vmem:[#allocation2 + $0x1a4] sm:$0xf] }
  0x96   : > { %1955 = vmatpush.bf16.msra.mxu0 %v7141_v32  ;;  %v6900_v32 = vld [vmem:[#allocation2 + $0x508] sm:$0xf]  ;;  %v6470_v17 = vld [vmem:[#allocation2 + $0x1c8] sm:$0xf0]  ;;  %v8884_v22 = vld [vmem:[#allocation2 + $0x174] sm:$0xf0] }
  0x97   : > { %1969 = vmatpush.bf16.msra.mxu1 %v6505_v33  ;;  %v9003_v33 = vld [vmem:[#allocation2 + $0x52c] sm:$0xf0]  ;;  %v9044_v27 = vld [vmem:[#allocation2 + $0x674] sm:$0xf0]  ;;  %v8879_v28 = vld [vmem:[#allocation2 + $0x154] sm:$0xf] }
  0x98   : > { %1983 = vmatpush.bf16.msra.mxu2 %v6825_v34  ;;  %1997 = vmatpush.bf16.msra.mxu3 %v7145_v38  ;;  %v6305_v34 = vor.u32 %v8848_v24, %v6302_v26  ;;  %v8918_v38 = vld [vmem:[#allocation2 + $0x28c] sm:$0xf]  ;;  %v6748_v23 = vld [vmem:[#allocation2 + $0x3d0] sm:$0xf]  ;;  %v6473_v24 = vor.u32 %v8889_v16, %v6470_v17  ;;  %v6430_v29 = vld [vmem:[#allocation2 + $0x178] sm:$0xf0] }
  0x99   : > { %v6585_v51 = vor.u32 %v8918_v38, %v6582_v40  ;;  %v7068_v26 = vld [vmem:[#allocation2 + $0x650] sm:$0xf]  ;;  %v7028_v38 = vld [vmem:[#allocation2 + $0x600] sm:$0xf]  ;;  %v8869_v40 = vld [vmem:[#allocation2 + $0x104] sm:$0xf] }
  0x9a   : > { %1956 = vmatpush.bf16.msra.mxu0 %v7101_v44  ;;  %v8914_v44 = vld [vmem:[#allocation2 + $0x264] sm:$0xf0]  ;;  %v6390_v41 = vld [vmem:[#allocation2 + $0x128] sm:$0xf0]  ;;  %v8859_v52 = vld [vmem:[#allocation2 + $0xb4] sm:$0xf] }
  0x9b   : > { %1970 = vmatpush.bf16.msra.mxu1 %v6465_v45  ;;  %v6868_v45 = vld [vmem:[#allocation2 + $0x4c0] sm:$0xf]  ;;  %v6549_v56 = vor.u32 %v8914_v44, %v6548_v43  ;;  %v6350_v54 = vld [vmem:[#allocation2 + $0xd8] sm:$0xf0]  ;;  %v6310_v4 = vld [vmem:[#allocation2 + $0x88] sm:$0xf0] }
  0x9c   : > { %1984 = vmatpush.bf16.msra.mxu2 %v6785_v46  ;;  %1998 = vmatpush.bf16.msra.mxu3 %v7105_v50  ;;  %v6901_v46 = vor.u32 %v9003_v33, %v6900_v32  ;;  %v6265_v50 = vor.u32 %v8838_v36, %v6262_v37  ;;  %v7069_v32 = vor.u32 %v9044_v27, %v7068_v26  ;;  %v6388_v33 = vld [vmem:[#allocation2 + $0x100] sm:$0xf]  ;;  %v8954_v37 = vld [vmem:[#allocation2 + $0x3a4] sm:$0xf0]  ;;  %v6270_v16 = vld [vmem:[#allocation2 + $0x38] sm:$0xf0] }
  0x9d   : > { %v6433_v36 = vor.u32 %v8879_v28, %v6430_v29  ;;  %v8989_v17 = vld [vmem:[#allocation2 + $0x4c4] sm:$0xf]  ;;  %v6876_v26 = vld [vmem:[#allocation2 + $0x4c8] sm:$0xf]  ;;  %v8995_v27 = vld [vmem:[#allocation2 + $0x4ec] sm:$0xf0] }
  0x9e   : > { %1957 = vmatpush.bf16.msra.mxu0 %v7061_v57  ;;  %v6869_v57 = vor.u32 %v8994_v47, %v6868_v45  ;;  %v6348_v45 = vld [vmem:[#allocation2 + $0xb0] sm:$0xf]  ;;  %p11628_p5 = scmp.lt.s32.totalorder %s375_s7, 9  ;;  %s9481_s13 = smul.u32 5, %s9984_s4 }
  0x9f   : > { %1971 = vmatpush.bf16.msra.mxu1 %v6425_v58  ;;  %v7189_v58 = vor.u32 %v9074_v49, %v7188_v48  ;;  %v6668_v47 = vld [vmem:[#allocation2 + $0x330] sm:$0xf]  ;;  %v6393_v48 = vor.u32 %v8869_v40, %v6390_v41  ;;  %v8944_v49 = vld [vmem:[#allocation2 + $0x354] sm:$0xf0]  ;;  %v8985_v40 = vld [vmem:[#allocation2 + $0x49c] sm:$0xf0] }
  0xa0   : > { %1985 = vmatpush.bf16.msra.mxu2 %v6745_v61  ;;  %1999 = vmatpush.bf16.msra.mxu3 %v7065_v1  ;;  %v6508_v61 = vld [vmem:[#allocation2 + $0x1f0] sm:$0xf]  ;;  %v8984_v1 = vld [vmem:[#allocation2 + $0x494] sm:$0xf0]  ;;  %s12124_s7 = smov (!%p11628_p5, %s375_s7), 9  ;;  %s11706_s14 = scalar_lea.vmem [#allocation7], %s9481_s13 }
  0xa1   : > { %v6509_v6 = vor.u32 %v8904_v62, %v6508_v61  ;;  %v8854_v61 = vld [vmem:[#allocation2 + $0x84] sm:$0xf0]  ;;  %v6628_v62 = vld [vmem:[#allocation2 + $0x2e0] sm:$0xf]  ;;  %s11681_s22 = scalar_lea.vmem %s12026_s5, %s12124_s7  ;;  %s9482_s16 = smul.u32 80, %s9984_s4 }
  0xa2   : > { %1958 = vmatpush.bf16.msra.mxu0 %v7021_v7  ;;  %v6829_v7 = vor.u32 %v8984_v1, %v6828_v63  ;;  %v6353_v63 = vor.u32 %v8859_v52, %v6350_v54  ;;  %v6948_v1 = vld [vmem:[#allocation2 + $0x560] sm:$0xf]  ;;  %v8975_v52 = vld [vmem:[#allocation2 + $0x44c] sm:$0xf0]  ;;  %s12117_s8 = sld [smem:[#allocation17_spill]] (%p9894_p10) }
  0xa3   : > { %1972 = vmatpush.bf16.msra.mxu1 %v6385_v8  ;;  %v7149_v8 = vor.u32 %v9064_v3, %v7148_v2  ;;  %v9014_v2 = vld [vmem:[#allocation2 + $0x584] sm:$0xf0]  ;;  %v8849_v3 = vld [vmem:[#allocation2 + $0x64] sm:$0xf]  ;;  %s11748_s18 = scalar_lea.vmem [#allocation8], %s9482_s16 }
  0xa4   : > { %1986 = vmatpush.bf16.msra.mxu2 %v6705_v9  ;;  %2000 = vmatpush.bf16.msra.mxu3 %v7025_v13  ;;  %v6468_v9 = vld [vmem:[#allocation2 + $0x1a0] sm:$0xf]  ;;  %v8974_v13 = vld [vmem:[#allocation2 + $0x444] sm:$0xf0] }
  0xa5   : > { %v6469_v18 = vor.u32 %v8894_v10, %v6468_v9  ;;  %v6949_v9 = vor.u32 %v9014_v2, %v6948_v1  ;;  %v6588_v10 = vld [vmem:[#allocation2 + $0x290] sm:$0xf]  ;;  %v8885_v1 = vld [vmem:[#allocation2 + $0x17c] sm:$0xf0]  ;;  %v6756_v2 = vld [vmem:[#allocation2 + $0x3d8] sm:$0xf] }
  0xa6   : > { %1959 = vmatpush.bf16.msra.mxu0 %v6981_v19  ;;  %v6789_v19 = vor.u32 %v8974_v13, %v6788_v11  ;;  %v8924_v11 = vld [vmem:[#allocation2 + $0x2b4] sm:$0xf0]  ;;  %v6313_v13 = vor.u32 %v8849_v3, %v6310_v4  ;;  %v8965_v3 = vld [vmem:[#allocation2 + $0x3fc] sm:$0xf0] }
  0xa7   : > { %1973 = vmatpush.bf16.msra.mxu1 %v6345_v20  ;;  %v7109_v20 = vor.u32 %v9054_v15, %v7108_v14  ;;  %v9004_v14 = vld [vmem:[#allocation2 + $0x534] sm:$0xf0]  ;;  %v8839_v15 = vld [vmem:[#allocation2 + $0x14] sm:$0xf] }
  0xa8   : > { %1987 = vmatpush.bf16.msra.mxu2 %v6665_v21  ;;  %2001 = vmatpush.bf16.msra.mxu3 %v6985_v25  ;;  %v6428_v21 = vld [vmem:[#allocation2 + $0x150] sm:$0xf]  ;;  %v8964_v25 = vld [vmem:[#allocation2 + $0x3f4] sm:$0xf0]  ;;  %v6273_v28 = vor.u32 %v8839_v15, %v6270_v16 }
  0xa9   : > { %v6429_v30 = vor.u32 %v8884_v22, %v6428_v21  ;;  %v7190_v21 = vld [vmem:[#allocation2 + $0x768] sm:$0xf0]  ;;  %v6556_v22 = vld [vmem:[#allocation2 + $0x248] sm:$0xf]  ;;  %v8955_v15 = vld [vmem:[#allocation2 + $0x3ac] sm:$0xf0] }
  0xaa   : > { %1960 = vmatpush.bf16.msra.mxu0 %v6941_v31  ;;  %v6749_v31 = vor.u32 %v8964_v25, %v6748_v23  ;;  %v8915_v23 = vld [vmem:[#allocation2 + $0x26c] sm:$0xf0] }
  0xab   : > { %1974 = vmatpush.bf16.msra.mxu1 %v6305_v34  ;;  %v8874_v34 = vld [vmem:[#allocation2 + $0x124] sm:$0xf0] }
  0xac   : > { %1988 = vmatpush.bf16.msra.mxu2 %v6625_v35  ;;  %2002 = vmatpush.bf16.msra.mxu3 %v6945_v39  ;;  %v6708_v35 = vld [vmem:[#allocation2 + $0x380] sm:$0xf]  ;;  %v9034_v39 = vld [vmem:[#allocation2 + $0x624] sm:$0xf0]  ;;  %v6389_v42 = vor.u32 %v8874_v34, %v6388_v33  ;;  %v6830_v33 = vld [vmem:[#allocation2 + $0x498] sm:$0xf0] }
  0xad   : > { %v6709_v43 = vor.u32 %v8954_v37, %v6708_v35  ;;  %v7029_v44 = vor.u32 %v9034_v39, %v7028_v38  ;;  %v9059_v34 = vld [vmem:[#allocation2 + $0x6f4] sm:$0xf]  ;;  %v6877_v35 = vor.u32 %v8995_v27, %v6876_v26  ;;  %v6516_v37 = vld [vmem:[#allocation2 + $0x1f8] sm:$0xf]  ;;  %v8905_v38 = vld [vmem:[#allocation2 + $0x21c] sm:$0xf0] }
  0xae   : > { %1961 = vmatpush.bf16.msra.mxu0 %v6901_v46  ;;  %v8864_v46 = vld [vmem:[#allocation2 + $0xd4] sm:$0xf0]  ;;  %v8945_v27 = vld [vmem:[#allocation2 + $0x35c] sm:$0xf0] }
  0xaf   : > { %1975 = vmatpush.bf16.msra.mxu1 %v6265_v50  ;;  %v6988_v50 = vld [vmem:[#allocation2 + $0x5b0] sm:$0xf]  ;;  %v6836_v39 = vld [vmem:[#allocation2 + $0x478] sm:$0xf] }
  0xb0   : > { %1989 = vmatpush.bf16.msra.mxu2 %v6585_v51  ;;  %2003 = vmatpush.bf16.msra.mxu3 %v6905_v55  ;;  %v9024_v51 = vld [vmem:[#allocation2 + $0x5d4] sm:$0xf0]  ;;  %v6349_v55 = vor.u32 %v8864_v46, %v6348_v45  ;;  %v6790_v45 = vld [vmem:[#allocation2 + $0x448] sm:$0xf0]  ;;  %v9049_v46 = vld [vmem:[#allocation2 + $0x6a4] sm:$0xf] }
  0xb1   : > { %1962 = vmatmul.bf16.vlgmr.msra.gmra.mxu0 %v10011_v53  ;;  %v6676_v26 = vld [vmem:[#allocation2 + $0x338] sm:$0xf] }
  0xb2   : > { %2010 = vmatpush.bf16.msrb.mxu0 %v6549_v56  ;;  %1976 = vmatmul.bf16.vlgmr.msra.gmra.mxu1 %v10013_v59  ;;  %v6669_v56 = vor.u32 %v8944_v49, %v6668_v47  ;;  %v6837_v47 = vor.u32 %v8985_v40, %v6836_v39  ;;  %v6476_v49 = vld [vmem:[#allocation2 + $0x1a8] sm:$0xf]  ;;  %v8935_v39 = vld [vmem:[#allocation2 + $0x30c] sm:$0xf0] }
  0xb3   : > { %2024 = vmatpush.bf16.msrb.mxu1 %v6869_v57  ;;  %1990 = vmatmul.bf16.vlgmr.msra.gmra.mxu2 %v10015_v60  ;;  %v6989_v57 = vor.u32 %v9024_v51, %v6988_v50  ;;  %v8895_v50 = vld [vmem:[#allocation2 + $0x1cc] sm:$0xf0]  ;;  %v6796_v51 = vld [vmem:[#allocation2 + $0x428] sm:$0xf] }
  0xb4   : > { %2038 = vmatpush.bf16.msrb.mxu2 %v7189_v58  ;;  %2052 = vmatpush.bf16.msrb.mxu3 %v6553_v0  ;;  %v6308_v58 = vld [vmem:[#allocation2 + $0x60] sm:$0xf]  ;;  %v8934_v0 = vld [vmem:[#allocation2 + $0x304] sm:$0xf0] }
  0xb5   : > { %2004 = vmatmul.bf16.vlgmr.msra.gmra.mxu3 %v10011_v53  ;;  %v6309_v5 = vor.u32 %v8854_v61, %v6308_v58  ;;  %v6750_v58 = vld [vmem:[#allocation2 + $0x3f8] sm:$0xf0]  ;;  %v9039_v61 = vld [vmem:[#allocation2 + $0x654] sm:$0xf] }
  0xb6   : > { %2011 = vmatpush.bf16.msrb.mxu0 %v6509_v6  ;;  %v6268_v6 = vld [vmem:[#allocation2 + $0x10] sm:$0xf] }
  0xb7   : > { %2025 = vmatpush.bf16.msrb.mxu1 %v6829_v7  ;;  %v8844_v7 = vld [vmem:[#allocation2 + $0x34] sm:$0xf0] }
  0xb8   : > { %2039 = vmatpush.bf16.msrb.mxu2 %v7149_v8  ;;  %2053 = vmatpush.bf16.msrb.mxu3 %v6513_v12  ;;  %v6629_v8 = vor.u32 %v8934_v0, %v6628_v62  ;;  %v6908_v12 = vld [vmem:[#allocation2 + $0x510] sm:$0xf]  ;;  %v6797_v62 = vor.u32 %v8975_v52, %v6796_v51  ;;  %v6436_v0 = vld [vmem:[#allocation2 + $0x158] sm:$0xf]  ;;  %v8925_v51 = vld [vmem:[#allocation2 + $0x2bc] sm:$0xf0] }
  0xb9   : > { %v6909_v25 = vor.u32 %v9004_v14, %v6908_v12  ;;  %v6396_v12 = vld [vmem:[#allocation2 + $0x108] sm:$0xf] }
  0xba   : > { %2012 = vmatpush.bf16.msrb.mxu0 %v6469_v18  ;;  %v6870_v18 = vld [vmem:[#allocation2 + $0x4e8] sm:$0xf0]  ;;  %v6716_v14 = vld [vmem:[#allocation2 + $0x388] sm:$0xf] }
  0xbb   : > { %2026 = vmatpush.bf16.msrb.mxu1 %v6789_v19  ;;  %v9069_v19 = vld [vmem:[#allocation2 + $0x744] sm:$0xf]  ;;  %v6873_v29 = vor.u32 %v8989_v17, %v6870_v18  ;;  %v7196_v52 = vld [vmem:[#allocation2 + $0x748] sm:$0xf] }
  0xbc   : > { %2040 = vmatpush.bf16.msrb.mxu2 %v7109_v20  ;;  %2054 = vmatpush.bf16.msrb.mxu3 %v6473_v24  ;;  %v6269_v20 = vor.u32 %v8844_v7, %v6268_v6  ;;  %v6589_v24 = vor.u32 %v8924_v11, %v6588_v10  ;;  %v6437_v6 = vor.u32 %v8885_v1, %v6436_v0  ;;  %v8949_v7 = vld [vmem:[#allocation2 + $0x384] sm:$0xf]  ;;  %v7030_v11 = vld [vmem:[#allocation2 + $0x628] sm:$0xf0]  ;;  %v7198_v1 = vld [vmem:[#allocation2 + $0x770] sm:$0xf0] }
  0xbd   : > { %v6757_v10 = vor.u32 %v8965_v3, %v6756_v2  ;;  %v9070_v0 = vld [vmem:[#allocation2 + $0x74c] sm:$0xf] }
  0xbe   : > { %2013 = vmatpush.bf16.msrb.mxu0 %v6429_v30  ;;  %v7193_v30 = vor.u32 %v9069_v19, %v7190_v21  ;;  %v8939_v19 = vld [vmem:[#allocation2 + $0x334] sm:$0xf] }
  0xbf   : > { %2027 = vmatpush.bf16.msrb.mxu1 %v6749_v31  ;;  %v6557_v31 = vor.u32 %v8915_v23, %v6556_v22  ;;  %v9019_v21 = vld [vmem:[#allocation2 + $0x5b4] sm:$0xf]  ;;  %v6717_v22 = vor.u32 %v8955_v15, %v6716_v14  ;;  %v6990_v23 = vld [vmem:[#allocation2 + $0x5d8] sm:$0xf0]  ;;  %v7158_v14 = vld [vmem:[#allocation2 + $0x720] sm:$0xf0] }
  0xc0   : > { %2041 = vmatpush.bf16.msrb.mxu2 %v7069_v32  ;;  %2055 = vmatpush.bf16.msrb.mxu3 %v6433_v36  ;;  %v8979_v32 = vld [vmem:[#allocation2 + $0x474] sm:$0xf]  ;;  %v7150_v36 = vld [vmem:[#allocation2 + $0x718] sm:$0xf0] }
  0xc1   : > { %v6833_v41 = vor.u32 %v8979_v32, %v6830_v33  ;;  %v6630_v32 = vld [vmem:[#allocation2 + $0x308] sm:$0xf0]  ;;  %v9009_v33 = vld [vmem:[#allocation2 + $0x564] sm:$0xf] }
  0xc2   : > { %2014 = vmatpush.bf16.msrb.mxu0 %v6389_v42  ;;  %v7153_v42 = vor.u32 %v9059_v34, %v7150_v36  ;;  %v6677_v34 = vor.u32 %v8945_v27, %v6676_v26  ;;  %v6316_v36 = vld [vmem:[#allocation2 + $0x68] sm:$0xf]  ;;  %v7118_v26 = vld [vmem:[#allocation2 + $0x6d0] sm:$0xf0] }
  0xc3   : > { %2028 = vmatpush.bf16.msrb.mxu1 %v6709_v43  ;;  %v6517_v43 = vor.u32 %v8905_v38, %v6516_v37  ;;  %v8855_v37 = vld [vmem:[#allocation2 + $0x8c] sm:$0xf0]  ;;  %v6636_v38 = vld [vmem:[#allocation2 + $0x2e8] sm:$0xf] }
  0xc4   : > { %2042 = vmatpush.bf16.msrb.mxu2 %v7029_v44  ;;  %2056 = vmatpush.bf16.msrb.mxu3 %v6393_v48  ;;  %v8969_v44 = vld [vmem:[#allocation2 + $0x424] sm:$0xf]  ;;  %v7110_v48 = vld [vmem:[#allocation2 + $0x6c8] sm:$0xf0] }
  0xc5   : > { %v6793_v54 = vor.u32 %v8969_v44, %v6790_v45  ;;  %v6317_v44 = vor.u32 %v8855_v37, %v6316_v36  ;;  %v8999_v45 = vld [vmem:[#allocation2 + $0x514] sm:$0xf]  ;;  %v6758_v36 = vld [vmem:[#allocation2 + $0x400] sm:$0xf0]  ;;  %v9040_v37 = vld [vmem:[#allocation2 + $0x65c] sm:$0xf] }
  0xc6   : > { %2015 = vmatpush.bf16.msrb.mxu0 %v6349_v55  ;;  %v7113_v55 = vor.u32 %v9049_v46, %v7110_v48  ;;  %v6910_v46 = vld [vmem:[#allocation2 + $0x538] sm:$0xf0]  ;;  %v6637_v48 = vor.u32 %v8935_v39, %v6636_v38  ;;  %v7078_v38 = vld [vmem:[#allocation2 + $0x680] sm:$0xf0] }
  0xc7   : > { %2029 = vmatpush.bf16.msrb.mxu1 %v6669_v56  ;;  %v6477_v56 = vor.u32 %v8895_v50, %v6476_v49  ;;  %v8845_v49 = vld [vmem:[#allocation2 + $0x3c] sm:$0xf0]  ;;  %v6596_v50 = vld [vmem:[#allocation2 + $0x298] sm:$0xf] }
  0xc8   : > { %2043 = vmatpush.bf16.msrb.mxu2 %v6989_v57  ;;  %2057 = vmatpush.bf16.msrb.mxu3 %v6353_v63  ;;  %v8959_v57 = vld [vmem:[#allocation2 + $0x3d4] sm:$0xf]  ;;  %v7070_v63 = vld [vmem:[#allocation2 + $0x678] sm:$0xf0]  ;;  %v6597_v2 = vor.u32 %v8925_v51, %v6596_v50  ;;  %v9030_v51 = vld [vmem:[#allocation2 + $0x60c] sm:$0xf] }
  0xc9   : > { %v6753_v4 = vor.u32 %v8959_v57, %v6750_v58  ;;  %v6558_v57 = vld [vmem:[#allocation2 + $0x270] sm:$0xf0]  ;;  %v8990_v58 = vld [vmem:[#allocation2 + $0x4cc] sm:$0xf] }
  0xca   : > { %2016 = vmatpush.bf16.msrb.mxu0 %v6309_v5  ;;  %v7073_v5 = vor.u32 %v9039_v61, %v7070_v63  ;;  %v6878_v61 = vld [vmem:[#allocation2 + $0x4f0] sm:$0xf0] }
  0xcb   : > { %2030 = vmatpush.bf16.msrb.mxu1 %v6629_v8  ;;  %v6710_v8 = vld [vmem:[#allocation2 + $0x3a8] sm:$0xf0]  ;;  %v6718_v50 = vld [vmem:[#allocation2 + $0x3b0] sm:$0xf0] }
  0xcc   : > { %2044 = vmatpush.bf16.msrb.mxu2 %v6949_v9  ;;  %2058 = vmatpush.bf16.msrb.mxu3 %v6313_v13  ;;  %v9029_v9 = vld [vmem:[#allocation2 + $0x604] sm:$0xf]  ;;  %v8875_v13 = vld [vmem:[#allocation2 + $0x12c] sm:$0xf0]  ;;  %v6713_v16 = vor.u32 %v8949_v7, %v6710_v8  ;;  %v9065_v7 = vld [vmem:[#allocation2 + $0x71c] sm:$0xf0] }
  0xcd   : > { %v7033_v17 = vor.u32 %v9029_v9, %v7030_v11  ;;  %v6397_v18 = vor.u32 %v8875_v13, %v6396_v12  ;;  %v8900_v8 = vld [vmem:[#allocation2 + $0x1fc] sm:$0xf]  ;;  %v7201_v9 = vor.u32 %v9070_v0, %v7198_v1  ;;  %v6838_v12 = vld [vmem:[#allocation2 + $0x4a0] sm:$0xf0] }
  0xce   : > { %2017 = vmatpush.bf16.msrb.mxu0 %v6269_v20  ;;  %v6670_v20 = vld [vmem:[#allocation2 + $0x358] sm:$0xf0] }
  0xcf   : > { %2031 = vmatpush.bf16.msrb.mxu1 %v6589_v24  ;;  %v6356_v24 = vld [vmem:[#allocation2 + $0xb8] sm:$0xf]  ;;  %v8980_v11 = vld [vmem:[#allocation2 + $0x47c] sm:$0xf] }
  0xd0   : > { %2045 = vmatpush.bf16.msrb.mxu2 %v6909_v25  ;;  %2059 = vmatpush.bf16.msrb.mxu3 %v6273_v28  ;;  %v8865_v25 = vld [vmem:[#allocation2 + $0xdc] sm:$0xf0]  ;;  %v6673_v28 = vor.u32 %v8939_v19, %v6670_v20  ;;  %v9060_v13 = vld [vmem:[#allocation2 + $0x6fc] sm:$0xf]  ;;  %v9055_v19 = vld [vmem:[#allocation2 + $0x6cc] sm:$0xf0] }
  0xd1   : > { %2018 = vmatmul.bf16.vlgmr.msrb.gmra.mxu0 %v10013_v59  ;;  %v8890_v20 = vld [vmem:[#allocation2 + $0x1ac] sm:$0xf]  ;;  %v8860_v0 = vld [vmem:[#allocation2 + $0xbc] sm:$0xf] }
  0xd2   : > { %2066 = vmatpush.bf16.msra.mxu0 %v6873_v29  ;;  %2032 = vmatmul.bf16.vlgmr.msrb.gmra.mxu1 %v10015_v60  ;;  %v6993_v29 = vor.u32 %v9019_v21, %v6990_v23  ;;  %v7161_v21 = vor.u32 %v9060_v13, %v7158_v14  ;;  %v8970_v23 = vld [vmem:[#allocation2 + $0x42c] sm:$0xf] }
  0xd3   : > { %2080 = vmatpush.bf16.msra.mxu1 %v7193_v30  ;;  %2046 = vmatmul.bf16.vlgmr.msrb.gmra.mxu2 %v10011_v53  ;;  %v6357_v30 = vor.u32 %v8865_v25, %v6356_v24  ;;  %v6798_v24 = vld [vmem:[#allocation2 + $0x450] sm:$0xf0]  ;;  %v9050_v25 = vld [vmem:[#allocation2 + $0x6ac] sm:$0xf] }
  0xd4   : > { %2094 = vmatpush.bf16.msra.mxu2 %v6557_v31  ;;  %2108 = vmatpush.bf16.msra.mxu3 %v6877_v35  ;;  %v8929_v31 = vld [vmem:[#allocation2 + $0x2e4] sm:$0xf]  ;;  %v6950_v35 = vld [vmem:[#allocation2 + $0x588] sm:$0xf0] }
  0xd5   : > { %2060 = vmatmul.bf16.vlgmr.msrb.gmra.mxu3 %v10013_v59  ;;  %v6633_v40 = vor.u32 %v8929_v31, %v6630_v32  ;;  %v9045_v31 = vld [vmem:[#allocation2 + $0x67c] sm:$0xf0]  ;;  %v8880_v32 = vld [vmem:[#allocation2 + $0x15c] sm:$0xf] }
  0xd6   : > { %2067 = vmatpush.bf16.msra.mxu0 %v6833_v41  ;;  %v8919_v41 = vld [vmem:[#allocation2 + $0x294] sm:$0xf] }
  0xd7   : > { %2081 = vmatpush.bf16.msra.mxu1 %v7153_v42  ;;  %v6590_v42 = vld [vmem:[#allocation2 + $0x2b8] sm:$0xf0] }
  0xd8   : > { %2095 = vmatpush.bf16.msra.mxu2 %v6517_v43  ;;  %2109 = vmatpush.bf16.msra.mxu3 %v6837_v47  ;;  %v6953_v43 = vor.u32 %v9009_v33, %v6950_v35  ;;  %v6276_v47 = vld [vmem:[#allocation2 + $0x18] sm:$0xf]  ;;  %v7121_v33 = vor.u32 %v9050_v25, %v7118_v26  ;;  %v8960_v35 = vld [vmem:[#allocation2 + $0x3dc] sm:$0xf] }
  0xd9   : > { %v6277_v63 = vor.u32 %v8845_v49, %v6276_v47  ;;  %v7081_v47 = vor.u32 %v9040_v37, %v7078_v38  ;;  %v8950_v49 = vld [vmem:[#allocation2 + $0x38c] sm:$0xf]  ;;  %v6598_v37 = vld [vmem:[#allocation2 + $0x2c0] sm:$0xf0]  ;;  %v9000_v38 = vld [vmem:[#allocation2 + $0x51c] sm:$0xf] }
  0xda   : > { %2068 = vmatpush.bf16.msra.mxu0 %v6793_v54  ;;  %v9075_v54 = vld [vmem:[#allocation2 + $0x76c] sm:$0xf0] }
  0xdb   : > { %2082 = vmatpush.bf16.msra.mxu1 %v7113_v55  ;;  %v8910_v55 = vld [vmem:[#allocation2 + $0x24c] sm:$0xf]  ;;  %v7197_v3 = vor.u32 %v9075_v54, %v7196_v52  ;;  %v7038_v52 = vld [vmem:[#allocation2 + $0x630] sm:$0xf0] }
  0xdc   : > { %2096 = vmatpush.bf16.msra.mxu2 %v6477_v56  ;;  %2110 = vmatpush.bf16.msra.mxu3 %v6797_v62  ;;  %v6593_v56 = vor.u32 %v8919_v41, %v6590_v42  ;;  %v6913_v62 = vor.u32 %v8999_v45, %v6910_v46  ;;  %v9035_v45 = vld [vmem:[#allocation2 + $0x62c] sm:$0xf0]  ;;  %v8870_v46 = vld [vmem:[#allocation2 + $0x10c] sm:$0xf]  ;;  %v7041_v1 = vor.u32 %v9030_v51, %v7038_v52  ;;  %v8911_v51 = vld [vmem:[#allocation2 + $0x254] sm:$0xf] }
  0xdd   : > { %v6566_v52 = vld [vmem:[#allocation2 + $0x278] sm:$0xf0] }
  0xde   : > { %2069 = vmatpush.bf16.msra.mxu0 %v6753_v4  ;;  %v6561_v4 = vor.u32 %v8910_v55, %v6558_v57 }
  0xdf   : > { %2083 = vmatpush.bf16.msra.mxu1 %v7073_v5  ;;  %v6881_v5 = vor.u32 %v8990_v58, %v6878_v61  ;;  %v6721_v58 = vor.u32 %v8950_v49, %v6718_v50 }
  0xe0   : > { %2097 = vmatpush.bf16.msra.mxu2 %v6437_v6  ;;  %2111 = vmatpush.bf16.msra.mxu3 %v6757_v10  ;;  %v7156_v6 = vld [vmem:[#allocation2 + $0x6f8] sm:$0xf]  ;;  %v6518_v10 = vld [vmem:[#allocation2 + $0x220] sm:$0xf0] }
  0xe1   : > { %v7157_v15 = vor.u32 %v9065_v7, %v7156_v6  ;;  %v6998_v6 = vld [vmem:[#allocation2 + $0x5e0] sm:$0xf0] }
  0xe2   : > { %2070 = vmatpush.bf16.msra.mxu0 %v6713_v16  ;;  %v6521_v16 = vor.u32 %v8900_v8, %v6518_v10 }
  0xe3   : > { %2084 = vmatpush.bf16.msra.mxu1 %v7033_v17  ;;  %v6841_v17 = vor.u32 %v8980_v11, %v6838_v12 }
  0xe4   : > { %2098 = vmatpush.bf16.msra.mxu2 %v6397_v18  ;;  %2112 = vmatpush.bf16.msra.mxu3 %v6717_v22  ;;  %v7116_v18 = vld [vmem:[#allocation2 + $0x6a8] sm:$0xf]  ;;  %v6478_v22 = vld [vmem:[#allocation2 + $0x1d0] sm:$0xf0] }
  0xe5   : > { %v7117_v27 = vor.u32 %v9055_v19, %v7116_v18  ;;  %v6318_v19 = vld [vmem:[#allocation2 + $0x90] sm:$0xf0] }
  0xe6   : > { %2071 = vmatpush.bf16.msra.mxu0 %v6673_v28  ;;  %v6481_v28 = vor.u32 %v8890_v20, %v6478_v22  ;;  %v8930_v20 = vld [vmem:[#allocation2 + $0x2ec] sm:$0xf] }
  0xe7   : > { %2085 = vmatpush.bf16.msra.mxu1 %v6993_v29  ;;  %v6801_v29 = vor.u32 %v8970_v23, %v6798_v24  ;;  %v9010_v23 = vld [vmem:[#allocation2 + $0x56c] sm:$0xf]  ;;  %v6958_v24 = vld [vmem:[#allocation2 + $0x590] sm:$0xf0] }
  0xe8   : > { %2099 = vmatpush.bf16.msra.mxu2 %v6357_v30  ;;  %2113 = vmatpush.bf16.msra.mxu3 %v6677_v34  ;;  %v7076_v30 = vld [vmem:[#allocation2 + $0x658] sm:$0xf]  ;;  %v6438_v34 = vld [vmem:[#allocation2 + $0x180] sm:$0xf0] }
  0xe9   : > { %v7077_v39 = vor.u32 %v9045_v31, %v7076_v30  ;;  %v6441_v42 = vor.u32 %v8880_v32, %v6438_v34  ;;  %v6278_v34 = vld [vmem:[#allocation2 + $0x40] sm:$0xf0] }
  0xea   : > { %2072 = vmatpush.bf16.msra.mxu0 %v6633_v40 }
  0xeb   : > { %2086 = vmatpush.bf16.msra.mxu1 %v6953_v43  ;;  %v6761_v43 = vor.u32 %v8960_v35, %v6758_v36  ;;  %v8920_v35 = vld [vmem:[#allocation2 + $0x29c] sm:$0xf]  ;;  %v6961_v36 = vor.u32 %v9010_v23, %v6958_v24  ;;  %v6444_v24 = vld [vmem:[#allocation2 + $0x160] sm:$0xf] }
  0xec   : > { %2100 = vmatpush.bf16.msra.mxu2 %v6317_v44  ;;  %2114 = vmatpush.bf16.msra.mxu3 %v6637_v48  ;;  %v7036_v44 = vld [vmem:[#allocation2 + $0x608] sm:$0xf]  ;;  %v6398_v48 = vld [vmem:[#allocation2 + $0x130] sm:$0xf0]  ;;  %v6601_v50 = vor.u32 %v8920_v35, %v6598_v37  ;;  %v8881_v35 = vld [vmem:[#allocation2 + $0x164] sm:$0xf] }
  0xed   : > { %v7037_v55 = vor.u32 %v9035_v45, %v7036_v44  ;;  %v6401_v57 = vor.u32 %v8870_v46, %v6398_v48  ;;  %v8996_v46 = vld [vmem:[#allocation2 + $0x4f4] sm:$0xf0] }
  0xee   : > { %2073 = vmatpush.bf16.msra.mxu0 %v6593_v56  ;;  %v1851_v40 = vpop.f32.mrf.mxu0  ;;  %v10040_v56 = vld [vmem:[%s12023_s2] sm:$0xff]  ;;  %v9076_v48 = vld [vmem:[#allocation2 + $0x774] sm:$0xf0] }
  0xef   : > { %2087 = vmatpush.bf16.msra.mxu1 %v6913_v62  ;;  %v1865_v41 = vpop.f32.mrf.mxu1  ;;  %v6996_v62 = vld [vmem:[#allocation2 + $0x5b8] sm:$0xf]  ;;  %v2266_v8 = vperm.slane %v10040_v56, 0 }
  0xf0   : > { %2101 = vmatpush.bf16.msra.mxu2 %v6277_v63  ;;  %2115 = vmatpush.bf16.msra.mxu3 %v6597_v2  ;;  %v1866_v54 = vadd.f32 %v1865_v41, %v1851_v40  ;;  %v9025_v63 = vld [vmem:[#allocation2 + $0x5dc] sm:$0xf0]  ;;  %v6358_v2 = vld [vmem:[#allocation2 + $0xe0] sm:$0xf0]  ;;  %v6564_v41 = vld [vmem:[#allocation2 + $0x250] sm:$0xf] }
  0xf1   : > { %2074 = vmatmul.bf16.vlgmr.msra.gmra.mxu0 %v10015_v60  ;;  %v6997_v10 = vor.u32 %v9025_v63, %v6996_v62  ;;  %v6361_v13 = vor.u32 %v8860_v0, %v6358_v2  ;;  %v8906_v63 = vld [vmem:[#allocation2 + $0x224] sm:$0xf0]  ;;  %v6844_v0 = vld [vmem:[#allocation2 + $0x480] sm:$0xf] }
  0xf2   : > { %2122 = vmatpush.bf16.msrb.mxu0 %v7197_v3  ;;  %2088 = vmatmul.bf16.vlgmr.msra.gmra.mxu1 %v10011_v53  ;;  %v8940_v3 = vld [vmem:[#allocation2 + $0x33c] sm:$0xf] }
  0xf3   : > { %2136 = vmatpush.bf16.msrb.mxu1 %v6561_v4  ;;  %2102 = vmatmul.bf16.vlgmr.msra.gmra.mxu2 %v10013_v59  ;;  %v6678_v4 = vld [vmem:[#allocation2 + $0x360] sm:$0xf0] }
  0xf4   : > { %2150 = vmatpush.bf16.msrb.mxu2 %v6881_v5  ;;  %2164 = vmatpush.bf16.msrb.mxu3 %v7201_v9  ;;  %v9020_v5 = vld [vmem:[#allocation2 + $0x5bc] sm:$0xf]  ;;  %v10043_v9 = vld [vmem:[#allocation4] sm:$0xff]  ;;  %v6681_v14 = vor.u32 %v8940_v3, %v6678_v4  ;;  %v6569_v3 = vor.u32 %v8911_v51, %v6566_v52  ;;  %v7044_v52 = vld [vmem:[#allocation2 + $0x610] sm:$0xf] }
  0xf5   : > { %2116 = vmatmul.bf16.vlgmr.msra.gmra.mxu3 %v10015_v60  ;;  %v7001_v18 = vor.u32 %v9020_v5, %v6998_v6  ;;  %v2310_v26 = vperm.slane %v10043_v9, 0  ;;  %v7164_v4 = vld [vmem:[#allocation2 + $0x700] sm:$0xf]  ;;  %v9066_v5 = vld [vmem:[#allocation2 + $0x724] sm:$0xf0]  ;;  %v2311_v51 = vperm.slane %v10043_v9, 1 }
  0xf6   : > { %2123 = vmatpush.bf16.msrb.mxu0 %v7157_v15  ;;  %v1879_v61 = vpop.f32.mrf.mxu2  ;;  %v1853_v11 = vpop.f32.mrf.mxu0  ;;  %v6956_v15 = vld [vmem:[#allocation2 + $0x568] sm:$0xf]  ;;  %v8901_v6 = vld [vmem:[#allocation2 + $0x204] sm:$0xf] }
  0xf7   : > { %2137 = vmatpush.bf16.msrb.mxu1 %v6521_v16  ;;  %v1880_v7 = vadd.f32 %v1879_v61, %v1866_v54  ;;  %v1867_v12 = vpop.f32.mrf.mxu1  ;;  %v9015_v16 = vld [vmem:[#allocation2 + $0x58c] sm:$0xf0] }
  0xf8   : > { %2151 = vmatpush.bf16.msrb.mxu2 %v6841_v17  ;;  %2165 = vmatpush.bf16.msrb.mxu3 %v7161_v21  ;;  %v8850_v17 = vld [vmem:[#allocation2 + $0x6c] sm:$0xf]  ;;  %v6638_v21 = vld [vmem:[#allocation2 + $0x310] sm:$0xf0]  ;;  %v1868_v22 = vadd.f32 %v1867_v12, %v1853_v11  ;;  %v7165_v12 = vor.u32 %v9066_v5, %v7164_v4  ;;  %v1893_v23 = vpop.f32.mrf.mxu3 }
  0xf9   : > { %v2286_v25 = vmul.f32 %v2266_v8, %v1880_v7  ;;  %v6321_v30 = vor.u32 %v8850_v17, %v6318_v19  ;;  %v6641_v31 = vor.u32 %v8930_v20, %v6638_v21  ;;  %v6526_v7 = vld [vmem:[#allocation2 + $0x228] sm:$0xf0]  ;;  %v8976_v17 = vld [vmem:[#allocation2 + $0x454] sm:$0xf0]  ;;  %v8891_v20 = vld [vmem:[#allocation2 + $0x1b4] sm:$0xf] }
  0xfa   : > { %2124 = vmatpush.bf16.msrb.mxu0 %v7117_v27  ;;  %v6957_v27 = vor.u32 %v9015_v16, %v6956_v15  ;;  %v6804_v15 = vld [vmem:[#allocation2 + $0x430] sm:$0xf]  ;;  %v6529_v16 = vor.u32 %v8901_v6, %v6526_v7  ;;  %v9056_v19 = vld [vmem:[#allocation2 + $0x6d4] sm:$0xf0]  ;;  %v6486_v21 = vld [vmem:[#allocation2 + $0x1d8] sm:$0xf0] }
  0xfb   : > { %2138 = vmatpush.bf16.msrb.mxu1 %v6481_v28  ;;  %v6916_v28 = vld [vmem:[#allocation2 + $0x518] sm:$0xf]  ;;  %v10046_v44 = vadd.f32 %v2310_v26, %v2286_v25  ;;  %v8946_v7 = vld [vmem:[#allocation2 + $0x364] sm:$0xf0] }
  0xfc   : > { %2152 = vmatpush.bf16.msrb.mxu2 %v6801_v29  ;;  %2166 = vmatpush.bf16.msrb.mxu3 %v7121_v33  ;;  %v9005_v29 = vld [vmem:[#allocation2 + $0x53c] sm:$0xf0]  ;;  %v8840_v33 = vld [vmem:[#allocation2 + $0x1c] sm:$0xf] }
  0xfd   : > { %v6917_v45 = vor.u32 %v9005_v29, %v6916_v28  ;;  %v6281_v49 = vor.u32 %v8840_v33, %v6278_v34  ;;  %v7210_v2 = vmul.f32 -1.442695, %v10046_v44  ;;  %v8886_v28 = vld [vmem:[#allocation2 + $0x184] sm:$0xf0]  ;;  %v6764_v29 = vld [vmem:[#allocation2 + $0x3e0] sm:$0xf] }
  0xfe   : > { %2125 = vmatpush.bf16.msrb.mxu0 %v7077_v39  ;;  %v1881_v32 = vpop.f32.mrf.mxu2  ;;  %v6918_v39 = vld [vmem:[#allocation2 + $0x540] sm:$0xf0]  ;;  %v9046_v33 = vld [vmem:[#allocation2 + $0x684] sm:$0xf0] }
  0xff   : > { %2139 = vmatpush.bf16.msrb.mxu1 %v6441_v42  ;;  %v1882_v40 = vadd.f32 %v1881_v32, %v1868_v22  ;;  %v8916_v42 = vld [vmem:[#allocation2 + $0x274] sm:$0xf0]  ;;  %v6921_v54 = vor.u32 %v9000_v38, %v6918_v39  ;;  %9552 = vpow2.f32 %v7210_v2  ;;  %v7084_v32 = vld [vmem:[#allocation2 + $0x660] sm:$0xf]  ;;  %v6445_v39 = vor.u32 %v8886_v28, %v6444_v24  ;;  %v8866_v2 = vld [vmem:[#allocation2 + $0xe4] sm:$0xf0] }
 0x100   : > { %2153 = vmatpush.bf16.msrb.mxu2 %v6761_v43  ;;  %2167 = vmatpush.bf16.msrb.mxu3 %v7081_v47  ;;  %v6884_v43 = vld [vmem:[#allocation2 + $0x4d0] sm:$0xf]  ;;  %v1895_v6 = vpop.f32.mrf.mxu3 }
 0x101   : > { %v7204_v47 = vld [vmem:[#allocation2 + $0x750] sm:$0xf]  ;;  %v6885_v61 = vor.u32 %v8996_v46, %v6884_v43  ;;  %v8876_v46 = vld [vmem:[#allocation2 + $0x134] sm:$0xf0] }
 0x102   : > { %2126 = vmatpush.bf16.msrb.mxu0 %v7037_v55  ;;  %v6565_v55 = vor.u32 %v8916_v42, %v6564_v41  ;;  %v7205_v62 = vor.u32 %v9076_v48, %v7204_v47  ;;  %v2267_v41 = vperm.slane %v10040_v56, 1  ;;  %v6404_v42 = vld [vmem:[#allocation2 + $0x110] sm:$0xf]  ;;  %v8956_v48 = vld [vmem:[#allocation2 + $0x3b4] sm:$0xf0] }
 0x103   : > { %2140 = vmatpush.bf16.msrb.mxu1 %v6401_v57  ;;  %v6524_v57 = vld [vmem:[#allocation2 + $0x200] sm:$0xf]  ;;  %v6724_v47 = vld [vmem:[#allocation2 + $0x390] sm:$0xf] }
 0x104   : > { %2154 = vmatpush.bf16.msrb.mxu2 %v6721_v58  ;;  %2168 = vmatpush.bf16.msrb.mxu3 %v7041_v1  ;;  %v2296_v58 = vmul.f32 %v2266_v8, %v1882_v40  ;;  %v8986_v1 = vld [vmem:[#allocation2 + $0x4a4] sm:$0xf0]  ;;  %v6644_v24 = vld [vmem:[#allocation2 + $0x2f0] sm:$0xf] }
 0x105   : > { %v6845_v8 = vor.u32 %v8986_v1, %v6844_v0  ;;  %v9553_v37 = vpop.eup %9552  ;;  %v6364_v1 = vld [vmem:[#allocation2 + $0xc0] sm:$0xf]  ;;  %v6964_v28 = vld [vmem:[#allocation2 + $0x570] sm:$0xf] }
 0x106   : > { %2127 = vmatpush.bf16.msrb.mxu0 %v6997_v10  ;;  %v6525_v10 = vor.u32 %v8906_v63, %v6524_v57  ;;  %v10049_v11 = vadd.f32 %v2310_v26, %v2296_v58  ;;  %v6805_v26 = vor.u32 %v8976_v17, %v6804_v15  ;;  %v8871_v57 = vld [vmem:[#allocation2 + $0x114] sm:$0xf]  ;;  %v6406_v58 = vld [vmem:[#allocation2 + $0x138] sm:$0xf0]  ;;  %v6725_v63 = vor.u32 %v8956_v48, %v6724_v47  ;;  %v6366_v15 = vld [vmem:[#allocation2 + $0xe8] sm:$0xf0] }
 0x107   : > { %2141 = vmatpush.bf16.msrb.mxu1 %v6361_v13  ;;  %v6484_v13 = vld [vmem:[#allocation2 + $0x1b0] sm:$0xf]  ;;  %v6409_v5 = vor.u32 %v8871_v57, %v6406_v58  ;;  %v6365_v17 = vor.u32 %v8866_v2, %v6364_v1  ;;  %v8841_v47 = vld [vmem:[#allocation2 + $0x24] sm:$0xf]  ;;  %v6286_v48 = vld [vmem:[#allocation2 + $0x48] sm:$0xf0] }
 0x108   : > { %2155 = vmatpush.bf16.msrb.mxu2 %v6681_v14  ;;  %2169 = vmatpush.bf16.msrb.mxu3 %v7001_v18  ;;  %v8896_v14 = vld [vmem:[#allocation2 + $0x1d4] sm:$0xf0]  ;;  %v7124_v18 = vld [vmem:[#allocation2 + $0x6b0] sm:$0xf]  ;;  %v7220_v25 = vmul.f32 -1.442695, %v10049_v11 }
 0x109   : > { %v6485_v22 = vor.u32 %v8896_v14, %v6484_v13  ;;  %v8861_v14 = vld [vmem:[#allocation2 + $0xc4] sm:$0xf] }
 0x10a   : > { %2128 = vmatpush.bf16.msrb.mxu0 %v6957_v27  ;;  %v7125_v27 = vor.u32 %v9056_v19, %v7124_v18  ;;  %9554 = vpow2.f32 %v7220_v25  ;;  %v6324_v19 = vld [vmem:[#allocation2 + $0x70] sm:$0xf]  ;;  %v8936_v25 = vld [vmem:[#allocation2 + $0x314] sm:$0xf0]  ;;  %v7532_v1 = vld [vmem:[%s9987_s23 + $0x258] sm:$0xf] }
 0x10b   : > { %2142 = vmatpush.bf16.msrb.mxu1 %v6321_v30  ;;  %v6489_v30 = vor.u32 %v8891_v20, %v6486_v21 }
 0x10c   : > { %2156 = vmatpush.bf16.msrb.mxu2 %v6641_v31  ;;  %2170 = vmatpush.bf16.msrb.mxu3 %v6961_v36  ;;  %v8966_v31 = vld [vmem:[#allocation2 + $0x404] sm:$0xf0]  ;;  %v6446_v36 = vld [vmem:[#allocation2 + $0x188] sm:$0xf0] }
 0x10d   : > { %v6765_v43 = vor.u32 %v8966_v31, %v6764_v29  ;;  %v9016_v29 = vld [vmem:[#allocation2 + $0x594] sm:$0xf0]  ;;  %v8851_v31 = vld [vmem:[#allocation2 + $0x74] sm:$0xf] }
 0x10e   : > { %2129 = vmatpush.bf16.msrb.mxu0 %v6917_v45  ;;  %v1907_v34 = vpop.f32.mrf.mxu0  ;;  %v7085_v45 = vor.u32 %v9046_v33, %v7084_v32  ;;  %v6326_v32 = vld [vmem:[#allocation2 + $0x98] sm:$0xf0] }
 0x10f   : > { %2143 = vmatpush.bf16.msrb.mxu1 %v6281_v49  ;;  %v1908_v38 = vadd.f32 %v1907_v34, %v1893_v23  ;;  %v1921_v40 = vpop.f32.mrf.mxu1  ;;  %v6449_v49 = vor.u32 %v8881_v35, %v6446_v36  ;;  %v8856_v23 = vld [vmem:[#allocation2 + $0x94] sm:$0xf0]  ;;  %v6284_v34 = vld [vmem:[#allocation2 + $0x20] sm:$0xf]  ;;  %v8846_v35 = vld [vmem:[#allocation2 + $0x44] sm:$0xf0] }
 0x110   : > { %2157 = vmatpush.bf16.msrb.mxu2 %v6601_v50  ;;  %2171 = vmatpush.bf16.msrb.mxu3 %v6921_v54  ;;  %v9036_v54 = vld [vmem:[#allocation2 + $0x634] sm:$0xf0]  ;;  %v6325_v33 = vor.u32 %v8856_v23, %v6324_v19  ;;  %v6604_v36 = vld [vmem:[#allocation2 + $0x2a0] sm:$0xf]  ;;  %v10097_v19 = vld [vmem:[#allocation2 + $0x728] sm:$0xf0] }
 0x111   : > { %2130 = vmatmul.bf16.vlgmr.msrb.gmra.mxu0 %v10011_v53  ;;  %v1922_v50 = vadd.f32 %v1921_v40, %v1908_v38  ;;  %v7045_v0 = vor.u32 %v9036_v54, %v7044_v52  ;;  %v6965_v40 = vor.u32 %v9016_v29, %v6964_v28  ;;  %v9071_v52 = vld [vmem:[#allocation2 + $0x754] sm:$0xf]  ;;  %v7206_v54 = vld [vmem:[#allocation2 + $0x778] sm:$0xf0]  ;;  %v9149_v29 = vld [vmem:[%s9987_s23 + $0x240] sm:$0xf0] }
 0x112   : > { %2178 = vmatpush.bf16.msra.mxu0 %v6565_v55  ;;  %2144 = vmatmul.bf16.vlgmr.msrb.gmra.mxu1 %v10013_v59  ;;  %v10058_v55 = vadd.f32 1.0, %v9553_v37  ;;  %v7352_v23 = vld [vmem:[%s9987_s23 + $0xf0] sm:$0xf] }
 0x113   : > { %2192 = vmatpush.bf16.msra.mxu1 %v6885_v61  ;;  %2158 = vmatmul.bf16.vlgmr.msrb.gmra.mxu2 %v10015_v60  ;;  %v2287_v61 = vmul.f32 %v2267_v41, %v1922_v50  ;;  %v7512_v28 = vld [vmem:[%s9987_s23 + $0x230] sm:$0xf] }
 0x114   : > { %2206 = vmatpush.bf16.msra.mxu2 %v7205_v62  ;;  %2220 = vmatpush.bf16.msra.mxu3 %v6569_v3  ;;  %v6405_v62 = vor.u32 %v8876_v46, %v6404_v42  ;;  %v6684_v3 = vld [vmem:[#allocation2 + $0x340] sm:$0xf]  ;;  %9556 = vrcp.f32 %v10058_v55  ;;  %v8926_v42 = vld [vmem:[#allocation2 + $0x2c4] sm:$0xf0]  ;;  %v6329_v46 = vor.u32 %v8851_v31, %v6326_v32  ;;  %v10108_v31 = vld [vmem:[#allocation2 + $0x434] sm:$0xf]  ;;  %vm2435_vm0 = vweird.f32 %v10058_v55 }
 0x115   : > { %2172 = vmatmul.bf16.vlgmr.msrb.gmra.mxu3 %v10011_v53  ;;  %v10064_v4 = vadd.f32 %v2311_v51, %v2287_v61  ;;  %v6685_v21 = vor.u32 %v8946_v7, %v6684_v3  ;;  %v6285_v61 = vor.u32 %v8846_v35, %v6284_v34  ;;  %v10110_v32 = vld [vmem:[#allocation2 + $0x458] sm:$0xf0] }
 0x116   : > { %2179 = vmatpush.bf16.msra.mxu0 %v6525_v10  ;;  %v7004_v10 = vld [vmem:[#allocation2 + $0x5c0] sm:$0xf]  ;;  %v1909_v13 = vpop.f32.mrf.mxu0  ;;  %v10084_v2 = vpop.f32.mrf.mxu2 }
 0x117   : > { %2193 = vmatpush.bf16.msra.mxu1 %v6845_v8  ;;  %v9026_v8 = vld [vmem:[#allocation2 + $0x5e4] sm:$0xf0]  ;;  %v1923_v18 = vpop.f32.mrf.mxu1  ;;  %v1910_v20 = vadd.f32 %v1909_v13, %v1895_v6 }
 0x118   : > { %2207 = vmatpush.bf16.msra.mxu2 %v7165_v12  ;;  %2221 = vmatpush.bf16.msra.mxu3 %v6529_v16  ;;  %v9555_v12 = vpop.eup %9554  ;;  %v7211_v16 = vmul.f32 -1.442695, %v10064_v4  ;;  %v10086_v3 = vpop.f32.mrf.mxu3 }
 0x11a   : > { %2180 = vmatpush.bf16.msra.mxu0 %v6485_v22  ;;  %v7005_v22 = vor.u32 %v9026_v8, %v7004_v10  ;;  %9558 = vpow2.f32 %v7211_v16  ;;  %v10070_v37 = vpop.eup %9556  ;;  %v9154_v10 = vld [vmem:[%s9987_s23 + $0x268] sm:$0xf0]  ;;  %v2439_v8 = vand.u32 2147483647, %v10058_v55 }
 0x11b   : > { %2194 = vmatpush.bf16.msra.mxu1 %v6805_v26  ;;  %v10068_v26 = vadd.f32 1.0, %v9555_v12  ;;  %v2431_v58 = vmul.f32 %v10070_v37, %v10058_v55  ;;  %v6289_v12 = vor.u32 %v8841_v47, %v6286_v48  ;;  %vm2436_vm1 = vweird.f32 %v10070_v37  ;;  %v10137_v47 = vld [vmem:[%s9987_s23 + $0x218] sm:$0xf0] }
 0x11c   : > { %2208 = vmatpush.bf16.msra.mxu2 %v7125_v27  ;;  %2222 = vmatpush.bf16.msra.mxu3 %v6489_v30  ;;  %v6369_v27 = vor.u32 %v8861_v14, %v6366_v15  ;;  %v1924_v30 = vadd.f32 %v1923_v18, %v1910_v20  ;;  %v8981_v14 = vld [vmem:[#allocation2 + $0x484] sm:$0xf]  ;;  %v7209_v15 = vor.u32 %v9071_v52, %v7206_v54  ;;  %v2268_v52 = vperm.slane %v10040_v56, 2  ;;  %vm10183_vm2 = vmor %vm2435_vm0, %vm2436_vm1 }
 0x11d   : > { %9560 = vrcp.f32 %v10068_v26  ;;  %v10095_v18 = vld [vmem:[#allocation2 + $0x704] sm:$0xf]  ;;  %vm2585_vm3 = vweird.f32 %v10068_v26  ;;  %vm10264_vm6 = vcmp.eq.f32.partialorder %v2439_v8, 8.507059e+37  ;;  %v2269_v8 = vperm.slane %v10040_v56, 3 }
 0x11e   : > { %2181 = vmatpush.bf16.msra.mxu0 %v6445_v39  ;;  %v2297_v38 = vmul.f32 %v2267_v41, %v1924_v30  ;;  %v6645_v39 = vor.u32 %v8936_v25, %v6644_v24  ;;  %v6886_v41 = vld [vmem:[#allocation2 + $0x4f8] sm:$0xf0]  ;;  %v9109_v24 = vld [vmem:[%s9987_s23 + $0x100] sm:$0xf0]  ;;  %v7169_v35 = vor.u32 %v10095_v18, %v10097_v19  ;;  %v10148_v54 = vld [vmem:[#allocation2 + $0x3e4] sm:$0xf] }
 0x11f   : > { %2195 = vmatpush.bf16.msra.mxu1 %v6765_v43  ;;  %v6924_v43 = vld [vmem:[#allocation2 + $0x520] sm:$0xf]  ;;  %v10193_v18 = vld [vmem:[#allocation2 + $0x614] sm:$0xf] }
 0x120   : > { %2209 = vmatpush.bf16.msra.mxu2 %v7085_v45  ;;  %2223 = vmatpush.bf16.msra.mxu3 %v6449_v49  ;;  %v9006_v45 = vld [vmem:[#allocation2 + $0x544] sm:$0xf0]  ;;  %v8991_v49 = vld [vmem:[#allocation2 + $0x4d4] sm:$0xf]  ;;  %v10077_v50 = vadd.f32 %v2311_v51, %v2297_v38  ;;  %v9559_v57 = vpop.eup %9558  ;;  %v2441_v51 = vand.u32 2147483648, %v10058_v55 }
 0x121   : > { %v6925_v7 = vor.u32 %v9006_v45, %v6924_v43  ;;  %v6889_v13 = vor.u32 %v8991_v49, %v6886_v41  ;;  %v10121_v38 = vld [vmem:[#allocation2 + $0x6d8] sm:$0xf0]  ;;  %v2589_v43 = vand.u32 2147483647, %v10068_v26  ;;  %v7513_v45 = vor.u32 %v9149_v29, %v7512_v28  ;;  %v10211_v28 = vld [vmem:[%s9987_s23 + $0x1b8] sm:$0xf] }
 0x122   : > { %2182 = vmatpush.bf16.msra.mxu0 %v6405_v62  ;;  %v6605_v62 = vor.u32 %v8926_v42, %v6604_v36  ;;  %v7221_v6 = vmul.f32 -1.442695, %v10077_v50  ;;  %v10103_v25 = vor.u32 1.1754944e-38, %v2441_v51  ;;  %v7353_v36 = vor.u32 %v9109_v24, %v7352_v23  ;;  %v10203_v23 = vld [vmem:[%s9987_s23 + $0x78] sm:$0xf] }
 0x123   : > { %2196 = vmatpush.bf16.msra.mxu1 %v6725_v63  ;;  %v7372_v63 = vld [vmem:[%s9987_s23 + $0x118] sm:$0xf]  ;;  %v10099_v20 = vpop.eup %9560  ;;  %v6809_v41 = vor.u32 %v10108_v31, %v10110_v32  ;;  %v10206_v24 = vld [vmem:[%s9987_s23 + $0x88] sm:$0xf0]  ;;  %vm10248_vm5 = vcmp.eq.f32.partialorder %v2589_v43, 8.507059e+37 }
 0x124   : > { %2210 = vmatpush.bf16.msra.mxu2 %v7045_v0  ;;  %2224 = vmatpush.bf16.msra.mxu3 %v6409_v5  ;;  %v9114_v0 = vld [vmem:[%s9987_s23 + $0x128] sm:$0xf0]  ;;  %v10089_v5 = vadd.f32 1.0, %v9559_v57  ;;  %v10117_v34 = vmul.f32 %v10099_v20, %v10068_v26  ;;  %v10150_v57 = vld [vmem:[#allocation2 + $0x408] sm:$0xf0]  ;;  %vm2586_vm4 = vweird.f32 %v10099_v20  ;;  %v7293_v43 = vor.u32 %v10206_v24, %v10203_v23 }
 0x125   : > { %v7373_v16 = vor.u32 %v9114_v0, %v7372_v63  ;;  %v10160_v63 = vld [vmem:[%s9987_s23 + $0xb0] sm:$0xf0]  ;;  %v10214_v29 = vld [vmem:[%s9987_s23 + $0x1c8] sm:$0xf0]  ;;  %v6769_v32 = vor.u32 %v10148_v54, %v10150_v57  ;;  %vm10305_vm9 = vmor %vm2585_vm3, %vm2586_vm4 }
 0x126   : > { %2183 = vmatpush.bf16.msra.mxu0 %v6365_v17  ;;  %9562 = vrcp.f32 %v10089_v5  ;;  %v6846_v17 = vld [vmem:[#allocation2 + $0x4a8] sm:$0xf0]  ;;  %vm2450_vm7 = vweird.f32 %v10089_v5 }
 0x127   : > { %2197 = vmatpush.bf16.msra.mxu1 %v6685_v21  ;;  %v2432_v21 = vsub.f32 1.0, %v2431_v58  ;;  %9564 = vpow2.f32 %v7221_v6  ;;  %v6849_v30 = vor.u32 %v8981_v14, %v6846_v17  ;;  %v10152_v58 = vld [vmem:[#allocation2 + $0x664] sm:$0xf]  ;;  %v10175_v14 = vld [vmem:[#allocation2 + $0x394] sm:$0xf]  ;;  %v2312_v17 = vperm.slane %v10043_v9, 2 }
 0x128   : > { %2211 = vmatpush.bf16.msra.mxu2 %v7005_v22  ;;  %2225 = vmatpush.bf16.msra.mxu3 %v6369_v27  ;;  %v7533_v22 = vor.u32 %v9154_v10, %v7532_v1  ;;  %v2591_v27 = vand.u32 2147483648, %v10068_v26  ;;  %v1950_v1 = vadd.f32 %v10086_v3, %v10084_v2  ;;  %v1951_v10 = vpop.f32.mrf.mxu3  ;;  %v10177_v2 = vld [vmem:[#allocation2 + $0x3b8] sm:$0xf0] }
 0x129   : > { %v2433_v42 = vmul.f32 %v10070_v37, %v2432_v21 }
 0x12a   : > { %2184 = vmatpush.bf16.msra.mxu0 %v6325_v33  ;;  %v10112_v33 = vld [vmem:[#allocation2 + $0x6b4] sm:$0xf]  ;;  %v10141_v49 = vor.u32 1.1754944e-38, %v2591_v27 }
 0x12b   : > { %2198 = vmatpush.bf16.msra.mxu1 %v6645_v39  ;;  %v10124_v39 = vld [vmem:[%s9987_s23 + $0xc8] sm:$0xf]  ;;  %v7129_v51 = vor.u32 %v10112_v33, %v10121_v38  ;;  %v10196_v19 = vadd.f32 %v10070_v37, %v2433_v42  ;;  %v10228_v38 = vld [vmem:[#allocation2 + $0x5e8] sm:$0xf0] }
 0x12c   : > { %2212 = vmatpush.bf16.msra.mxu2 %v6965_v40  ;;  %2226 = vmatpush.bf16.msra.mxu3 %v6329_v46  ;;  %v10127_v40 = vld [vmem:[%s9987_s23 + $0xd8] sm:$0xf0]  ;;  %v10134_v46 = vld [vmem:[%s9987_s23 + $0x208] sm:$0xf]  ;;  %v10139_v48 = vpop.eup %9562 }
 0x12d   : > { %v9565_v0 = vpop.eup %9564  ;;  %v7333_v6 = vor.u32 %v10127_v40, %v10124_v39  ;;  %v7493_v21 = vor.u32 %v10137_v47, %v10134_v46  ;;  %v10236_v46 = vld [vmem:[%s9987_s23 + $0x50] sm:$0xf]  ;;  %v10239_v47 = vld [vmem:[%s9987_s23 + $0x60] sm:$0xf0]  ;;  %vm2451_vm8 = vweird.f32 %v10139_v48 }
 0x12e   : > { %2185 = vmatpush.bf16.msra.mxu0 %v6285_v61  ;;  %v10154_v61 = vld [vmem:[#allocation2 + $0x688] sm:$0xf0]  ;;  %v1963_v27 = vpop.f32.mrf.mxu0  ;;  %vm10331_vm12 = vmor %vm2450_vm7, %vm2451_vm8 }
 0x12f   : > { %2199 = vmatpush.bf16.msra.mxu1 %v6605_v62  ;;  %v10157_v62 = vld [vmem:[%s9987_s23 + $0xa0] sm:$0xf]  ;;  %v1964_v31 = vadd.f32 %v1963_v27, %v1950_v1  ;;  %v7089_v33 = vor.u32 %v10152_v58, %v10154_v61  ;;  %v1977_v61 = vpop.f32.mrf.mxu1  ;;  %v7453_v1 = vor.u32 %v10214_v29, %v10211_v28  ;;  %v10299_v27 = vld [vmem:[#allocation2 + $0x574] sm:$0xf] }
 0x130   : > { %2213 = vmatpush.bf16.msra.mxu2 %v6925_v7  ;;  %2227 = vmatpush.bf16.msra.mxu3 %v6289_v12  ;;  %v1937_v7 = vpop.f32.mrf.mxu2  ;;  %v10169_v12 = vld [vmem:[%s9987_s23 + $0x1e0] sm:$0xf]  ;;  %v7812_v28 = vld [vmem:[%s9987_s23 + $0x488] sm:$0xf] }
 0x131   : > { %2186 = vmatmul.bf16.vlgmr.msra.gmra.mxu0 %v10013_v59  ;;  %v2288_v57 = vmul.f32 %v2268_v52, %v1964_v31 }
 0x132   : > { %2234 = vmatpush.bf16.msrb.mxu0 %v6889_v13  ;;  %2200 = vmatmul.bf16.vlgmr.msra.gmra.mxu1 %v10015_v60  ;;  %v10172_v13 = vld [vmem:[%s9987_s23 + $0x1f0] sm:$0xf0] }
 0x133   : > { %2248 = vmatpush.bf16.msrb.mxu1 %v7209_v15  ;;  %2214 = vmatmul.bf16.vlgmr.msra.gmra.mxu2 %v10011_v53  ;;  %v2582_v15 = vsub.f32 1.0, %v10117_v34  ;;  %v7313_v34 = vor.u32 %v10160_v63, %v10157_v62  ;;  %v7473_v42 = vor.u32 %v10172_v13, %v10169_v12  ;;  %v10257_v62 = vld [vmem:[%s9987_s23 + $0x190] sm:$0xf]  ;;  %v10260_v63 = vld [vmem:[%s9987_s23 + $0x1a0] sm:$0xf0]  ;;  %v1952_v12 = vadd.f32 %v1951_v10, %v1937_v7 }
 0x134   : > { %5320 = vmatpush.bf16.msrb.mxu2 %v7373_v16  ;;  %5334 = vmatpush.bf16.msrb.mxu3 %v7533_v22  ;;  %v2446_v16 = vmul.f32 %v10139_v48, %v10089_v5  ;;  %v10200_v22 = vld [vmem:[#allocation2 + $0x638] sm:$0xf0]  ;;  %v10278_v55 = vadd.f32 %v2312_v17, %v2288_v57  ;;  %v7273_v13 = vor.u32 %v10239_v47, %v10236_v46  ;;  %v10290_v10 = vld [vmem:[#allocation2 + $0x2f4] sm:$0xf]  ;;  %v2454_v7 = vand.u32 2147483647, %v10089_v5 }
 0x135   : > { %2228 = vmatmul.bf16.vlgmr.msra.gmra.mxu3 %v10013_v59  ;;  %v10190_v59 = vadd.f32 1.0, %v9565_v0  ;;  %v2583_v39 = vmul.f32 %v10099_v20, %v2582_v15  ;;  %v7049_v58 = vor.u32 %v10193_v18, %v10200_v22  ;;  %v2456_v18 = vand.u32 2147483648, %v10089_v5 }
 0x136   : > { %2235 = vmatpush.bf16.msrb.mxu0 %v6849_v30  ;;  %v10216_v30 = vld [vmem:[#allocation2 + $0x344] sm:$0xf]  ;;  %v2447_v40 = vsub.f32 1.0, %v2446_v16  ;;  %v10292_v16 = vld [vmem:[#allocation2 + $0x318] sm:$0xf0]  ;;  %vm10375_vm15 = vcmp.eq.f32.partialorder %v2454_v7, 8.507059e+37  ;;  %v12062_v46 = vor.u32 %v10260_v63, %v10257_v62 }
 0x137   : > { %2249 = vmatpush.bf16.msrb.mxu1 %v7169_v35  ;;  %9566 = vrcp.f32 %v10190_v59  ;;  %v10224_v35 = vld [vmem:[#allocation2 + $0x368] sm:$0xf0]  ;;  %v7212_v22 = vmul.f32 -1.442695, %v10278_v55  ;;  %vm2600_vm10 = vweird.f32 %v10190_v59  ;;  %v2604_v29 = vand.u32 2147483647, %v10190_v59 }
 0x138   : > { %5321 = vmatpush.bf16.msrb.mxu2 %v7353_v36  ;;  %5335 = vmatpush.bf16.msrb.mxu3 %v7513_v45  ;;  %v10226_v36 = vld [vmem:[#allocation2 + $0x5c4] sm:$0xf]  ;;  %v6729_v45 = vor.u32 %v10175_v14, %v10177_v2  ;;  %v2584_v2 = vadd.f32 %v10099_v20, %v2583_v39  ;;  %v2448_v15 = vmul.f32 %v10139_v48, %v2447_v40  ;;  %v1991_v23 = vpop.f32.mrf.mxu2  ;;  %v2005_v24 = vpop.f32.mrf.mxu3  ;;  %v2606_v31 = vand.u32 2147483648, %v10190_v59  ;;  %v10316_v40 = vld [vmem:[%s9987_s23 + $0x28] sm:$0xf] }
 0x139   : > { %9568 = vpow2.f32 %v7212_v22  ;;  %v7412_v22 = vld [vmem:[%s9987_s23 + $0x168] sm:$0xf]  ;;  %vm10357_vm14 = vcmp.eq.f32.partialorder %v2604_v29, 8.507059e+37  ;;  %v7852_v7 = vld [vmem:[%s9987_s23 + $0x4d8] sm:$0xf] }
 0x13a   : > { %2236 = vmatpush.bf16.msrb.mxu0 %v6809_v41  ;;  %v2438_v41 = vsel %vm10183_vm2, %v10070_v37, %v10196_v19  ;;  %v2449_v57 = vadd.f32 %v10139_v48, %v2448_v15  ;;  %v7692_v37 = vld [vmem:[%s9987_s23 + $0x398] sm:$0xf] }
 0x13b   : > { %2250 = vmatpush.bf16.msrb.mxu1 %v7129_v51  ;;  %v6689_v51 = vor.u32 %v10216_v30, %v10224_v35  ;;  %v7392_v35 = vld [vmem:[%s9987_s23 + $0x140] sm:$0xf]  ;;  %v2443_v54 = vsel %vm10264_vm6, %v10103_v25, %v2438_v41 }
 0x13c   : > { %5322 = vmatpush.bf16.msrb.mxu2 %v7333_v6  ;;  %5336 = vmatpush.bf16.msrb.mxu3 %v7493_v21  ;;  %v7009_v6 = vor.u32 %v10226_v36, %v10228_v38  ;;  %v2453_v29 = vsel %vm10331_vm12, %v10139_v48, %v2449_v57 }
 0x13d   : > { %v10283_v14 = vpop.eup %9566 }
 0x13e   : > { %2237 = vmatpush.bf16.msrb.mxu0 %v6769_v32  ;;  %v2596_v21 = vmul.f32 %v10283_v14, %v10190_v59  ;;  %v1992_v32 = vadd.f32 %v1991_v23, %v1977_v61  ;;  %vm2601_vm11 = vweird.f32 %v10283_v14  ;;  %v9124_v23 = vld [vmem:[%s9987_s23 + $0x178] sm:$0xf0] }
 0x13f   : > { %2251 = vmatpush.bf16.msrb.mxu1 %v7089_v33  ;;  %v1965_v33 = vpop.f32.mrf.mxu0  ;;  %vm10346_vm13 = vmor %vm2600_vm10, %vm2601_vm11  ;;  %v9569_v48 = vpop.eup %9568  ;;  %v7413_v47 = vor.u32 %v9124_v23, %v7412_v22  ;;  %v7832_v22 = vld [vmem:[%s9987_s23 + $0x4b0] sm:$0xf]  ;;  %v9229_v23 = vld [vmem:[%s9987_s23 + $0x4c0] sm:$0xf0] }
 0x140   : > { %5323 = vmatpush.bf16.msrb.mxu2 %v7313_v34  ;;  %5337 = vmatpush.bf16.msrb.mxu3 %v7473_v42  ;;  %v10312_v34 = vld [vmem:[#allocation2 + $0x598] sm:$0xf0]  ;;  %v2597_v39 = vsub.f32 1.0, %v2596_v21  ;;  %v1966_v26 = vadd.f32 %v1965_v33, %v1952_v12  ;;  %v10319_v42 = vld [vmem:[%s9987_s23 + $0x38] sm:$0xf0]  ;;  %v2006_v61 = vadd.f32 %v2005_v24, %v1992_v32  ;;  %v2313_v21 = vperm.slane %v10043_v9, 3  ;;  %v1993_v3 = vpop.f32.mrf.mxu2 }
 0x141   : > { %v2457_v24 = vor.u32 1.1754944e-38, %v2456_v18  ;;  %v9001_v32 = vld [vmem:[#allocation2 + $0x524] sm:$0xf]  ;;  %v6926_v33 = vld [vmem:[#allocation2 + $0x548] sm:$0xf0]  ;;  %v10410_v25 = vadd.f32 1.0, %v9569_v48 }
 0x142   : > { %2238 = vmatpush.bf16.msrb.mxu0 %v6729_v45  ;;  %v2588_v45 = vsel %vm10305_vm9, %v10099_v20, %v2584_v2  ;;  %v2598_v15 = vmul.f32 %v10283_v14, %v2597_v39  ;;  %v2607_v20 = vor.u32 1.1754944e-38, %v2606_v31  ;;  %v7253_v2 = vor.u32 %v10319_v42, %v10316_v40  ;;  %v9234_v39 = vld [vmem:[%s9987_s23 + $0x4e8] sm:$0xf0]  ;;  %v9184_v9 = vld [vmem:[%s9987_s23 + $0x358] sm:$0xf0] }
 0x143   : > { %2252 = vmatpush.bf16.msrb.mxu1 %v7049_v58  ;;  %v2298_v58 = vmul.f32 %v2268_v52, %v1966_v26  ;;  %v6969_v52 = vor.u32 %v10299_v27, %v10312_v34  ;;  %v1979_v27 = vpop.f32.mrf.mxu1  ;;  %v7232_v34 = vld [vmem:[%s9987_s23] sm:$0xf]  ;;  %v2593_v18 = vsel %vm10248_vm5, %v10141_v49, %v2588_v45  ;;  %v9079_v49 = vld [vmem:[%s9987_s23 + $0x10] sm:$0xf0]  ;;  %v2458_v62 = vsel %vm10375_vm15, %v2457_v24, %v2453_v29  ;;  %v10461_v29 = vld [vmem:[%s9987_s23 + $0x2f8] sm:$0xf] }
 0x144   : > { %5324 = vmatpush.bf16.msrb.mxu2 %v7293_v43  ;;  %5338 = vmatpush.bf16.msrb.mxu3 %v7453_v1  ;;  %v6649_v43 = vor.u32 %v10290_v10, %v10292_v16  ;;  %v2289_v1 = vmul.f32 %v2269_v8, %v2006_v61  ;;  %v8921_v10 = vld [vmem:[#allocation2 + $0x2a4] sm:$0xf]  ;;  %v6606_v16 = vld [vmem:[#allocation2 + $0x2c8] sm:$0xf0]  ;;  %v2599_v59 = vadd.f32 %v10283_v14, %v2598_v15  ;;  %vm2465_vm2 = vweird.f32 %v10410_v25 }
 0x145   : > { %v10363_v31 = vadd.f32 %v2312_v17, %v2298_v58  ;;  %v1994_v0 = vadd.f32 %v1993_v3, %v1979_v27  ;;  %v6609_v63 = vor.u32 %v8921_v10, %v6606_v16  ;;  %v6929_v40 = vor.u32 %v9001_v32, %v6926_v33  ;;  %v9189_v15 = vld [vmem:[%s9987_s23 + $0x380] sm:$0xf0]  ;;  %v7652_v16 = vld [vmem:[%s9987_s23 + $0x348] sm:$0xf]  ;;  %v9224_v27 = vld [vmem:[%s9987_s23 + $0x498] sm:$0xf0] }
 0x146   : > { %2239 = vmatpush.bf16.msrb.mxu0 %v6689_v51  ;;  %v10381_v30 = vadd.f32 %v2313_v21, %v2289_v1  ;;  %v2603_v36 = vsel %vm10346_vm13, %v10283_v14, %v2599_v59  ;;  %v9119_v51 = vld [vmem:[%s9987_s23 + $0x150] sm:$0xf0]  ;;  %v2740_v14 = vmul.f32 %v2593_v18, %v10049_v11  ;;  %v7233_v11 = vor.u32 %v9079_v49, %v7232_v34  ;;  %v9274_v1 = vld [vmem:[%s9987_s23 + $0x628] sm:$0xf0]  ;;  %v7992_v33 = vld [vmem:[%s9987_s23 + $0x5f0] sm:$0xf] }
 0x147   : > { %2253 = vmatpush.bf16.msrb.mxu1 %v7009_v6  ;;  %v7222_v38 = vmul.f32 -1.442695, %v10363_v31  ;;  %v2608_v19 = vsel %vm10357_vm14, %v2607_v20, %v2603_v36  ;;  %v2007_v6 = vpop.f32.mrf.mxu3  ;;  %v7393_v57 = vor.u32 %v9119_v51, %v7392_v35  ;;  %v2730_v45 = vmul.f32 %v2443_v54, %v10046_v44  ;;  %v8012_v44 = vld [vmem:[%s9987_s23 + $0x618] sm:$0xf]  ;;  %v9179_v32 = vld [vmem:[%s9987_s23 + $0x330] sm:$0xf0] }
 0x148   : > { %5325 = vmatpush.bf16.msrb.mxu2 %v7273_v13  ;;  %5339 = vmatpush.bf16.msrb.mxu3 %v12062_v46  ;;  %v7213_v41 = vmul.f32 -1.442695, %v10381_v30  ;;  %v9194_v13 = vld [vmem:[%s9987_s23 + $0x3a8] sm:$0xf0]  ;;  %v2741_v26 = vmul.f32 %v2608_v19, %v10077_v50  ;;  %v2008_v42 = vadd.f32 %v2007_v6, %v1994_v0  ;;  %v2731_v12 = vmul.f32 %v2458_v62, %v10064_v4  ;;  %v7672_v50 = vld [vmem:[%s9987_s23 + $0x370] sm:$0xf] }
 0x149   : > { %9570 = vpow2.f32 %v7222_v38  ;;  %v7693_v61 = vor.u32 %v9194_v13, %v7692_v37  ;;  %v7853_v58 = vor.u32 %v9234_v39, %v7852_v7  ;;  %v10429_v5 = vpack.c.bf16 %v2740_v14, %v2730_v45  ;;  %v9269_v17 = vld [vmem:[%s9987_s23 + $0x600] sm:$0xf0]  ;;  %v10465_v35 = vld [vmem:[%s9987_s23 + $0x308] sm:$0xf0]  ;;  %v7792_v48 = vld [vmem:[%s9987_s23 + $0x460] sm:$0xf] }
 0x14a   : > { %2240 = vmatpush.bf16.msrb.mxu0 %v6649_v43  ;;  %9572 = vrcp.f32 %v10410_v25  ;;  %v2299_v43 = vmul.f32 %v2269_v8, %v2008_v42  ;;  %v10431_v20 = vpack.c.bf16 %v2741_v26, %v2731_v12  ;;  %v7673_v56 = vor.u32 %v9189_v15, %v7672_v50  ;;  %v9219_v54 = vld [vmem:[%s9987_s23 + $0x470] sm:$0xf0]  ;;  %v10471_v38 = vld [vmem:[%s9987_s23 + $0x2d0] sm:$0xf]  ;;  %v10474_v46 = vld [vmem:[%s9987_s23 + $0x2e0] sm:$0xf0] }
 0x14b   : > { %2254 = vmatpush.bf16.msrb.mxu1 %v6969_v52  ;;  %9574 = vpow2.f32 %v7213_v41  ;;  %v8013_v8 = vor.u32 %v9274_v1, %v8012_v44  ;;  %v7653_v18 = vor.u32 %v9184_v9, %v7652_v16  ;;  %v7813_v49 = vor.u32 %v9224_v27, %v7812_v28  ;;  %v10480_v3 = vld [vmem:[%s9987_s23 + $0x448] sm:$0xf0]  ;;  %v7972_v51 = vld [vmem:[%s9987_s23 + $0x5c8] sm:$0xf]  ;;  %v9264_v37 = vld [vmem:[%s9987_s23 + $0x5d8] sm:$0xf0] }
 0x14c   : > { %5326 = vmatpush.bf16.msrb.mxu2 %v7253_v2  ;;  %5340 = vmatpush.bf16.msrb.mxu3 %v7413_v47  ;;  %v10437_v52 = vadd.f32 %v2313_v21, %v2299_v43  ;;  %v7833_v21 = vor.u32 %v9229_v23, %v7832_v22  ;;  %v7993_v36 = vor.u32 %v9269_v17, %v7992_v33  ;;  %v10477_v47 = vld [vmem:[%s9987_s23 + $0x438] sm:$0xf]  ;;  %v10487_v14 = vld [vmem:[%s9987_s23 + $0x2a8] sm:$0xf]  ;;  %v10490_v62 = vld [vmem:[%s9987_s23 + $0x2b8] sm:$0xf0] }
 0x14d   : > { %v7613_v13 = vor.u32 %v10465_v35, %v10461_v29  ;;  %v10497_v39 = vld [vmem:[%s12023_s2] sm:$0xff]  ;;  %v7793_v42 = vor.u32 %v9219_v54, %v7792_v48  ;;  %v2469_v45 = vand.u32 2147483647, %v10410_v25  ;;  %v10513_v43 = vld [vmem:[%s9987_s23 + $0x420] sm:$0xf0]  ;;  %v7773_v23 = vor.u32 %v10480_v3, %v10477_v47 }
 0x14e   : > { %2241 = vmatpush.bf16.msrb.mxu0 %v6609_v63  ;;  %v7223_v59 = vmul.f32 -1.442695, %v10437_v52  ;;  %v2019_v0 = vpop.f32.mrf.mxu0  ;;  %v7973_v63 = vor.u32 %v9264_v37, %v7972_v51  ;;  %v2270_v26 = vperm.slane %v10497_v39, 4  ;;  %v7573_v44 = vor.u32 %v10490_v62, %v10487_v14  ;;  %v7952_v1 = vld [vmem:[%s9987_s23 + $0x5a0] sm:$0xf] }
 0x14f   : > { %2255 = vmatpush.bf16.msrb.mxu1 %v6929_v40  ;;  %v9571_v4 = vpop.eup %9570  ;;  %v2033_v6 = vpop.f32.mrf.mxu1  ;;  %v10500_v40 = vld [vmem:[#allocation4] sm:$0xff]  ;;  %v10529_v9 = vld [vmem:[%s9987_s23 + $0x280] sm:$0xf]  ;;  %vm10542_vm4 = vcmp.eq.f32.partialorder %v2469_v45, 8.507059e+37  ;;  %v9254_v48 = vld [vmem:[%s9987_s23 + $0x588] sm:$0xf0] }
 0x150   : > { %5327 = vmatpush.bf16.msrb.mxu2 %v7233_v11  ;;  %5341 = vmatpush.bf16.msrb.mxu3 %v7393_v57  ;;  %v10439_v2 = vpop.eup %9572  ;;  %v10441_v10 = vadd.f32 1.0, %v9571_v4  ;;  %v2314_v11 = vperm.slane %v10500_v40, 4  ;;  %v7593_v57 = vor.u32 %v10474_v46, %v10471_v38  ;;  %v2034_v15 = vadd.f32 %v2033_v6, %v2019_v0  ;;  %v9259_v4 = vld [vmem:[%s9987_s23 + $0x5b0] sm:$0xf0]  ;;  %v7932_v35 = vld [vmem:[%s9987_s23 + $0x578] sm:$0xf] }
 0x151   : > { %2242 = vmatmul.bf16.vlgmr.msrb.gmra.mxu0 %v10015_v60  ;;  %v9575_v24 = vpop.eup %9574  ;;  %v7632_v60 = vld [vmem:[%s9987_s23 + $0x320] sm:$0xf]  ;;  %vm2466_vm3 = vweird.f32 %v10439_v2  ;;  %v7732_v37 = vld [vmem:[%s9987_s23 + $0x3e8] sm:$0xf] }
 0x152   : > { %5348 = vmatpush.bf16.msra.mxu0 %v7693_v61  ;;  %2256 = vmatmul.bf16.vlgmr.msrb.gmra.mxu1 %v10011_v53  ;;  %9576 = vrcp.f32 %v10441_v10  ;;  %v2461_v53 = vmul.f32 %v10439_v2, %v10410_v25  ;;  %v10458_v34 = vadd.f32 1.0, %v9575_v24  ;;  %v7633_v41 = vor.u32 %v9179_v32, %v7632_v60  ;;  %vm10574_vm7 = vmor %vm2465_vm2, %vm2466_vm3  ;;  %v7712_v38 = vld [vmem:[%s9987_s23 + $0x3c0] sm:$0xf] }
 0x153   : > { %5362 = vmatpush.bf16.msra.mxu1 %v7853_v58  ;;  %5328 = vmatmul.bf16.vlgmr.msrb.gmra.mxu2 %v10429_v5  ;;  %9578 = vpow2.f32 %v7223_v59  ;;  %v2619_v50 = vand.u32 2147483647, %v10441_v10  ;;  %v10510_v58 = vld [vmem:[%s9987_s23 + $0x410] sm:$0xf]  ;;  %vm2615_vm0 = vweird.f32 %v10441_v10  ;;  %v7953_v24 = vor.u32 %v9259_v4, %v7952_v1 }
 0x154   : > { %5342 = vmatmul.bf16.vlgmr.msrb.gmra.mxu3 %v10431_v20  ;;  %5376 = vmatpush.bf16.msra.mxu2 %v8013_v8  ;;  %9580 = vrcp.f32 %v10458_v34  ;;  %v2462_v19 = vsub.f32 1.0, %v2461_v53  ;;  %v2621_v59 = vand.u32 2147483648, %v10441_v10  ;;  %v2471_v60 = vand.u32 2147483648, %v10410_v25 }
 0x155   : > { %v7753_v17 = vor.u32 %v10513_v43, %v10510_v58  ;;  %vm10562_vm6 = vcmp.eq.f32.partialorder %v2619_v50, 8.507059e+37  ;;  %vm2480_vm8 = vweird.f32 %v10458_v34  ;;  %v2484_v25 = vand.u32 2147483647, %v10458_v34  ;;  %v7912_v58 = vld [vmem:[%s9987_s23 + $0x550] sm:$0xf] }
 0x156   : > { %5349 = vmatpush.bf16.msra.mxu0 %v7673_v56  ;;  %v2463_v8 = vmul.f32 %v10439_v2, %v2462_v19  ;;  %v2047_v27 = vpop.f32.mrf.mxu2  ;;  %v2021_v3 = vpop.f32.mrf.mxu0  ;;  %v9204_v19 = vld [vmem:[%s9987_s23 + $0x3f8] sm:$0xf0]  ;;  %v2622_v0 = vor.u32 1.1754944e-38, %v2621_v59  ;;  %v2472_v45 = vor.u32 1.1754944e-38, %v2471_v60  ;;  %v9249_v43 = vld [vmem:[%s9987_s23 + $0x560] sm:$0xf0] }
 0x157   : > { %5363 = vmatpush.bf16.msra.mxu1 %v7833_v21  ;;  %v10532_v21 = vld [vmem:[%s9987_s23 + $0x290] sm:$0xf0]  ;;  %v2048_v33 = vadd.f32 %v2047_v27, %v2034_v15  ;;  %v2035_v51 = vpop.f32.mrf.mxu1  ;;  %v7733_v15 = vor.u32 %v9204_v19, %v7732_v37  ;;  %v7913_v46 = vor.u32 %v9249_v43, %v7912_v58  ;;  %vm10622_vm13 = vcmp.eq.f32.partialorder %v2484_v25, 8.507059e+37  ;;  %v7872_v19 = vld [vmem:[%s9987_s23 + $0x500] sm:$0xf] }
 0x158   : > { %5377 = vmatpush.bf16.msra.mxu2 %v7993_v36  ;;  %v10492_v7 = vpop.eup %9576  ;;  %v2464_v54 = vadd.f32 %v10439_v2, %v2463_v8  ;;  %v2036_v50 = vadd.f32 %v2035_v51, %v2021_v3  ;;  %v9199_v59 = vld [vmem:[%s9987_s23 + $0x3d0] sm:$0xf0]  ;;  %v8312_v25 = vld [vmem:[%s9987_s23 + $0x870] sm:$0xf]  ;;  %v8132_v43 = vld [vmem:[%s9987_s23 + $0x708] sm:$0xf] }
 0x159   : > { %v9579_v61 = vpop.eup %9578  ;;  %v2611_v12 = vmul.f32 %v10492_v7, %v10441_v10  ;;  %vm2616_vm1 = vweird.f32 %v10492_v7  ;;  %v2290_v47 = vmul.f32 %v2270_v26, %v2048_v33  ;;  %v7892_v33 = vld [vmem:[%s9987_s23 + $0x528] sm:$0xf]  ;;  %v7713_v14 = vor.u32 %v9199_v59, %v7712_v38  ;;  %v9299_v38 = vld [vmem:[%s9987_s23 + $0x6f0] sm:$0xf0]  ;;  %v8472_v27 = vld [vmem:[%s9987_s23 + $0x9b0] sm:$0xf] }
 0x15a   : > { %5350 = vmatpush.bf16.msra.mxu0 %v7653_v18  ;;  %v10516_v22 = vadd.f32 1.0, %v9579_v61  ;;  %v10524_v56 = vpop.eup %9580  ;;  %vm10550_vm5 = vmor %vm2615_vm0, %vm2616_vm1  ;;  %v9244_v18 = vld [vmem:[%s9987_s23 + $0x538] sm:$0xf0] }
 0x15b   : > { %5364 = vmatpush.bf16.msra.mxu1 %v7813_v49  ;;  %v2612_v16 = vsub.f32 1.0, %v2611_v12  ;;  %v2476_v28 = vmul.f32 %v10524_v56, %v10458_v34  ;;  %v7553_v49 = vor.u32 %v10532_v21, %v10529_v9  ;;  %vm2481_vm9 = vweird.f32 %v10524_v56 }
 0x15c   : > { %5378 = vmatpush.bf16.msra.mxu2 %v7973_v63  ;;  %9582 = vrcp.f32 %v10516_v22  ;;  %v2486_v12 = vand.u32 2147483648, %v10458_v34  ;;  %vm10610_vm10 = vmor %vm2480_vm8, %vm2481_vm9  ;;  %vm2630_vm11 = vweird.f32 %v10516_v22  ;;  %v2634_v34 = vand.u32 2147483647, %v10516_v22 }
 0x15d   : > { %v2613_v32 = vmul.f32 %v10492_v7, %v2612_v16  ;;  %v2477_v29 = vsub.f32 1.0, %v2476_v28  ;;  %v2636_v16 = vand.u32 2147483648, %v10516_v22  ;;  %v7893_v53 = vor.u32 %v9244_v18, %v7892_v33 }
 0x15e   : > { %5351 = vmatpush.bf16.msra.mxu0 %v7633_v41  ;;  %v2487_v60 = vor.u32 1.1754944e-38, %v2486_v12  ;;  %vm10652_vm15 = vcmp.eq.f32.partialorder %v2634_v34, 8.507059e+37 }
 0x15f   : > { %5365 = vmatpush.bf16.msra.mxu1 %v7793_v42  ;;  %v2614_v36 = vadd.f32 %v10492_v7, %v2613_v32  ;;  %v2478_v6 = vmul.f32 %v10524_v56, %v2477_v29  ;;  %v10587_v42 = vadd.f32 %v2314_v11, %v2290_v47 }
 0x160   : > { %5379 = vmatpush.bf16.msra.mxu2 %v7953_v24  ;;  %v2049_v24 = vpop.f32.mrf.mxu2 }
 0x161   : > { %v2618_v63 = vsel %vm10550_vm5, %v10492_v7, %v2614_v36  ;;  %v2468_v7 = vsel %vm10574_vm7, %v10439_v2, %v2464_v54  ;;  %v7214_v4 = vmul.f32 -1.442695, %v10587_v42  ;;  %v2050_v32 = vadd.f32 %v2049_v24, %v2036_v50  ;;  %v9314_v54 = vld [vmem:[%s9987_s23 + $0x768] sm:$0xf0]  ;;  %v8332_v36 = vld [vmem:[%s9987_s23 + $0x898] sm:$0xf] }
 0x162   : > { %5352 = vmatpush.bf16.msra.mxu0 %v7613_v13  ;;  %v7933_v13 = vor.u32 %v9254_v48, %v7932_v35  ;;  %v10589_v61 = vpop.eup %9582  ;;  %v2623_v8 = vsel %vm10562_vm6, %v2622_v0, %v2618_v63  ;;  %v2473_v28 = vsel %vm10542_vm4, %v2472_v45, %v2468_v7  ;;  %v8172_v48 = vld [vmem:[%s9987_s23 + $0x758] sm:$0xf]  ;;  %v8152_v63 = vld [vmem:[%s9987_s23 + $0x730] sm:$0xf]  ;;  %v9304_v7 = vld [vmem:[%s9987_s23 + $0x718] sm:$0xf0] }
 0x163   : > { %5366 = vmatpush.bf16.msra.mxu1 %v7773_v23  ;;  %v2479_v23 = vadd.f32 %v10524_v56, %v2478_v6  ;;  %v2626_v1 = vmul.f32 %v10589_v61, %v10516_v22  ;;  %vm2631_vm12 = vweird.f32 %v10589_v61  ;;  %9584 = vpow2.f32 %v7214_v4  ;;  %v8492_v4 = vld [vmem:[%s9987_s23 + $0x9d8] sm:$0xf]  ;;  %v9394_v2 = vld [vmem:[%s9987_s23 + $0x9e8] sm:$0xf0]  ;;  %v8112_v24 = vld [vmem:[%s9987_s23 + $0x6e0] sm:$0xf] }
 0x164   : > { %5380 = vmatpush.bf16.msra.mxu2 %v7933_v13  ;;  %v2742_v29 = vmul.f32 %v2623_v8, %v10363_v31  ;;  %vm10643_vm14 = vmor %vm2630_vm11, %vm2631_vm12  ;;  %v2300_v10 = vmul.f32 %v2270_v26, %v2050_v32  ;;  %v8173_v62 = vor.u32 %v9314_v54, %v8172_v48  ;;  %v2732_v47 = vmul.f32 %v2473_v28, %v10278_v55  ;;  %v9239_v55 = vld [vmem:[%s9987_s23 + $0x510] sm:$0xf0] }
 0x165   : > { %v7873_v13 = vor.u32 %v9239_v55, %v7872_v19  ;;  %v8113_v59 = vor.u32 %v9299_v38, %v8112_v24  ;;  %v9339_v28 = vld [vmem:[%s9987_s23 + $0x830] sm:$0xf0]  ;;  %v2315_v31 = vperm.slane %v10500_v40, 5  ;;  %v9384_v19 = vld [vmem:[%s9987_s23 + $0x998] sm:$0xf0] }
 0x166   : > { %5353 = vmatpush.bf16.msra.mxu0 %v7593_v57  ;;  %v2627_v57 = vsub.f32 1.0, %v2626_v1  ;;  %v10660_v26 = vadd.f32 %v2314_v11, %v2300_v10  ;;  %5390 = vmatpush.bf16.msra.mxu3 %v8173_v62  ;;  %v10664_v0 = vpack.c.bf16 %v2742_v29, %v2732_v47  ;;  %v9309_v11 = vld [vmem:[%s9987_s23 + $0x740] sm:$0xf0]  ;;  %v9344_v1 = vld [vmem:[%s9987_s23 + $0x858] sm:$0xf0] }
 0x167   : > { %5367 = vmatpush.bf16.msra.mxu1 %v7753_v17  ;;  %v2483_v17 = vsel %vm10610_vm10, %v10524_v56, %v2479_v23  ;;  %v2637_v56 = vor.u32 1.1754944e-38, %v2636_v16  ;;  %v2061_v23 = vpop.f32.mrf.mxu3  ;;  %v8493_v16 = vor.u32 %v9394_v2, %v8492_v4  ;;  %v9294_v10 = vld [vmem:[%s9987_s23 + $0x6c8] sm:$0xf0]  ;;  %v9284_v2 = vld [vmem:[%s9987_s23 + $0x678] sm:$0xf0] }
 0x168   : > { %5381 = vmatpush.bf16.msra.mxu2 %v7913_v46  ;;  %v2628_v35 = vmul.f32 %v10589_v61, %v2627_v57  ;;  %v2488_v37 = vsel %vm10622_vm13, %v2487_v60, %v2483_v17  ;;  %v7224_v50 = vmul.f32 -1.442695, %v10660_v26  ;;  %v8272_v46 = vld [vmem:[%s9987_s23 + $0x820] sm:$0xf]  ;;  %v9389_v60 = vld [vmem:[%s9987_s23 + $0x9c0] sm:$0xf0] }
 0x169   : > { %v9585_v41 = vpop.eup %9584  ;;  %v2733_v9 = vmul.f32 %v2488_v37, %v10381_v30  ;;  %v8292_v30 = vld [vmem:[%s9987_s23 + $0x848] sm:$0xf]  ;;  %v2271_v17 = vperm.slane %v10497_v39, 5  ;;  %v8473_v48 = vor.u32 %v9389_v60, %v8472_v27  ;;  %v9334_v47 = vld [vmem:[%s9987_s23 + $0x808] sm:$0xf0] }
 0x16a   : > { %5354 = vmatpush.bf16.msra.mxu0 %v7573_v44  ;;  %v9354_v44 = vld [vmem:[%s9987_s23 + $0x8a8] sm:$0xf0]  ;;  %v2629_v22 = vadd.f32 %v10589_v61, %v2628_v35  ;;  %v10677_v12 = vadd.f32 1.0, %v9585_v41  ;;  %v8293_v8 = vor.u32 %v9344_v1, %v8292_v30  ;;  %v8273_v35 = vor.u32 %v9339_v28, %v8272_v46  ;;  %v7334_v24 = vld [vmem:[%s9987_s23 + $0xdc] sm:$0xf0] }
 0x16b   : > { %5368 = vmatpush.bf16.msra.mxu1 %v7733_v15  ;;  %v8333_v51 = vor.u32 %v9354_v44, %v8332_v36  ;;  %v9349_v15 = vld [vmem:[%s9987_s23 + $0x880] sm:$0xf0]  ;;  %v8632_v28 = vld [vmem:[%s9987_s23 + $0xaf0] sm:$0xf] }
 0x16c   : > { %5382 = vmatpush.bf16.msra.mxu2 %v7893_v53  ;;  %v2633_v6 = vsel %vm10643_vm14, %v10589_v61, %v2629_v22  ;;  %v8153_v61 = vor.u32 %v9309_v11, %v8152_v63  ;;  %9586 = vrcp.f32 %v10677_v12  ;;  %v8452_v22 = vld [vmem:[%s9987_s23 + $0x988] sm:$0xf]  ;;  %v2499_v3 = vand.u32 2147483647, %v10677_v12  ;;  %v9289_v63 = vld [vmem:[%s9987_s23 + $0x6a0] sm:$0xf0] }
 0x16d   : > { %v2638_v45 = vsel %vm10652_vm15, %v2637_v56, %v2633_v6  ;;  %9588 = vpow2.f32 %v7224_v50  ;;  %v8092_v56 = vld [vmem:[%s9987_s23 + $0x6b8] sm:$0xf]  ;;  %v8453_v6 = vor.u32 %v9384_v19, %v8452_v22  ;;  %v8232_v11 = vld [vmem:[%s9987_s23 + $0x7d0] sm:$0xf]  ;;  %vm2495_vm0 = vweird.f32 %v10677_v12  ;;  %v9329_v50 = vld [vmem:[%s9987_s23 + $0x7e0] sm:$0xf0] }
 0x16e   : > { %5355 = vmatpush.bf16.msra.mxu0 %v7553_v49  ;;  %v2743_v21 = vmul.f32 %v2638_v45, %v10437_v52  ;;  %v8313_v49 = vor.u32 %v9349_v15, %v8312_v25  ;;  %5391 = vmatpush.bf16.msra.mxu3 %v8153_v61  ;;  %v8133_v52 = vor.u32 %v9304_v7, %v8132_v43  ;;  %v2075_v34 = vpop.f32.mrf.mxu0  ;;  %v8432_v61 = vld [vmem:[%s9987_s23 + $0x960] sm:$0xf]  ;;  %v9379_v15 = vld [vmem:[%s9987_s23 + $0x970] sm:$0xf0]  ;;  %vm10750_vm5 = vcmp.eq.f32.partialorder %v2499_v3, 8.507059e+37 }
 0x16f   : > { %5369 = vmatpush.bf16.msra.mxu1 %v7713_v14  ;;  %v2076_v18 = vadd.f32 %v2075_v34, %v2061_v23  ;;  %v2089_v29 = vpop.f32.mrf.mxu1  ;;  %v8252_v14 = vld [vmem:[%s9987_s23 + $0x7f8] sm:$0xf]  ;;  %v8093_v44 = vor.u32 %v9294_v10, %v8092_v56  ;;  %v8233_v23 = vor.u32 %v9329_v50, %v8232_v11  ;;  %v9324_v34 = vld [vmem:[%s9987_s23 + $0x7b8] sm:$0xf0]  ;;  %v8032_v56 = vld [vmem:[%s9987_s23 + $0x640] sm:$0xf] }
 0x170   : > { %5383 = vmatpush.bf16.msra.mxu2 %v7873_v13  ;;  %v10685_v58 = vpack.c.bf16 %v2743_v21, %v2733_v9  ;;  %v8253_v37 = vor.u32 %v9334_v47, %v8252_v14  ;;  %v8072_v13 = vld [vmem:[%s9987_s23 + $0x690] sm:$0xf]  ;;  %v2501_v9 = vand.u32 2147483648, %v10677_v12  ;;  %v9279_v10 = vld [vmem:[%s9987_s23 + $0x650] sm:$0xf0] }
 0x171   : > { %5356 = vmatmul.bf16.vlgmr.msra.gmra.mxu0 %v10664_v0  ;;  %v2090_v36 = vadd.f32 %v2089_v29, %v2076_v18  ;;  %v8073_v45 = vor.u32 %v9289_v63, %v8072_v13  ;;  %v9369_v47 = vld [vmem:[%s9987_s23 + $0x920] sm:$0xf0]  ;;  %v8372_v50 = vld [vmem:[%s9987_s23 + $0x8e8] sm:$0xf] }
 0x172   : > { %5404 = vmatpush.bf16.msrb.mxu0 %v8333_v51  ;;  %5370 = vmatmul.bf16.vlgmr.msra.gmra.mxu1 %v10685_v58  ;;  %v10697_v57 = vpop.eup %9586  ;;  %v2063_v51 = vpop.f32.mrf.mxu3 }
 0x173   : > { %5392 = vmatpush.bf16.msra.mxu3 %v8133_v52  ;;  %5418 = vmatpush.bf16.msrb.mxu1 %v8493_v16  ;;  %v9589_v32 = vpop.eup %9588  ;;  %v2491_v33 = vmul.f32 %v10697_v57, %v10677_v12  ;;  %v2291_v62 = vmul.f32 %v2271_v17, %v2090_v36  ;;  %vm2496_vm1 = vweird.f32 %v10697_v57  ;;  %v8433_v52 = vor.u32 %v9379_v15, %v8432_v61  ;;  %v8212_v16 = vld [vmem:[%s9987_s23 + $0x7a8] sm:$0xf]  ;;  %v9364_v61 = vld [vmem:[%s9987_s23 + $0x8f8] sm:$0xf0] }
 0x174   : > { %v10705_v53 = vadd.f32 1.0, %v9589_v32  ;;  %vm10744_vm4 = vmor %vm2495_vm0, %vm2496_vm1  ;;  %v8213_v12 = vor.u32 %v9324_v34, %v8212_v16  ;;  %v9374_v32 = vld [vmem:[%s9987_s23 + $0x948] sm:$0xf0] }
 0x175   : > { %v2492_v54 = vsub.f32 1.0, %v2491_v33  ;;  %v10721_v41 = vadd.f32 %v2315_v31, %v2291_v62  ;;  %v2502_v33 = vor.u32 1.1754944e-38, %v2501_v9  ;;  %v8033_v62 = vor.u32 %v9279_v10, %v8032_v56  ;;  %v9107_v9 = vld [vmem:[%s9987_s23 + $0xf4] sm:$0xf]  ;;  %v9102_v16 = vld [vmem:[%s9987_s23 + $0xcc] sm:$0xf] }
 0x176   : > { %5405 = vmatpush.bf16.msrb.mxu0 %v8313_v49  ;;  %9590 = vrcp.f32 %v10705_v53  ;;  %v2077_v25 = vpop.f32.mrf.mxu0  ;;  %vm2645_vm2 = vweird.f32 %v10705_v53  ;;  %v2651_v30 = vand.u32 2147483648, %v10705_v53  ;;  %v2649_v60 = vand.u32 2147483647, %v10705_v53  ;;  %v9147_v10 = vld [vmem:[%s9987_s23 + $0x234] sm:$0xf] }
 0x177   : > { %5393 = vmatpush.bf16.msra.mxu3 %v8113_v59  ;;  %5419 = vmatpush.bf16.msrb.mxu1 %v8473_v48  ;;  %v2493_v55 = vmul.f32 %v10697_v57, %v2492_v54  ;;  %v7215_v21 = vmul.f32 -1.442695, %v10721_v41  ;;  %v2078_v49 = vadd.f32 %v2077_v25, %v2063_v51  ;;  %v2091_v43 = vpop.f32.mrf.mxu1  ;;  %v8412_v59 = vld [vmem:[%s9987_s23 + $0x938] sm:$0xf]  ;;  %v2103_v51 = vpop.f32.mrf.mxu2  ;;  %v7337_v34 = vor.u32 %v9102_v16, %v7334_v24 }
 0x178   : > { %v2652_v29 = vor.u32 1.1754944e-38, %v2651_v30  ;;  %v8413_v48 = vor.u32 %v9374_v32, %v8412_v59  ;;  %vm10778_vm7 = vcmp.eq.f32.partialorder %v2649_v60, 8.507059e+37  ;;  %v2272_v56 = vperm.slane %v10497_v39, 6 }
 0x179   : > { %v2494_v1 = vadd.f32 %v10697_v57, %v2493_v55  ;;  %9592 = vpow2.f32 %v7215_v21  ;;  %v2092_v38 = vadd.f32 %v2091_v43, %v2078_v49  ;;  %v9112_v55 = vld [vmem:[%s9987_s23 + $0x11c] sm:$0xf]  ;;  %v7354_v21 = vld [vmem:[%s9987_s23 + $0x104] sm:$0xf0] }
 0x17a   : > { %5406 = vmatpush.bf16.msrb.mxu0 %v8293_v8  ;;  %v8052_v8 = vld [vmem:[%s9987_s23 + $0x668] sm:$0xf]  ;;  %v7357_v30 = vor.u32 %v9107_v9, %v7354_v21 }
 0x17b   : > { %5394 = vmatpush.bf16.msra.mxu3 %v8093_v44  ;;  %5420 = vmatpush.bf16.msrb.mxu1 %v8453_v6  ;;  %v8053_v46 = vor.u32 %v9284_v2, %v8052_v8  ;;  %v2498_v54 = vsel %vm10744_vm4, %v10697_v57, %v2494_v1  ;;  %v9319_v44 = vld [vmem:[%s9987_s23 + $0x790] sm:$0xf0]  ;;  %v7374_v6 = vld [vmem:[%s9987_s23 + $0x12c] sm:$0xf0]  ;;  %v8352_v8 = vld [vmem:[%s9987_s23 + $0x8c0] sm:$0xf] }
 0x17c   : > { %v9591_v7 = vpop.eup %9590  ;;  %v2503_v13 = vsel %vm10750_vm5, %v2502_v33, %v2498_v54  ;;  %v7377_v25 = vor.u32 %v9112_v55, %v7374_v6  ;;  %v9359_v2 = vld [vmem:[%s9987_s23 + $0x8d0] sm:$0xf0]  ;;  %v7314_v54 = vld [vmem:[%s9987_s23 + $0xb4] sm:$0xf0]  ;;  %v7294_v55 = vld [vmem:[%s9987_s23 + $0x8c] sm:$0xf0] }
 0x17d   : > { %v2641_v4 = vmul.f32 %v9591_v7, %v10705_v53  ;;  %vm2646_vm3 = vweird.f32 %v9591_v7  ;;  %v8192_v53 = vld [vmem:[%s9987_s23 + $0x780] sm:$0xf]  ;;  %v2734_v49 = vmul.f32 %v2503_v13, %v10587_v42  ;;  %v9152_v42 = vld [vmem:[%s9987_s23 + $0x25c] sm:$0xf] }
 0x17e   : > { %5407 = vmatpush.bf16.msrb.mxu0 %v8273_v35  ;;  %vm10759_vm6 = vmor %vm2645_vm2, %vm2646_vm3  ;;  %v2301_v35 = vmul.f32 %v2271_v17, %v2092_v38  ;;  %v8392_v17 = vld [vmem:[%s9987_s23 + $0x910] sm:$0xf]  ;;  %v8193_v19 = vor.u32 %v9319_v44, %v8192_v53  ;;  %v7514_v53 = vld [vmem:[%s9987_s23 + $0x244] sm:$0xf0] }
 0x17f   : > { %5395 = vmatpush.bf16.msra.mxu3 %v8073_v45  ;;  %v2642_v27 = vsub.f32 1.0, %v2641_v4  ;;  %5421 = vmatpush.bf16.msrb.mxu1 %v8433_v52  ;;  %v9593_v22 = vpop.eup %9592  ;;  %v9434_v52 = vld [vmem:[%s9987_s23 + $0xb28] sm:$0xf0]  ;;  %v7534_v38 = vld [vmem:[%s9987_s23 + $0x26c] sm:$0xf0]  ;;  %v2105_v33 = vpop.f32.mrf.mxu2  ;;  %v7517_v57 = vor.u32 %v9147_v10, %v7514_v53 }
 0x180   : > { %v10773_v14 = vadd.f32 %v2315_v31, %v2301_v35  ;;  %v8393_v31 = vor.u32 %v9369_v47, %v8392_v17  ;;  %v10786_v63 = vadd.f32 1.0, %v9593_v22  ;;  %v7537_v59 = vor.u32 %v9152_v42, %v7534_v38  ;;  %v8612_v17 = vld [vmem:[%s9987_s23 + $0xac8] sm:$0xf]  ;;  %v9082_v10 = vld [vmem:[%s9987_s23 + $0x2c] sm:$0xf] }
 0x181   : > { %v2643_v36 = vmul.f32 %v9591_v7, %v2642_v27  ;;  %v9429_v27 = vld [vmem:[%s9987_s23 + $0xb00] sm:$0xf0]  ;;  %v7254_v53 = vld [vmem:[%s9987_s23 + $0x3c] sm:$0xf0] }
 0x182   : > { %5408 = vmatpush.bf16.msrb.mxu0 %v8253_v37  ;;  %v2117_v37 = vpop.f32.mrf.mxu3  ;;  %v7225_v11 = vmul.f32 -1.442695, %v10773_v14  ;;  %9594 = vrcp.f32 %v10786_v63  ;;  %v2516_v47 = vand.u32 2147483648, %v10786_v63  ;;  %vm2510_vm8 = vweird.f32 %v10786_v63 }
 0x183   : > { %5396 = vmatpush.bf16.msra.mxu3 %v8053_v46  ;;  %v2644_v3 = vadd.f32 %v9591_v7, %v2643_v36  ;;  %5422 = vmatpush.bf16.msrb.mxu1 %v8413_v48  ;;  %v2118_v32 = vadd.f32 %v2117_v37, %v2103_v51  ;;  %v9097_v48 = vld [vmem:[%s9987_s23 + $0xa4] sm:$0xf]  ;;  %v9424_v51 = vld [vmem:[%s9987_s23 + $0xad8] sm:$0xf0]  ;;  %v2273_v37 = vperm.slane %v10497_v39, 7 }
 0x184   : > { %9596 = vpow2.f32 %v7225_v11  ;;  %v7317_v44 = vor.u32 %v9097_v48, %v7314_v54  ;;  %v9414_v48 = vld [vmem:[%s9987_s23 + $0xa88] sm:$0xf0] }
 0x185   : > { %v2648_v45 = vsel %vm10759_vm6, %v9591_v7, %v2644_v3  ;;  %v8373_v7 = vor.u32 %v9364_v61, %v8372_v50  ;;  %v2316_v3 = vperm.slane %v10500_v40, 6  ;;  %v9142_v50 = vld [vmem:[%s9987_s23 + $0x20c] sm:$0xf]  ;;  %v7494_v61 = vld [vmem:[%s9987_s23 + $0x21c] sm:$0xf0] }
 0x186   : > { %5409 = vmatpush.bf16.msrb.mxu0 %v8233_v23  ;;  %v2653_v15 = vsel %vm10778_vm7, %v2652_v29, %v2648_v45  ;;  %v8652_v23 = vld [vmem:[%s9987_s23 + $0xb18] sm:$0xf]  ;;  %v8633_v29 = vor.u32 %v9429_v27, %v8632_v28  ;;  %v2317_v45 = vperm.slane %v10500_v40, 7  ;;  %v7497_v21 = vor.u32 %v9142_v50, %v7494_v61  ;;  %v9404_v28 = vld [vmem:[%s9987_s23 + $0xa38] sm:$0xf0] }
 0x187   : > { %5397 = vmatpush.bf16.msra.mxu3 %v8033_v62  ;;  %v2744_v43 = vmul.f32 %v2653_v15, %v10660_v26  ;;  %5423 = vmatpush.bf16.msrb.mxu1 %v8393_v31  ;;  %v8653_v4 = vor.u32 %v9434_v52, %v8652_v23  ;;  %v8353_v26 = vor.u32 %v9359_v2, %v8352_v8  ;;  %v9092_v31 = vld [vmem:[%s9987_s23 + $0x7c] sm:$0xf]  ;;  %v2514_v15 = vand.u32 2147483647, %v10786_v63  ;;  %v9087_v8 = vld [vmem:[%s9987_s23 + $0x54] sm:$0xf] }
 0x188   : > { %v10811_v46 = vpop.eup %9594  ;;  %v7297_v9 = vor.u32 %v9092_v31, %v7294_v55  ;;  %v7274_v2 = vld [vmem:[%s9987_s23 + $0x64] sm:$0xf0]  ;;  %v7257_v31 = vor.u32 %v9082_v10, %v7254_v53  ;;  %v8552_v55 = vld [vmem:[%s9987_s23 + $0xa50] sm:$0xf]  ;;  %v9469_v10 = vld [vmem:[%s9987_s23 + $0xc40] sm:$0xf0] }
 0x189   : > { %v10802_v1 = vpack.c.bf16 %v2744_v43, %v2734_v49  ;;  %5432 = vmatpush.bf16.msrb.mxu2 %v8653_v4  ;;  %v8592_v49 = vld [vmem:[%s9987_s23 + $0xaa0] sm:$0xf]  ;;  %v9419_v43 = vld [vmem:[%s9987_s23 + $0xab0] sm:$0xf0]  ;;  %vm2511_vm9 = vweird.f32 %v10811_v46  ;;  %vm10877_vm13 = vcmp.eq.f32.partialorder %v2514_v15, 8.507059e+37 }
 0x18a   : > { %5410 = vmatpush.bf16.msrb.mxu0 %v8213_v12  ;;  %v9597_v60 = vpop.eup %9596  ;;  %v2506_v12 = vmul.f32 %v10811_v46, %v10786_v63  ;;  %v2119_v18 = vpop.f32.mrf.mxu3  ;;  %v8593_v23 = vor.u32 %v9419_v43, %v8592_v49  ;;  %vm10863_vm11 = vmor %vm2510_vm8, %vm2511_vm9  ;;  %v9127_v49 = vld [vmem:[%s9987_s23 + $0x194] sm:$0xf]  ;;  %v8772_v40 = vld [vmem:[%s9987_s23 + $0xc08] sm:$0xf] }
 0x18b   : > { %5384 = vmatmul.bf16.vlgmr.msra.gmra.mxu2 %v10802_v1  ;;  %5424 = vmatpush.bf16.msrb.mxu1 %v8373_v7  ;;  %v10817_v35 = vadd.f32 1.0, %v9597_v60  ;;  %v2120_v13 = vadd.f32 %v2119_v18, %v2105_v33  ;;  %v2517_v7 = vor.u32 1.1754944e-38, %v2516_v47  ;;  %v8572_v18 = vld [vmem:[%s9987_s23 + $0xa78] sm:$0xf] }
 0x18c   : > { %v2507_v36 = vsub.f32 1.0, %v2506_v12 }
 0x18d   : > { %9598 = vrcp.f32 %v10817_v35  ;;  %5433 = vmatpush.bf16.msrb.mxu2 %v8633_v29  ;;  %v2664_v4 = vand.u32 2147483647, %v10817_v35  ;;  %vm2660_vm10 = vweird.f32 %v10817_v35  ;;  %v2666_v27 = vand.u32 2147483648, %v10817_v35 }
 0x18e   : > { %5411 = vmatpush.bf16.msrb.mxu0 %v8193_v19  ;;  %v2131_v62 = vpop.f32.mrf.mxu0  ;;  %v8613_v19 = vor.u32 %v9424_v51, %v8612_v17  ;;  %v2508_v6 = vmul.f32 %v10811_v46, %v2507_v36  ;;  %v8573_v36 = vor.u32 %v9414_v48, %v8572_v18  ;;  %v7694_v17 = vld [vmem:[%s9987_s23 + $0x3ac] sm:$0xf0] }
 0x18f   : > { %5425 = vmatpush.bf16.msrb.mxu1 %v8353_v26  ;;  %v2132_v22 = vadd.f32 %v2131_v62, %v2118_v32  ;;  %v7277_v32 = vor.u32 %v9087_v8, %v7274_v2  ;;  %v9132_v62 = vld [vmem:[%s9987_s23 + $0x1bc] sm:$0xf]  ;;  %vm10898_vm15 = vcmp.eq.f32.partialorder %v2664_v4, 8.507059e+37 }
 0x190   : > { %v2509_v16 = vadd.f32 %v10811_v46, %v2508_v6  ;;  %v9409_v6 = vld [vmem:[%s9987_s23 + $0xa60] sm:$0xf0] }
 0x191   : > { %v2292_v11 = vmul.f32 %v2272_v56, %v2132_v22  ;;  %5434 = vmatpush.bf16.msrb.mxu2 %v8613_v19  ;;  %v2667_v19 = vor.u32 1.1754944e-38, %v2666_v27  ;;  %v8553_v50 = vor.u32 %v9409_v6, %v8552_v55  ;;  %v8812_v27 = vld [vmem:[%s9987_s23 + $0xc58] sm:$0xf]  ;;  %v9187_v6 = vld [vmem:[%s9987_s23 + $0x374] sm:$0xf] }
 0x192   : > { %5460 = vmatpush.bf16.msra.mxu0 %v7377_v25  ;;  %v2145_v25 = vpop.f32.mrf.mxu1 }
 0x193   : > { %5474 = vmatpush.bf16.msra.mxu1 %v7537_v59  ;;  %v10847_v52 = vpop.eup %9598  ;;  %v7474_v59 = vld [vmem:[%s9987_s23 + $0x1f4] sm:$0xf0] }
 0x194   : > { %v2656_v24 = vmul.f32 %v10847_v52, %v10817_v35  ;;  %vm2661_vm12 = vweird.f32 %v10847_v52 }
 0x195   : > { %5435 = vmatpush.bf16.msrb.mxu2 %v8593_v23  ;;  %vm10889_vm14 = vmor %vm2660_vm10, %vm2661_vm12 }
 0x196   : > { %5461 = vmatpush.bf16.msra.mxu0 %v7357_v30  ;;  %v10845_v30 = vadd.f32 %v2316_v3, %v2292_v11  ;;  %v2159_v26 = vpop.f32.mrf.mxu2  ;;  %v2133_v12 = vpop.f32.mrf.mxu0  ;;  %v2657_v29 = vsub.f32 1.0, %v2656_v24 }
 0x197   : > { %5475 = vmatpush.bf16.msra.mxu1 %v7517_v57  ;;  %v2160_v60 = vadd.f32 %v2159_v26, %v2145_v25  ;;  %v2134_v63 = vadd.f32 %v2133_v12, %v2120_v13  ;;  %v7454_v57 = vld [vmem:[%s9987_s23 + $0x1cc] sm:$0xf0] }
 0x198   : > { %v7216_v42 = vmul.f32 -1.442695, %v10845_v30  ;;  %v2173_v38 = vpop.f32.mrf.mxu3  ;;  %v2658_v47 = vmul.f32 %v10847_v52, %v2657_v29 }
 0x199   : > { %v2174_v54 = vadd.f32 %v2173_v38, %v2160_v60  ;;  %v2302_v22 = vmul.f32 %v2272_v56, %v2134_v63  ;;  %v7457_v56 = vor.u32 %v9132_v62, %v7454_v57  ;;  %5436 = vmatpush.bf16.msrb.mxu2 %v8573_v36  ;;  %v9474_v60 = vld [vmem:[%s9987_s23 + $0xc68] sm:$0xf0]  ;;  %v8512_v63 = vld [vmem:[%s9987_s23 + $0xa00] sm:$0xf]  ;;  %v8792_v36 = vld [vmem:[%s9987_s23 + $0xc30] sm:$0xf] }
 0x19a   : > { %5462 = vmatpush.bf16.msra.mxu0 %v7337_v34  ;;  %v9137_v34 = vld [vmem:[%s9987_s23 + $0x1e4] sm:$0xf]  ;;  %9600 = vpow2.f32 %v7216_v42  ;;  %v2659_v13 = vadd.f32 %v10847_v52, %v2658_v47  ;;  %v2147_v25 = vpop.f32.mrf.mxu1  ;;  %v8813_v18 = vor.u32 %v9474_v60, %v8812_v27  ;;  %v8793_v62 = vor.u32 %v9469_v10, %v8792_v36  ;;  %v7394_v57 = vld [vmem:[%s9987_s23 + $0x154] sm:$0xf0] }
 0x19b   : > { %5476 = vmatpush.bf16.msra.mxu1 %v7497_v21  ;;  %v7477_v33 = vor.u32 %v9137_v34, %v7474_v59  ;;  %v10904_v11 = vadd.f32 %v2316_v3, %v2302_v22  ;;  %v7234_v21 = vld [vmem:[%s9987_s23 + $0x14] sm:$0xf0]  ;;  %v8532_v59 = vld [vmem:[%s9987_s23 + $0xa28] sm:$0xf]  ;;  %v9117_v47 = vld [vmem:[%s9987_s23 + $0x144] sm:$0xf] }
 0x19c   : > { %v2663_v23 = vsel %vm10889_vm14, %v10847_v52, %v2659_v13  ;;  %5446 = vmatpush.bf16.msrb.mxu3 %v8813_v18 }
 0x19d   : > { %v7226_v3 = vmul.f32 -1.442695, %v10904_v11  ;;  %v2668_v2 = vsel %vm10898_vm15, %v2667_v19, %v2663_v23  ;;  %5437 = vmatpush.bf16.msrb.mxu2 %v8553_v50  ;;  %v7674_v50 = vld [vmem:[%s9987_s23 + $0x384] sm:$0xf0] }
 0x19e   : > { %5463 = vmatpush.bf16.msra.mxu0 %v7317_v44  ;;  %v2513_v44 = vsel %vm10863_vm11, %v10811_v46, %v2509_v16  ;;  %v2293_v46 = vmul.f32 %v2273_v37, %v2174_v54  ;;  %v2161_v4 = vpop.f32.mrf.mxu2  ;;  %v2745_v38 = vmul.f32 %v2668_v2, %v10773_v14  ;;  %v7414_v14 = vld [vmem:[%s9987_s23 + $0x17c] sm:$0xf0]  ;;  %v9399_v54 = vld [vmem:[%s9987_s23 + $0xa10] sm:$0xf0] }
 0x19f   : > { %5477 = vmatpush.bf16.msra.mxu1 %v7477_v33  ;;  %v2518_v61 = vsel %vm10877_vm13, %v2517_v7, %v2513_v44  ;;  %v7434_v7 = vld [vmem:[%s9987_s23 + $0x1a4] sm:$0xf0]  ;;  %v2162_v42 = vadd.f32 %v2161_v4, %v2147_v25  ;;  %9602 = vpow2.f32 %v7226_v3  ;;  %v9122_v33 = vld [vmem:[%s9987_s23 + $0x16c] sm:$0xf]  ;;  %v8513_v53 = vor.u32 %v9399_v54, %v8512_v63  ;;  %v9192_v44 = vld [vmem:[%s9987_s23 + $0x39c] sm:$0xf] }
 0x1a0   : > { %v10910_v15 = vadd.f32 %v2317_v45, %v2293_v46  ;;  %v9601_v43 = vpop.eup %9600  ;;  %v2175_v26 = vpop.f32.mrf.mxu3  ;;  %v2735_v52 = vmul.f32 %v2518_v61, %v10721_v41  ;;  %v7437_v34 = vor.u32 %v9127_v49, %v7434_v7  ;;  %v8533_v41 = vor.u32 %v9404_v28, %v8532_v59  ;;  %5447 = vmatpush.bf16.msrb.mxu3 %v8793_v62  ;;  %v10973_v49 = vld [vmem:[%s12023_s2 + $0x8] sm:$0x3]  ;;  %v9459_v3 = vld [vmem:[%s9987_s23 + $0xbf0] sm:$0xf0]  ;;  %v9182_v4 = vld [vmem:[%s9987_s23 + $0x34c] sm:$0xf] }
 0x1a1   : > { %v10922_v16 = vadd.f32 1.0, %v9601_v43  ;;  %v7417_v29 = vor.u32 %v9122_v33, %v7414_v14  ;;  %v7397_v46 = vor.u32 %v9117_v47, %v7394_v57  ;;  %v7677_v61 = vor.u32 %v9187_v6, %v7674_v50  ;;  %v8752_v43 = vld [vmem:[%s9987_s23 + $0xbe0] sm:$0xf]  ;;  %v10991_v59 = vld [vmem:[#allocation4 + $0x8] sm:$0x3] }
 0x1a2   : > { %5464 = vmatpush.bf16.msra.mxu0 %v7297_v9  ;;  %v9077_v9 = vld [vmem:[%s9987_s23 + $0x4] sm:$0xf]  ;;  %v7217_v24 = vmul.f32 -1.442695, %v10910_v15  ;;  %v10932_v12 = vpack.c.bf16 %v2745_v38, %v2735_v52  ;;  %5438 = vmatpush.bf16.msrb.mxu2 %v8533_v41  ;;  %v8732_v33 = vld [vmem:[%s9987_s23 + $0xbb8] sm:$0xf] }
 0x1a3   : > { %v7237_v8 = vor.u32 %v9077_v9, %v7234_v21  ;;  %5478 = vmatpush.bf16.msra.mxu1 %v7457_v56  ;;  %9604 = vrcp.f32 %v10922_v16  ;;  %vm2525_vm0 = vweird.f32 %v10922_v16  ;;  %v2529_v21 = vand.u32 2147483647, %v10922_v16  ;;  %v9454_v14 = vld [vmem:[%s9987_s23 + $0xbc8] sm:$0xf0]  ;;  %v7634_v54 = vld [vmem:[%s9987_s23 + $0x334] sm:$0xf0] }
 0x1a4   : > { %9606 = vpow2.f32 %v7217_v24  ;;  %5398 = vmatmul.bf16.vlgmr.msra.gmra.mxu3 %v10932_v12  ;;  %v2531_v23 = vand.u32 2147483648, %v10922_v16  ;;  %v11017_v62 = vld [vmem:[%s9987_s23 + $0x62c] sm:$0xf0]  ;;  %v9172_v50 = vld [vmem:[%s9987_s23 + $0x2fc] sm:$0xf] }
 0x1a5   : > { %v9603_v22 = vpop.eup %9602  ;;  %vm10993_vm3 = vcmp.eq.f32.partialorder %v2529_v21, 8.507059e+37 }
 0x1a6   : > { %5465 = vmatpush.bf16.msra.mxu0 %v7277_v32  ;;  %v2176_v32 = vadd.f32 %v2175_v26, %v2162_v42  ;;  %v10953_v19 = vadd.f32 1.0, %v9603_v22  ;;  %5439 = vmatpush.bf16.msrb.mxu2 %v8513_v53  ;;  %v8753_v42 = vor.u32 %v9459_v3, %v8752_v43  ;;  %v7654_v26 = vld [vmem:[%s9987_s23 + $0x35c] sm:$0xf0]  ;;  %v11014_v53 = vld [vmem:[%s9987_s23 + $0x61c] sm:$0xf] }
 0x1a7   : > { %5479 = vmatpush.bf16.msra.mxu1 %v7437_v34  ;;  %v2274_v34 = vperm.slane %v10973_v49, 0 }
 0x1a8   : > { %v2303_v48 = vmul.f32 %v2273_v37, %v2176_v32  ;;  %v7697_v37 = vor.u32 %v9192_v44, %v7694_v17  ;;  %9608 = vrcp.f32 %v10953_v19  ;;  %v2679_v38 = vand.u32 2147483647, %v10953_v19 }
 0x1a9   : > { %v10951_v51 = vpop.eup %9604  ;;  %v2681_v32 = vand.u32 2147483648, %v10953_v19  ;;  %vm2675_vm4 = vweird.f32 %v10953_v19  ;;  %v8733_v44 = vor.u32 %v9454_v14, %v8732_v33 }
 0x1aa   : > { %5466 = vmatpush.bf16.msra.mxu0 %v7257_v31  ;;  %v10948_v39 = vadd.f32 %v2317_v45, %v2303_v48  ;;  %v9607_v31 = vpop.eup %9606  ;;  %v2521_v56 = vmul.f32 %v10951_v51, %v10922_v16  ;;  %v9464_v45 = vld [vmem:[%s9987_s23 + $0xc18] sm:$0xf0]  ;;  %5488 = vmatpush.bf16.msra.mxu2 %v7697_v37  ;;  %vm2526_vm1 = vweird.f32 %v10951_v51  ;;  %v7657_v16 = vor.u32 %v9182_v4, %v7654_v26  ;;  %v9177_v48 = vld [vmem:[%s9987_s23 + $0x324] sm:$0xf]  ;;  %v8692_v26 = vld [vmem:[%s9987_s23 + $0xb68] sm:$0xf] }
 0x1ab   : > { %5480 = vmatpush.bf16.msra.mxu1 %v7417_v29  ;;  %v10962_v35 = vadd.f32 1.0, %v9607_v31  ;;  %v8773_v25 = vor.u32 %v9464_v45, %v8772_v40  ;;  %vm10982_vm2 = vmor %vm2525_vm0, %vm2526_vm1  ;;  %v2532_v29 = vor.u32 1.1754944e-38, %v2531_v23  ;;  %v7637_v17 = vor.u32 %v9177_v48, %v7634_v54  ;;  %v7614_v23 = vld [vmem:[%s9987_s23 + $0x30c] sm:$0xf0] }
 0x1ac   : > { %v7227_v55 = vmul.f32 -1.442695, %v10948_v39  ;;  %v2522_v13 = vsub.f32 1.0, %v2521_v56  ;;  %v2318_v31 = vperm.slane %v10991_v59, 0  ;;  %v8712_v56 = vld [vmem:[%s9987_s23 + $0xb90] sm:$0xf]  ;;  %v7617_v7 = vor.u32 %v9172_v50, %v7614_v23 }
 0x1ad   : > { %5448 = vmatpush.bf16.msrb.mxu3 %v8773_v25  ;;  %v2544_v22 = vand.u32 2147483647, %v10962_v35  ;;  %v2546_v6 = vand.u32 2147483648, %v10962_v35  ;;  %v9449_v25 = vld [vmem:[%s9987_s23 + $0xba0] sm:$0xf0]  ;;  %vm11042_vm7 = vcmp.eq.f32.partialorder %v2679_v38, 8.507059e+37  ;;  %vm2540_vm8 = vweird.f32 %v10962_v35 }
 0x1ae   : > { %5467 = vmatpush.bf16.msra.mxu0 %v7237_v8  ;;  %9610 = vpow2.f32 %v7227_v55  ;;  %v2523_v9 = vmul.f32 %v10951_v51, %v2522_v13  ;;  %5489 = vmatpush.bf16.msra.mxu2 %v7677_v61  ;;  %v2187_v2 = vpop.f32.mrf.mxu0  ;;  %v10987_v52 = vpop.eup %9608  ;;  %v8017_v13 = vor.u32 %v11014_v53, %v11017_v62  ;;  %v9444_v38 = vld [vmem:[%s9987_s23 + $0xb78] sm:$0xf0]  ;;  %v8174_v4 = vld [vmem:[%s9987_s23 + $0x76c] sm:$0xf0]  ;;  %v9247_v50 = vld [vmem:[%s9987_s23 + $0x554] sm:$0xf] }
 0x1af   : > { %5481 = vmatpush.bf16.msra.mxu1 %v7397_v46  ;;  %9612 = vrcp.f32 %v10962_v35  ;;  %v2201_v24 = vpop.f32.mrf.mxu1  ;;  %v2671_v60 = vmul.f32 %v10987_v52, %v10953_v19  ;;  %vm2676_vm5 = vweird.f32 %v10987_v52  ;;  %vm11051_vm9 = vcmp.eq.f32.partialorder %v2544_v22, 8.507059e+37  ;;  %v9262_v19 = vld [vmem:[%s9987_s23 + $0x5cc] sm:$0xf] }
 0x1b0   : > { %v2524_v8 = vadd.f32 %v10951_v51, %v2523_v9  ;;  %v2202_v41 = vadd.f32 %v2201_v24, %v2187_v2  ;;  %vm11032_vm6 = vmor %vm2675_vm4, %vm2676_vm5  ;;  %v2319_v23 = vperm.slane %v10991_v59, 1  ;;  %v9292_v59 = vld [vmem:[%s9987_s23 + $0x6bc] sm:$0xf] }
 0x1b1   : > { %5449 = vmatpush.bf16.msrb.mxu3 %v8753_v42  ;;  %v2672_v10 = vsub.f32 1.0, %v2671_v60 }
 0x1b2   : > { %v2528_v18 = vsel %vm10982_vm2, %v10951_v51, %v2524_v8  ;;  %5490 = vmatpush.bf16.msra.mxu2 %v7657_v16  ;;  %v2682_v51 = vor.u32 1.1754944e-38, %v2681_v32  ;;  %v8713_v8 = vor.u32 %v9449_v25, %v8712_v56  ;;  %v9167_v16 = vld [vmem:[%s9987_s23 + $0x2d4] sm:$0xf]  ;;  %v7594_v32 = vld [vmem:[%s9987_s23 + $0x2e4] sm:$0xf0] }
 0x1b3   : > { %v2673_v57 = vmul.f32 %v10987_v52, %v2672_v10  ;;  %v2533_v55 = vsel %vm10993_vm3, %v2532_v29, %v2528_v18  ;;  %v9267_v29 = vld [vmem:[%s9987_s23 + $0x5f4] sm:$0xf]  ;;  %v7854_v25 = vld [vmem:[%s9987_s23 + $0x4ec] sm:$0xf0] }
 0x1b4   : > { %v9611_v28 = vpop.eup %9610  ;;  %v2736_v2 = vmul.f32 %v2533_v55, %v10845_v30  ;;  %v2547_v30 = vor.u32 1.1754944e-38, %v2546_v6  ;;  %v9232_v6 = vld [vmem:[%s9987_s23 + $0x4dc] sm:$0xf] }
 0x1b5   : > { %v11006_v63 = vadd.f32 1.0, %v9611_v28  ;;  %v11010_v36 = vpop.eup %9612  ;;  %5450 = vmatpush.bf16.msrb.mxu3 %v8733_v44  ;;  %v2674_v61 = vadd.f32 %v10987_v52, %v2673_v57  ;;  %v7994_v44 = vld [vmem:[%s9987_s23 + $0x604] sm:$0xf0]  ;;  %v9439_v57 = vld [vmem:[%s9987_s23 + $0xb50] sm:$0xf0] }
 0x1b6   : > { %v2536_v47 = vmul.f32 %v11010_v36, %v10962_v35  ;;  %v2215_v37 = vpop.f32.mrf.mxu2  ;;  %5491 = vmatpush.bf16.msra.mxu2 %v7637_v17  ;;  %v2189_v21 = vpop.f32.mrf.mxu0  ;;  %vm2541_vm10 = vweird.f32 %v11010_v36  ;;  %v7597_v17 = vor.u32 %v9167_v16, %v7594_v32  ;;  %v7997_v55 = vor.u32 %v9267_v29, %v7994_v44  ;;  %v7954_v32 = vld [vmem:[%s9987_s23 + $0x5b4] sm:$0xf0] }
 0x1b7   : > { %9614 = vrcp.f32 %v11006_v63  ;;  %v2216_v46 = vadd.f32 %v2215_v37, %v2202_v41  ;;  %v2203_v43 = vpop.f32.mrf.mxu1  ;;  %v2678_v24 = vsel %vm11032_vm6, %v10987_v52, %v2674_v61  ;;  %v8693_v52 = vor.u32 %v9444_v38, %v8692_v26  ;;  %vm11082_vm11 = vmor %vm2540_vm8, %vm2541_vm10  ;;  %v8672_v37 = vld [vmem:[%s9987_s23 + $0xb40] sm:$0xf]  ;;  %v9312_v26 = vld [vmem:[%s9987_s23 + $0x75c] sm:$0xf] }
 0x1b8   : > { %v2537_v45 = vsub.f32 1.0, %v2536_v47  ;;  %v2683_v27 = vsel %vm11042_vm7, %v2682_v51, %v2678_v24  ;;  %v2204_v60 = vadd.f32 %v2203_v43, %v2189_v21  ;;  %vm2690_vm12 = vweird.f32 %v11006_v63  ;;  %v9162_v51 = vld [vmem:[%s9987_s23 + $0x2ac] sm:$0xf] }
 0x1b9   : > { %v2294_v9 = vmul.f32 %v2274_v34, %v2216_v46  ;;  %5451 = vmatpush.bf16.msrb.mxu3 %v8713_v8  ;;  %v2746_v41 = vmul.f32 %v2683_v27, %v10904_v11  ;;  %v2694_v11 = vand.u32 2147483647, %v11006_v63  ;;  %v2696_v54 = vand.u32 2147483648, %v11006_v63  ;;  %v7554_v8 = vld [vmem:[%s9987_s23 + $0x294] sm:$0xf0] }
 0x1ba   : > { %v2538_v3 = vmul.f32 %v11010_v36, %v2537_v45  ;;  %5492 = vmatpush.bf16.msra.mxu2 %v7617_v7  ;;  %v8673_v40 = vor.u32 %v9439_v57, %v8672_v37  ;;  %v7574_v45 = vld [vmem:[%s9987_s23 + $0x2bc] sm:$0xf0]  ;;  %v7834_v7 = vld [vmem:[%s9987_s23 + $0x4c4] sm:$0xf0]  ;;  %v9217_v37 = vld [vmem:[%s9987_s23 + $0x464] sm:$0xf] }
 0x1bb   : > { %v11062_v42 = vadd.f32 %v2318_v31, %v2294_v9  ;;  %v11090_v47 = vpack.c.bf16 %v2746_v41, %v2736_v2  ;;  %v7974_v9 = vld [vmem:[%s9987_s23 + $0x5dc] sm:$0xf0]  ;;  %v7577_v21 = vor.u32 %v9162_v51, %v7574_v45  ;;  %vm11120_vm15 = vcmp.eq.f32.partialorder %v2694_v11, 8.507059e+37  ;;  %v2229_v11 = vpop.f32.mrf.mxu3  ;;  %v7794_v57 = vld [vmem:[%s9987_s23 + $0x474] sm:$0xf0] }
 0x1bc   : > { %v2539_v33 = vadd.f32 %v11010_v36, %v2538_v3  ;;  %v9157_v3 = vld [vmem:[%s9987_s23 + $0x284] sm:$0xf]  ;;  %v8177_v41 = vor.u32 %v9312_v26, %v8174_v4 }
 0x1bd   : > { %v11067_v28 = vpop.eup %9614  ;;  %v7218_v18 = vmul.f32 -1.442695, %v11062_v42  ;;  %5452 = vmatpush.bf16.msrb.mxu3 %v8693_v52  ;;  %5412 = vmatmul.bf16.vlgmr.msrb.gmra.mxu0 %v11090_v47  ;;  %v7557_v62 = vor.u32 %v9157_v3, %v7554_v8  ;;  %v9257_v52 = vld [vmem:[%s9987_s23 + $0x5a4] sm:$0xf]  ;;  %v9212_v3 = vld [vmem:[%s9987_s23 + $0x43c] sm:$0xf] }
 0x1be   : > { %v2686_v14 = vmul.f32 %v11067_v28, %v11006_v63  ;;  %v2217_v10 = vpop.f32.mrf.mxu2  ;;  %vm2691_vm13 = vweird.f32 %v11067_v28  ;;  %5493 = vmatpush.bf16.msra.mxu2 %v7597_v17  ;;  %v2543_v46 = vsel %vm11082_vm11, %v11010_v36, %v2539_v33  ;;  %v2697_v36 = vor.u32 1.1754944e-38, %v2696_v54  ;;  %5516 = vmatpush.bf16.msrb.mxu0 %v8017_v13  ;;  %v9227_v13 = vld [vmem:[%s9987_s23 + $0x4b4] sm:$0xf]  ;;  %v9252_v54 = vld [vmem:[%s9987_s23 + $0x57c] sm:$0xf] }
 0x1bf   : > { %9616 = vpow2.f32 %v7218_v18  ;;  %v2218_v22 = vadd.f32 %v2217_v10, %v2204_v60  ;;  %vm11108_vm14 = vmor %vm2690_vm12, %vm2691_vm13  ;;  %v7857_v63 = vor.u32 %v9232_v6, %v7854_v25  ;;  %v7837_v38 = vor.u32 %v9227_v13, %v7834_v7  ;;  %v9307_v33 = vld [vmem:[%s9987_s23 + $0x734] sm:$0xf]  ;;  %v8154_v18 = vld [vmem:[%s9987_s23 + $0x744] sm:$0xf0] }
 0x1c0   : > { %v2687_v35 = vsub.f32 1.0, %v2686_v14  ;;  %v7957_v29 = vor.u32 %v9257_v52, %v7954_v32  ;;  %v7934_v10 = vld [vmem:[%s9987_s23 + $0x58c] sm:$0xf0]  ;;  %v8157_v44 = vor.u32 %v9307_v33, %v8154_v18  ;;  %v9302_v17 = vld [vmem:[%s9987_s23 + $0x70c] sm:$0xf]  ;;  %v2275_v25 = vperm.slane %v10973_v49, 1 }
 0x1c1   : > { %v2304_v61 = vmul.f32 %v2274_v34, %v2218_v22  ;;  %v2548_v34 = vsel %vm11051_vm9, %v2547_v30, %v2543_v46  ;;  %5453 = vmatpush.bf16.msrb.mxu3 %v8673_v40  ;;  %v7977_v30 = vor.u32 %v9262_v19, %v7974_v9  ;;  %v8134_v22 = vld [vmem:[%s9987_s23 + $0x71c] sm:$0xf0]  ;;  %v7797_v40 = vor.u32 %v9217_v37, %v7794_v57  ;;  %v7774_v49 = vld [vmem:[%s9987_s23 + $0x44c] sm:$0xf0]  ;;  %v9237_v33 = vld [vmem:[%s9987_s23 + $0x504] sm:$0xf] }
 0x1c2   : > { %v2688_v56 = vmul.f32 %v11067_v28, %v2687_v35  ;;  %5494 = vmatpush.bf16.msra.mxu2 %v7577_v21  ;;  %5517 = vmatpush.bf16.msrb.mxu0 %v7997_v55  ;;  %v2737_v60 = vmul.f32 %v2548_v34, %v10910_v15  ;;  %v9222_v15 = vld [vmem:[%s9987_s23 + $0x48c] sm:$0xf]  ;;  %v7937_v55 = vor.u32 %v9252_v54, %v7934_v10  ;;  %v9297_v21 = vld [vmem:[%s9987_s23 + $0x6e4] sm:$0xf]  ;;  %v7894_v13 = vld [vmem:[%s9987_s23 + $0x53c] sm:$0xf0] }
 0x1c3   : > { %v11130_v53 = vadd.f32 %v2318_v31, %v2304_v61  ;;  %v8137_v9 = vor.u32 %v9302_v17, %v8134_v22  ;;  %v7777_v7 = vor.u32 %v9212_v3, %v7774_v49  ;;  %v2231_v26 = vpop.f32.mrf.mxu3  ;;  %v7874_v18 = vld [vmem:[%s9987_s23 + $0x514] sm:$0xf0]  ;;  %v8654_v54 = vld [vmem:[%s9987_s23 + $0xb2c] sm:$0xf0]  ;;  %v8074_v17 = vld [vmem:[%s9987_s23 + $0x6a4] sm:$0xf0] }
 0x1c4   : > { %v2689_v43 = vadd.f32 %v11067_v28, %v2688_v56  ;;  %v7734_v22 = vld [vmem:[%s9987_s23 + $0x3fc] sm:$0xf0]  ;;  %v9197_v49 = vld [vmem:[%s9987_s23 + $0x3c4] sm:$0xf] }
 0x1c5   : > { %v9617_v2 = vpop.eup %9616  ;;  %5502 = vmatpush.bf16.msra.mxu3 %v7857_v63  ;;  %v7228_v27 = vmul.f32 -1.442695, %v11130_v53  ;;  %v8114_v63 = vld [vmem:[%s9987_s23 + $0x6f4] sm:$0xf0] }
 0x1c6   : > { %v2693_v24 = vsel %vm11108_vm14, %v11067_v28, %v2689_v43  ;;  %v11141_v16 = vadd.f32 1.0, %v9617_v2  ;;  %5495 = vmatpush.bf16.msra.mxu2 %v7557_v62  ;;  %5518 = vmatpush.bf16.msrb.mxu0 %v7977_v30  ;;  %v9242_v62 = vld [vmem:[%s9987_s23 + $0x52c] sm:$0xf]  ;;  %v8117_v2 = vor.u32 %v9297_v21, %v8114_v63  ;;  %v7754_v30 = vld [vmem:[%s9987_s23 + $0x424] sm:$0xf0] }
 0x1c7   : > { %v2698_v31 = vsel %vm11120_vm15, %v2697_v36, %v2693_v24  ;;  %v7914_v36 = vld [vmem:[%s9987_s23 + $0x564] sm:$0xf0]  ;;  %v9427_v21 = vld [vmem:[%s9987_s23 + $0xaf4] sm:$0xf] }
 0x1c8   : > { %v2747_v28 = vmul.f32 %v2698_v31, %v10948_v39  ;;  %9618 = vrcp.f32 %v11141_v16  ;;  %v7814_v39 = vld [vmem:[%s9987_s23 + $0x49c] sm:$0xf0]  ;;  %v7917_v8 = vor.u32 %v9247_v50, %v7914_v36  ;;  %v8094_v31 = vld [vmem:[%s9987_s23 + $0x6cc] sm:$0xf0]  ;;  %vm2555_vm0 = vweird.f32 %v11141_v16  ;;  %v8634_v63 = vld [vmem:[%s9987_s23 + $0xb04] sm:$0xf0] }
 0x1c9   : > { %9620 = vpow2.f32 %v7228_v27  ;;  %5503 = vmatpush.bf16.msra.mxu3 %v7837_v38  ;;  %v7817_v48 = vor.u32 %v9222_v15, %v7814_v39  ;;  %v9207_v27 = vld [vmem:[%s9987_s23 + $0x414] sm:$0xf]  ;;  %v2561_v37 = vand.u32 2147483648, %v11141_v16  ;;  %v8054_v50 = vld [vmem:[%s9987_s23 + $0x67c] sm:$0xf0] }
 0x1ca   : > { %v11150_v14 = vpack.c.bf16 %v2747_v28, %v2737_v60  ;;  %5519 = vmatpush.bf16.msrb.mxu0 %v7957_v29  ;;  %v7897_v28 = vor.u32 %v9242_v62, %v7894_v13  ;;  %v7757_v52 = vor.u32 %v9207_v27, %v7754_v30  ;;  %v8097_v29 = vor.u32 %v9292_v59, %v8094_v31  ;;  %v9352_v59 = vld [vmem:[%s9987_s23 + $0x89c] sm:$0xf]  ;;  %v9422_v27 = vld [vmem:[%s9987_s23 + $0xacc] sm:$0xf]  ;;  %v8614_v30 = vld [vmem:[%s9987_s23 + $0xadc] sm:$0xf0] }
 0x1cc   : > { %5426 = vmatmul.bf16.vlgmr.msrb.gmra.mxu1 %v11150_v14 }
 0x1cd   : > { %5530 = vmatpush.bf16.msrb.mxu1 %v8177_v41  ;;  %5504 = vmatpush.bf16.msra.mxu3 %v7817_v48  ;;  %v9287_v48 = vld [vmem:[%s9987_s23 + $0x694] sm:$0xf] }
 0x1ce   : > { %v2243_v35 = vpop.f32.mrf.mxu0  ;;  %v11162_v51 = vpop.eup %9618  ;;  %5468 = vmatmul.bf16.vlgmr.msra.gmra.mxu0 %v10429_v5 }
 0x1cf   : > { %v2244_v46 = vadd.f32 %v2243_v35, %v2229_v11  ;;  %v2257_v56 = vpop.f32.mrf.mxu1  ;;  %v9621_v45 = vpop.eup %9620  ;;  %v2551_v6 = vmul.f32 %v11162_v51, %v11141_v16  ;;  %5520 = vmatpush.bf16.msrb.mxu0 %v7937_v55  ;;  %v9432_v11 = vld [vmem:[%s9987_s23 + $0xb1c] sm:$0xf]  ;;  %vm2556_vm1 = vweird.f32 %v11162_v51  ;;  %v9202_v35 = vld [vmem:[%s9987_s23 + $0x3ec] sm:$0xf] }
 0x1d0   : > { %v11169_v61 = vadd.f32 1.0, %v9621_v45  ;;  %v7737_v55 = vor.u32 %v9202_v35, %v7734_v22  ;;  %vm11212_vm2 = vmor %vm2555_vm0, %vm2556_vm1  ;;  %v9467_v22 = vld [vmem:[%s9987_s23 + $0xc34] sm:$0xf] }
 0x1d1   : > { %v2258_v19 = vadd.f32 %v2257_v56, %v2244_v46  ;;  %5531 = vmatpush.bf16.msrb.mxu1 %v8157_v44  ;;  %v2552_v43 = vsub.f32 1.0, %v2551_v6  ;;  %5505 = vmatpush.bf16.msra.mxu3 %v7797_v40  ;;  %v7877_v46 = vor.u32 %v9237_v33, %v7874_v18  ;;  %v9282_v56 = vld [vmem:[%s9987_s23 + $0x66c] sm:$0xf]  ;;  %v2559_v40 = vand.u32 2147483647, %v11141_v16 }
 0x1d2   : > { %9622 = vrcp.f32 %v11169_v61  ;;  %v8657_v6 = vor.u32 %v9432_v11, %v8654_v54  ;;  %v2711_v36 = vand.u32 2147483648, %v11169_v61  ;;  %v2709_v16 = vand.u32 2147483647, %v11169_v61  ;;  %v8594_v11 = vld [vmem:[%s9987_s23 + $0xab4] sm:$0xf0] }
 0x1d3   : > { %v2295_v34 = vmul.f32 %v2275_v25, %v2258_v19  ;;  %v2553_v24 = vmul.f32 %v11162_v51, %v2552_v43  ;;  %5521 = vmatpush.bf16.msrb.mxu0 %v7917_v8  ;;  %v2562_v8 = vor.u32 1.1754944e-38, %v2561_v37  ;;  %v8057_v62 = vor.u32 %v9282_v56, %v8054_v50  ;;  %v9412_v56 = vld [vmem:[%s9987_s23 + $0xa7c] sm:$0xf]  ;;  %v8294_v50 = vld [vmem:[%s9987_s23 + $0x85c] sm:$0xf0] }
 0x1d4   : > { %vm2560_vm4 = vcmp.eq.f32.partialorder %v2559_v40, 8.507059e+37  ;;  %vm2705_vm5 = vweird.f32 %v11169_v61  ;;  %vm2710_vm7 = vcmp.eq.f32.partialorder %v2709_v16, 8.507059e+37 }
 0x1d5   : > { %5532 = vmatpush.bf16.msrb.mxu1 %v8137_v9  ;;  %v11182_v4 = vadd.f32 %v2319_v23, %v2295_v34  ;;  %5506 = vmatpush.bf16.msra.mxu3 %v7777_v7  ;;  %v2554_v10 = vadd.f32 %v11162_v51, %v2553_v24  ;;  %v8077_v9 = vor.u32 %v9287_v48, %v8074_v17  ;;  %v8334_v24 = vld [vmem:[%s9987_s23 + $0x8ac] sm:$0xf0]  ;;  %v9417_v48 = vld [vmem:[%s9987_s23 + $0xaa4] sm:$0xf]  ;;  %v8314_v17 = vld [vmem:[%s9987_s23 + $0x884] sm:$0xf0] }
 0x1d6   : > { %v2245_v38 = vpop.f32.mrf.mxu0  ;;  %v8597_v37 = vor.u32 %v9417_v48, %v8594_v11 }
 0x1d7   : > { %v2246_v60 = vadd.f32 %v2245_v38, %v2231_v26  ;;  %v7219_v32 = vmul.f32 -1.442695, %v11182_v4  ;;  %v2259_v41 = vpop.f32.mrf.mxu1  ;;  %5522 = vmatpush.bf16.msrb.mxu0 %v7897_v28  ;;  %v2558_v43 = vsel %vm11212_vm2, %v11162_v51, %v2554_v10  ;;  %v2712_v38 = vor.u32 1.1754944e-38, %v2711_v36  ;;  %v8034_v28 = vld [vmem:[%s9987_s23 + $0x654] sm:$0xf0] }
 0x1d8   : > { %v11190_v15 = vpop.eup %9622  ;;  %v2563_v26 = vsel %vm2560_vm4, %v2562_v8, %v2558_v43  ;;  %v8774_v36 = vld [vmem:[%s9987_s23 + $0xc1c] sm:$0xf0]  ;;  %v9407_v43 = vld [vmem:[%s9987_s23 + $0xa54] sm:$0xf]  ;;  %v8274_v8 = vld [vmem:[%s9987_s23 + $0x834] sm:$0xf0] }
 0x1d9   : > { %v2260_v39 = vadd.f32 %v2259_v41, %v2246_v60  ;;  %5533 = vmatpush.bf16.msrb.mxu1 %v8117_v2  ;;  %v2701_v44 = vmul.f32 %v11190_v15, %v11169_v61  ;;  %9624 = vpow2.f32 %v7219_v32  ;;  %5507 = vmatpush.bf16.msra.mxu3 %v7757_v52  ;;  %vm2706_vm3 = vweird.f32 %v11190_v15  ;;  %v9277_v60 = vld [vmem:[%s9987_s23 + $0x644] sm:$0xf]  ;;  %v9472_v32 = vld [vmem:[%s9987_s23 + $0xc5c] sm:$0xf]  ;;  %v8814_v41 = vld [vmem:[%s9987_s23 + $0xc6c] sm:$0xf0] }
 0x1da   : > { %v8637_v2 = vor.u32 %v9427_v21, %v8634_v63  ;;  %vm2707_vm6 = vmor %vm2705_vm5, %vm2706_vm3  ;;  %v2738_v33 = vmul.f32 %v2563_v26, %v11062_v42  ;;  %v8817_v10 = vor.u32 %v9472_v32, %v8814_v41  ;;  %v8794_v42 = vld [vmem:[%s9987_s23 + $0xc44] sm:$0xf0]  ;;  %v8254_v26 = vld [vmem:[%s9987_s23 + $0x80c] sm:$0xf0] }
 0x1db   : > { %v2305_v57 = vmul.f32 %v2275_v25, %v2260_v39  ;;  %v2702_v45 = vsub.f32 1.0, %v2701_v44  ;;  %5523 = vmatpush.bf16.msrb.mxu0 %v7877_v46  ;;  %v8337_v39 = vor.u32 %v9352_v59, %v8334_v24  ;;  %v9347_v44 = vld [vmem:[%s9987_s23 + $0x874] sm:$0xf]  ;;  %v9462_v25 = vld [vmem:[%s9987_s23 + $0xc0c] sm:$0xf] }
 0x1dc   : > { %5482 = vmatmul.bf16.vlgmr.msra.gmra.mxu1 %v10431_v20  ;;  %v8317_v46 = vor.u32 %v9347_v44, %v8314_v17  ;;  %v8734_v32 = vld [vmem:[%s9987_s23 + $0xbcc] sm:$0xf0]  ;;  %v8514_v44 = vld [vmem:[%s9987_s23 + $0xa14] sm:$0xf0] }
 0x1dd   : > { %v11217_v19 = vadd.f32 %v2319_v23, %v2305_v57  ;;  %5534 = vmatpush.bf16.msrb.mxu1 %v8097_v29  ;;  %v2703_v3 = vmul.f32 %v11190_v15, %v2702_v45  ;;  %5508 = vmatpush.bf16.msra.mxu3 %v7737_v55  ;;  %v7714_v23 = vld [vmem:[%s9987_s23 + $0x3d4] sm:$0xf0]  ;;  %v8037_v29 = vor.u32 %v9277_v60, %v8034_v28  ;;  %v8574_v55 = vld [vmem:[%s9987_s23 + $0xa8c] sm:$0xf0]  ;;  %v9452_v60 = vld [vmem:[%s9987_s23 + $0xbbc] sm:$0xf] }
 0x1de   : > { %v7717_v13 = vor.u32 %v9197_v49, %v7714_v23  ;;  %5524 = vmatmul.bf16.vlgmr.msrb.gmra.mxu0 %v10802_v1  ;;  %v8797_v45 = vor.u32 %v9467_v22, %v8794_v42  ;;  %v8577_v21 = vor.u32 %v9412_v56, %v8574_v55  ;;  %v8777_v49 = vor.u32 %v9462_v25, %v8774_v36  ;;  %v9337_v23 = vld [vmem:[%s9987_s23 + $0x824] sm:$0xf]  ;;  %v7700_v22 = vld [vmem:[%s9987_s23 + $0x3a0] sm:$0xf]  ;;  %v9195_v42 = vld [vmem:[%s9987_s23 + $0x3b0] sm:$0xf0] }
 0x1df   : > { %v7229_v34 = vmul.f32 -1.442695, %v11217_v19  ;;  %v9625_v51 = vpop.eup %9624  ;;  %v2704_v7 = vadd.f32 %v11190_v15, %v2703_v3  ;;  %5572 = vmatpush.bf16.msra.mxu0 %v8657_v6  ;;  %v9342_v6 = vld [vmem:[%s9987_s23 + $0x84c] sm:$0xf]  ;;  %v8554_v3 = vld [vmem:[%s9987_s23 + $0xa64] sm:$0xf0]  ;;  %v8277_v24 = vor.u32 %v9337_v23, %v8274_v8 }
 0x1e0   : > { %v11236_v31 = vadd.f32 1.0, %v9625_v51  ;;  %v8297_v63 = vor.u32 %v9342_v6, %v8294_v50  ;;  %v8557_v51 = vor.u32 %v9407_v43, %v8554_v3  ;;  %v7701_v50 = vor.u32 %v9195_v42, %v7700_v22  ;;  %v9392_v25 = vld [vmem:[%s9987_s23 + $0x9dc] sm:$0xf]  ;;  %v8494_v36 = vld [vmem:[%s9987_s23 + $0x9ec] sm:$0xf0] }
 0x1e1   : > { %9626 = vpow2.f32 %v7229_v34  ;;  %5535 = vmatpush.bf16.msrb.mxu1 %v8077_v9  ;;  %v2708_v61 = vsel %vm2707_vm6, %v11190_v15, %v2704_v7  ;;  %5509 = vmatpush.bf16.msra.mxu3 %v7717_v13  ;;  %v8617_v15 = vor.u32 %v9422_v27, %v8614_v30  ;;  %v9457_v34 = vld [vmem:[%s9987_s23 + $0xbe4] sm:$0xf]  ;;  %v9332_v7 = vld [vmem:[%s9987_s23 + $0x7fc] sm:$0xf]  ;;  %v8534_v27 = vld [vmem:[%s9987_s23 + $0xa3c] sm:$0xf0] }
 0x1e2   : > { %v2713_v52 = vsel %vm2710_vm7, %v2712_v38, %v2708_v61  ;;  %9628 = vrcp.f32 %v11236_v31  ;;  %v9402_v38 = vld [vmem:[%s9987_s23 + $0xa2c] sm:$0xf]  ;;  %v2576_v30 = vand.u32 2147483648, %v11236_v31  ;;  %vm2570_vm9 = vweird.f32 %v11236_v31  ;;  %v7680_v43 = vld [vmem:[%s9987_s23 + $0x378] sm:$0xf] }
 0x1e3   : > { %v2748_v18 = vmul.f32 %v2713_v52, %v11130_v53  ;;  %5573 = vmatpush.bf16.msra.mxu0 %v8637_v2  ;;  %v2574_v28 = vand.u32 2147483647, %v11236_v31  ;;  %v9190_v3 = vld [vmem:[%s9987_s23 + $0x388] sm:$0xf0]  ;;  %v8694_v8 = vld [vmem:[%s9987_s23 + $0xb7c] sm:$0xf0] }
 0x1e4   : > { %v2577_v17 = vor.u32 1.1754944e-38, %v2576_v30  ;;  %v9442_v23 = vld [vmem:[%s9987_s23 + $0xb6c] sm:$0xf]  ;;  %v9437_v30 = vld [vmem:[%s9987_s23 + $0xb44] sm:$0xf] }
 0x1e5   : > { %5536 = vmatpush.bf16.msrb.mxu1 %v8057_v62  ;;  %v11251_v54 = vpack.c.bf16 %v2748_v18, %v2738_v33  ;;  %v8754_v62 = vld [vmem:[%s9987_s23 + $0xbf4] sm:$0xf0]  ;;  %v8257_v18 = vor.u32 %v9332_v7, %v8254_v26  ;;  %vm2575_vm12 = vcmp.eq.f32.partialorder %v2574_v28, 8.507059e+37  ;;  %v7681_v7 = vor.u32 %v9190_v3, %v7680_v43  ;;  %v7660_v26 = vld [vmem:[%s9987_s23 + $0x350] sm:$0xf] }
 0x1e6   : > { %v8757_v61 = vor.u32 %v9457_v34, %v8754_v62  ;;  %v8497_v34 = vor.u32 %v9392_v25, %v8494_v36  ;;  %v9317_v62 = vld [vmem:[%s9987_s23 + $0x784] sm:$0xf]  ;;  %v7860_v28 = vld [vmem:[%s9987_s23 + $0x4e0] sm:$0xf]  ;;  %v9372_v36 = vld [vmem:[%s9987_s23 + $0x93c] sm:$0xf] }
 0x1e7   : > { %v9627_v35 = vpop.eup %9626  ;;  %5440 = vmatmul.bf16.vlgmr.msrb.gmra.mxu2 %v11251_v54  ;;  %5574 = vmatpush.bf16.msra.mxu0 %v8617_v15  ;;  %v8537_v15 = vor.u32 %v9402_v38, %v8534_v27  ;;  %v9185_v38 = vld [vmem:[%s9987_s23 + $0x360] sm:$0xf0]  ;;  %v9115_v27 = vld [vmem:[%s9987_s23 + $0x130] sm:$0xf0]  ;;  %v9170_v43 = vld [vmem:[%s9987_s23 + $0x2e8] sm:$0xf0] }
 0x1e8   : > { %v11257_v53 = vadd.f32 1.0, %v9627_v35  ;;  %v11260_v57 = vpop.eup %9628  ;;  %5544 = vmatpush.bf16.msrb.mxu2 %v8337_v39  ;;  %v9327_v39 = vld [vmem:[%s9987_s23 + $0x7d4] sm:$0xf]  ;;  %v8737_v35 = vor.u32 %v9452_v60, %v8734_v32  ;;  %v7661_v41 = vor.u32 %v9185_v38, %v7660_v26  ;;  %v9377_v42 = vld [vmem:[%s9987_s23 + $0x964] sm:$0xf] }
 0x1e9   : > { %5537 = vmatpush.bf16.msrb.mxu1 %v8037_v29  ;;  %v2566_v40 = vmul.f32 %v11260_v57, %v11236_v31  ;;  %vm2571_vm8 = vweird.f32 %v11260_v57  ;;  %v8234_v29 = vld [vmem:[%s9987_s23 + $0x7e4] sm:$0xf0]  ;;  %v9095_v26 = vld [vmem:[%s9987_s23 + $0x90] sm:$0xf0] }
 0x1ea   : > { %9630 = vrcp.f32 %v11257_v53  ;;  %vm11293_vm10 = vmor %vm2570_vm9, %vm2571_vm8  ;;  %v2726_v33 = vand.u32 2147483648, %v11257_v53  ;;  %v2724_v11 = vand.u32 2147483647, %v11257_v53  ;;  %vm2720_vm13 = vweird.f32 %v11257_v53 }
 0x1eb   : > { %v2567_v9 = vsub.f32 1.0, %v2566_v40  ;;  %5575 = vmatpush.bf16.msra.mxu0 %v8597_v37 }
 0x1ec   : > { %5538 = vmatmul.bf16.vlgmr.msrb.gmra.mxu1 %v10932_v12  ;;  %5545 = vmatpush.bf16.msrb.mxu2 %v8317_v46  ;;  %v8714_v46 = vld [vmem:[%s9987_s23 + $0xba4] sm:$0xf0]  ;;  %v2727_v55 = vor.u32 1.1754944e-38, %v2726_v33  ;;  %vm2725_vm15 = vcmp.eq.f32.partialorder %v2724_v11, 8.507059e+37  ;;  %v9382_v33 = vld [vmem:[%s9987_s23 + $0x98c] sm:$0xf] }
 0x1ed   : > { %5586 = vmatpush.bf16.msra.mxu1 %v8817_v10  ;;  %v2568_v16 = vmul.f32 %v11260_v57, %v2567_v9  ;;  %v9397_v10 = vld [vmem:[%s9987_s23 + $0xa04] sm:$0xf]  ;;  %v7360_v11 = vld [vmem:[%s9987_s23 + $0xf8] sm:$0xf] }
 0x1ee   : > { %v8517_v40 = vor.u32 %v9397_v10, %v8514_v44  ;;  %v9110_v10 = vld [vmem:[%s9987_s23 + $0x108] sm:$0xf0] }
 0x1ef   : > { %5576 = vmatpush.bf16.msra.mxu0 %v8577_v21  ;;  %v2569_v2 = vadd.f32 %v11260_v57, %v2568_v16 }
 0x1f0   : > { %v9631_v13 = vpop.eup %9630  ;;  %5546 = vmatpush.bf16.msrb.mxu2 %v8297_v63  ;;  %v8214_v63 = vld [vmem:[%s9987_s23 + $0x7bc] sm:$0xf0] }
 0x1f1   : > { %5587 = vmatpush.bf16.msra.mxu1 %v8797_v45  ;;  %v2716_v59 = vmul.f32 %v9631_v13, %v11257_v53  ;;  %v2573_v31 = vsel %vm11293_vm10, %v11260_v57, %v2569_v2  ;;  %vm2721_vm11 = vweird.f32 %v9631_v13  ;;  %v9447_v57 = vld [vmem:[%s9987_s23 + $0xb94] sm:$0xf]  ;;  %v9322_v45 = vld [vmem:[%s9987_s23 + $0x7ac] sm:$0xf]  ;;  %v8237_v53 = vor.u32 %v9327_v39, %v8234_v29  ;;  %v8474_v2 = vld [vmem:[%s9987_s23 + $0x9c4] sm:$0xf0] }
 0x1f2   : > { %v2578_v56 = vsel %vm2575_vm12, %v2577_v17, %v2573_v31  ;;  %vm2722_vm14 = vmor %vm2720_vm13, %vm2721_vm11  ;;  %v8717_v21 = vor.u32 %v9447_v57, %v8714_v46  ;;  %v7640_v29 = vld [vmem:[%s9987_s23 + $0x328] sm:$0xf]  ;;  %v9180_v31 = vld [vmem:[%s9987_s23 + $0x338] sm:$0xf0]  ;;  %v7361_v57 = vor.u32 %v9110_v10, %v7360_v11 }
 0x1f3   : > { %v2717_v52 = vsub.f32 1.0, %v2716_v59  ;;  %5577 = vmatpush.bf16.msra.mxu0 %v8557_v51  ;;  %v2739_v16 = vmul.f32 %v2578_v56, %v11182_v4  ;;  %v8217_v51 = vor.u32 %v9322_v45, %v8214_v63  ;;  %v8194_v4 = vld [vmem:[%s9987_s23 + $0x794] sm:$0xf0]  ;;  %v8697_v59 = vor.u32 %v9442_v23, %v8694_v8  ;;  %v7620_v46 = vld [vmem:[%s9987_s23 + $0x300] sm:$0xf] }
 0x1f4   : > { %5547 = vmatpush.bf16.msrb.mxu2 %v8277_v24  ;;  %v7380_v24 = vld [vmem:[%s9987_s23 + $0x120] sm:$0xf]  ;;  %v8197_v32 = vor.u32 %v9317_v62, %v8194_v4  ;;  %v7840_v17 = vld [vmem:[%s9987_s23 + $0x4b8] sm:$0xf]  ;;  %v7641_v22 = vor.u32 %v9180_v31, %v7640_v29  ;;  %v9175_v56 = vld [vmem:[%s9987_s23 + $0x310] sm:$0xf0] }
 0x1f5   : > { %5588 = vmatpush.bf16.msra.mxu1 %v8777_v49  ;;  %v2718_v48 = vmul.f32 %v9631_v13, %v2717_v52  ;;  %v9235_v52 = vld [vmem:[%s9987_s23 + $0x4f0] sm:$0xf0]  ;;  %v9105_v45 = vld [vmem:[%s9987_s23 + $0xe0] sm:$0xf0]  ;;  %v7621_v25 = vor.u32 %v9175_v56, %v7620_v46  ;;  %v7600_v63 = vld [vmem:[%s9987_s23 + $0x2d8] sm:$0xf] }
 0x1f6   : > { %v7800_v8 = vld [vmem:[%s9987_s23 + $0x468] sm:$0xf]  ;;  %v7601_v62 = vor.u32 %v9170_v43, %v7600_v63  ;;  %v9355_v29 = vld [vmem:[%s9987_s23 + $0x8b0] sm:$0xf0]  ;;  %v9210_v11 = vld [vmem:[%s9987_s23 + $0x428] sm:$0xf0] }
 0x1f7   : > { %v2719_v37 = vadd.f32 %v9631_v13, %v2718_v48  ;;  %5496 = vmatmul.bf16.vlgmr.msra.gmra.mxu2 %v10664_v0  ;;  %5578 = vmatpush.bf16.msra.mxu0 %v8537_v15  ;;  %v7381_v15 = vor.u32 %v9115_v27, %v7380_v24  ;;  %v7861_v48 = vor.u32 %v9235_v52, %v7860_v28  ;;  %v7300_v24 = vld [vmem:[%s9987_s23 + $0x80] sm:$0xf]  ;;  %v9085_v56 = vld [vmem:[%s9987_s23 + $0x40] sm:$0xf0]  ;;  %v7520_v63 = vld [vmem:[%s9987_s23 + $0x238] sm:$0xf] }
 0x1f8   : > { %5548 = vmatpush.bf16.msrb.mxu2 %v8257_v18  ;;  %v8454_v18 = vld [vmem:[%s9987_s23 + $0x99c] sm:$0xf0]  ;;  %v7301_v52 = vor.u32 %v9095_v26, %v7300_v24  ;;  %v9150_v43 = vld [vmem:[%s9987_s23 + $0x248] sm:$0xf0]  ;;  %v9145_v24 = vld [vmem:[%s9987_s23 + $0x220] sm:$0xf0] }
 0x1f9   : > { %5589 = vmatpush.bf16.msra.mxu1 %v8757_v61  ;;  %v2723_v6 = vsel %vm2722_vm14, %v9631_v13, %v2719_v37  ;;  %v8674_v61 = vld [vmem:[%s9987_s23 + $0xb54] sm:$0xf0]  ;;  %v8457_v44 = vor.u32 %v9382_v33, %v8454_v18  ;;  %v7780_v27 = vld [vmem:[%s9987_s23 + $0x440] sm:$0xf]  ;;  %v9160_v33 = vld [vmem:[%s9987_s23 + $0x298] sm:$0xf0] }
 0x1fa   : > { %v2728_v9 = vsel %vm2725_vm15, %v2727_v55, %v2723_v6  ;;  %v8677_v39 = vor.u32 %v9437_v30, %v8674_v61  ;;  %v8434_v37 = vld [vmem:[%s9987_s23 + $0x974] sm:$0xf0]  ;;  %v9215_v30 = vld [vmem:[%s9987_s23 + $0x450] sm:$0xf0]  ;;  %v8374_v28 = vld [vmem:[%s9987_s23 + $0x8fc] sm:$0xf0] }
 0x1fb   : > { %v2749_v49 = vmul.f32 %v2728_v9, %v11217_v19  ;;  %5579 = vmatpush.bf16.msra.mxu0 %v8517_v40  ;;  %v9387_v19 = vld [vmem:[%s9987_s23 + $0x9b4] sm:$0xf]  ;;  %v7340_v40 = vld [vmem:[%s9987_s23 + $0xd0] sm:$0xf]  ;;  %v8437_v6 = vor.u32 %v9377_v42, %v8434_v37  ;;  %v7781_v18 = vor.u32 %v9215_v30, %v7780_v27  ;;  %v7540_v37 = vld [vmem:[%s9987_s23 + $0x260] sm:$0xf] }
 0x1fc   : > { %5549 = vmatpush.bf16.msrb.mxu2 %v8237_v53  ;;  %v8477_v60 = vor.u32 %v9387_v19, %v8474_v2  ;;  %v7820_v53 = vld [vmem:[%s9987_s23 + $0x490] sm:$0xf]  ;;  %v9165_v2 = vld [vmem:[%s9987_s23 + $0x2c0] sm:$0xf0]  ;;  %v8280_v27 = vld [vmem:[%s9987_s23 + $0x828] sm:$0xf] }
 0x1fd   : > { %5590 = vmatpush.bf16.msra.mxu1 %v8737_v35  ;;  %v11324_v13 = vpack.c.bf16 %v2749_v49, %v2739_v16  ;;  %v9230_v35 = vld [vmem:[%s9987_s23 + $0x4c8] sm:$0xf0]  ;;  %v8414_v9 = vld [vmem:[%s9987_s23 + $0x94c] sm:$0xf0]  ;;  %v7320_v16 = vld [vmem:[%s9987_s23 + $0xa8] sm:$0xf] }
 0x1fe   : > { %5580 = vmatmul.bf16.vlgmr.msra.gmra.mxu0 %v11251_v54  ;;  %v7841_v55 = vor.u32 %v9230_v35, %v7840_v17  ;;  %v9100_v49 = vld [vmem:[%s9987_s23 + $0xb8] sm:$0xf0]  ;;  %v8417_v23 = vor.u32 %v9372_v36, %v8414_v9  ;;  %v7580_v19 = vld [vmem:[%s9987_s23 + $0x2b0] sm:$0xf]  ;;  %v8354_v17 = vld [vmem:[%s9987_s23 + $0x8d4] sm:$0xf0] }
 0x1ff   : > { %5628 = vmatpush.bf16.msrb.mxu0 %v7701_v50  ;;  %5454 = vmatmul.bf16.vlgmr.msrb.gmra.mxu3 %v11324_v13  ;;  %v9225_v50 = vld [vmem:[%s9987_s23 + $0x4a0] sm:$0xf0]  ;;  %v7321_v4 = vor.u32 %v9100_v49, %v7320_v16  ;;  %v7581_v61 = vor.u32 %v9165_v2, %v7580_v19  ;;  %v7260_v42 = vld [vmem:[%s9987_s23 + $0x30] sm:$0xf]  ;;  %v8020_v16 = vld [vmem:[%s9987_s23 + $0x620] sm:$0xf] }
 0x200   : > { %5558 = vmatpush.bf16.msrb.mxu3 %v8497_v34  ;;  %5550 = vmatpush.bf16.msrb.mxu2 %v8217_v51  ;;  %v7821_v3 = vor.u32 %v9225_v50, %v7820_v53  ;;  %v9220_v34 = vld [vmem:[%s9987_s23 + $0x478] sm:$0xf0]  ;;  %v9367_v51 = vld [vmem:[%s9987_s23 + $0x914] sm:$0xf]  ;;  %v9205_v53 = vld [vmem:[%s9987_s23 + $0x400] sm:$0xf0]  ;;  %v7261_v36 = vor.u32 %v9085_v56, %v7260_v42 }
 0x201   : > { %5591 = vmatpush.bf16.msra.mxu1 %v8717_v21  ;;  %v7341_v21 = vor.u32 %v9105_v45, %v7340_v40  ;;  %v9350_v40 = vld [vmem:[%s9987_s23 + $0x888] sm:$0xf0]  ;;  %v8300_v49 = vld [vmem:[%s9987_s23 + $0x850] sm:$0xf]  ;;  %v9340_v30 = vld [vmem:[%s9987_s23 + $0x838] sm:$0xf0] }
 0x202   : > { %v7460_v42 = vld [vmem:[%s9987_s23 + $0x1c0] sm:$0xf]  ;;  %v9330_v56 = vld [vmem:[%s9987_s23 + $0x7e8] sm:$0xf0] }
 0x203   : > { %5629 = vmatpush.bf16.msrb.mxu0 %v7681_v7  ;;  %v8394_v7 = vld [vmem:[%s9987_s23 + $0x924] sm:$0xf0] }
 0x204   : > { %5559 = vmatpush.bf16.msrb.mxu3 %v8477_v60  ;;  %5551 = vmatpush.bf16.msrb.mxu2 %v8197_v32  ;;  %v8397_v38 = vor.u32 %v9367_v51, %v8394_v7  ;;  %v9362_v60 = vld [vmem:[%s9987_s23 + $0x8ec] sm:$0xf]  ;;  %v7280_v32 = vld [vmem:[%s9987_s23 + $0x58] sm:$0xf]  ;;  %v7521_v51 = vor.u32 %v9150_v43, %v7520_v63  ;;  %v8500_v7 = vld [vmem:[%s9987_s23 + $0x9e0] sm:$0xf] }
 0x205   : > { %5592 = vmatpush.bf16.msra.mxu1 %v8697_v59  ;;  %v7801_v59 = vor.u32 %v9220_v34, %v7800_v8  ;;  %v8377_v31 = vor.u32 %v9362_v60, %v8374_v28  ;;  %v9275_v8 = vld [vmem:[%s9987_s23 + $0x630] sm:$0xf0]  ;;  %v7720_v34 = vld [vmem:[%s9987_s23 + $0x3c8] sm:$0xf]  ;;  %v8000_v60 = vld [vmem:[%s9987_s23 + $0x5f8] sm:$0xf] }
 0x206   : > { %v8021_v26 = vor.u32 %v9275_v8, %v8020_v16  ;;  %v9270_v28 = vld [vmem:[%s9987_s23 + $0x608] sm:$0xf0]  ;;  %v8220_v63 = vld [vmem:[%s9987_s23 + $0x7b0] sm:$0xf]  ;;  %v9325_v43 = vld [vmem:[%s9987_s23 + $0x7c0] sm:$0xf0] }
 0x207   : > { %5630 = vmatpush.bf16.msrb.mxu0 %v7661_v41  ;;  %5552 = vmatmul.bf16.vlgmr.msrb.gmra.mxu2 %v11090_v47  ;;  %v7560_v41 = vld [vmem:[%s9987_s23 + $0x288] sm:$0xf]  ;;  %v7940_v16 = vld [vmem:[%s9987_s23 + $0x580] sm:$0xf] }
 0x208   : > { %5600 = vmatpush.bf16.msra.mxu2 %v7381_v15  ;;  %5560 = vmatpush.bf16.msrb.mxu3 %v8457_v44  ;;  %v9090_v15 = vld [vmem:[%s9987_s23 + $0x68] sm:$0xf0]  ;;  %v7561_v10 = vor.u32 %v9160_v33, %v7560_v41  ;;  %v9357_v44 = vld [vmem:[%s9987_s23 + $0x8c4] sm:$0xf]  ;;  %v8281_v33 = vor.u32 %v9340_v30, %v8280_v27  ;;  %v8420_v8 = vld [vmem:[%s9987_s23 + $0x940] sm:$0xf] }
 0x209   : > { %5593 = vmatpush.bf16.msra.mxu1 %v8677_v39  ;;  %v8340_v39 = vld [vmem:[%s9987_s23 + $0x8a0] sm:$0xf]  ;;  %v7281_v35 = vor.u32 %v9090_v15, %v7280_v32  ;;  %v8357_v45 = vor.u32 %v9357_v44, %v8354_v17  ;;  %v8480_v32 = vld [vmem:[%s9987_s23 + $0x9b8] sm:$0xf]  ;;  %v9390_v41 = vld [vmem:[%s9987_s23 + $0x9c8] sm:$0xf0] }
 0x20a   : > { %v9140_v15 = vld [vmem:[%s9987_s23 + $0x1f8] sm:$0xf0]  ;;  %v8460_v17 = vld [vmem:[%s9987_s23 + $0x990] sm:$0xf]  ;;  %v7382_v27 = vld [vmem:[%s9987_s23 + $0x134] sm:$0xf0] }
 0x20b   : > { %5631 = vmatpush.bf16.msrb.mxu0 %v7641_v22  ;;  %v8341_v22 = vor.u32 %v9355_v29, %v8340_v39  ;;  %v8001_v39 = vor.u32 %v9270_v28, %v8000_v60  ;;  %v8260_v29 = vld [vmem:[%s9987_s23 + $0x800] sm:$0xf]  ;;  %v9370_v60 = vld [vmem:[%s9987_s23 + $0x928] sm:$0xf0] }
 0x20c   : > { %5594 = vmatmul.bf16.vlgmr.msra.gmra.mxu1 %v11324_v13  ;;  %5601 = vmatpush.bf16.msra.mxu2 %v7361_v57  ;;  %v9155_v57 = vld [vmem:[%s9987_s23 + $0x270] sm:$0xf0] }
 0x20d   : > { %5642 = vmatpush.bf16.msrb.mxu1 %v7861_v48  ;;  %5561 = vmatpush.bf16.msrb.mxu3 %v8437_v6  ;;  %v7760_v48 = vld [vmem:[%s9987_s23 + $0x418] sm:$0xf]  ;;  %v7740_v6 = vld [vmem:[%s9987_s23 + $0x3f0] sm:$0xf]  ;;  %v7541_v50 = vor.u32 %v9155_v57, %v7540_v37  ;;  %v9135_v37 = vld [vmem:[%s9987_s23 + $0x1d0] sm:$0xf0] }
 0x20e   : > { %v7761_v46 = vor.u32 %v9210_v11, %v7760_v48  ;;  %v8481_v48 = vor.u32 %v9390_v41, %v8480_v32  ;;  %v7980_v11 = vld [vmem:[%s9987_s23 + $0x5d0] sm:$0xf]  ;;  %v9120_v32 = vld [vmem:[%s9987_s23 + $0x158] sm:$0xf0] }
 0x20f   : > { %5632 = vmatpush.bf16.msrb.mxu0 %v7621_v25  ;;  %5510 = vmatmul.bf16.vlgmr.msra.gmra.mxu3 %v10685_v58  ;;  %v7240_v25 = vld [vmem:[%s9987_s23 + $0x8] sm:$0xf] }
 0x210   : > { %5602 = vmatpush.bf16.msra.mxu2 %v7341_v21  ;;  %v9080_v21 = vld [vmem:[%s9987_s23 + $0x18] sm:$0xf0] }
 0x211   : > { %5643 = vmatpush.bf16.msrb.mxu1 %v7841_v55  ;;  %5562 = vmatpush.bf16.msrb.mxu3 %v8417_v23  ;;  %v8320_v55 = vld [vmem:[%s9987_s23 + $0x878] sm:$0xf]  ;;  %v9345_v23 = vld [vmem:[%s9987_s23 + $0x860] sm:$0xf0]  ;;  %v7241_v19 = vor.u32 %v9080_v21, %v7240_v25 }
 0x212   : > { %v8321_v9 = vor.u32 %v9350_v40, %v8320_v55  ;;  %v8301_v2 = vor.u32 %v9345_v23, %v8300_v49  ;;  %v7960_v40 = vld [vmem:[%s9987_s23 + $0x5a8] sm:$0xf]  ;;  %v9255_v49 = vld [vmem:[%s9987_s23 + $0x590] sm:$0xf0] }
 0x213   : > { %5633 = vmatpush.bf16.msrb.mxu0 %v7601_v62  ;;  %v9200_v62 = vld [vmem:[%s9987_s23 + $0x3d8] sm:$0xf0] }
 0x214   : > { %5603 = vmatpush.bf16.msra.mxu2 %v7321_v4  ;;  %v9395_v4 = vld [vmem:[%s9987_s23 + $0x9f0] sm:$0xf0] }
 0x215   : > { %5644 = vmatpush.bf16.msrb.mxu1 %v7821_v3  ;;  %5563 = vmatpush.bf16.msrb.mxu3 %v8397_v38  ;;  %v7741_v3 = vor.u32 %v9205_v53, %v7740_v6  ;;  %v7721_v38 = vor.u32 %v9200_v62, %v7720_v34  ;;  %v7461_v6 = vor.u32 %v9135_v37, %v7460_v42  ;;  %v8440_v53 = vld [vmem:[%s9987_s23 + $0x968] sm:$0xf]  ;;  %v9375_v34 = vld [vmem:[%s9987_s23 + $0x950] sm:$0xf0] }
 0x216   : > { %v8221_v62 = vor.u32 %v9325_v43, %v8220_v63 }
 0x217   : > { %5634 = vmatpush.bf16.msrb.mxu0 %v7581_v61  ;;  %v8501_v61 = vor.u32 %v9395_v4, %v8500_v7  ;;  %v9125_v7 = vld [vmem:[%s9987_s23 + $0x180] sm:$0xf0]  ;;  %v7941_v4 = vor.u32 %v9255_v49, %v7940_v16 }
 0x218   : > { %5604 = vmatpush.bf16.msra.mxu2 %v7301_v52  ;;  %v9305_v16 = vld [vmem:[%s9987_s23 + $0x720] sm:$0xf0] }
 0x219   : > { %5645 = vmatpush.bf16.msrb.mxu1 %v7801_v59  ;;  %5564 = vmatpush.bf16.msrb.mxu3 %v8377_v31  ;;  %v7500_v59 = vld [vmem:[%s9987_s23 + $0x210] sm:$0xf]  ;;  %v9335_v31 = vld [vmem:[%s9987_s23 + $0x810] sm:$0xf0] }
 0x21a   : > { %v7501_v52 = vor.u32 %v9145_v24, %v7500_v59  ;;  %v9320_v59 = vld [vmem:[%s9987_s23 + $0x798] sm:$0xf0]  ;;  %v8421_v24 = vor.u32 %v9375_v34, %v8420_v8  ;;  %v9098_v8 = vld [vmem:[%s9987_s23 + $0xac] sm:$0xf]  ;;  %v7322_v34 = vld [vmem:[%s9987_s23 + $0xbc] sm:$0xf0] }
 0x21b   : > { %5635 = vmatpush.bf16.msrb.mxu0 %v7561_v10  ;;  %v9265_v10 = vld [vmem:[%s9987_s23 + $0x5e0] sm:$0xf0] }
 0x21c   : > { %5605 = vmatpush.bf16.msra.mxu2 %v7281_v35  ;;  %v9385_v35 = vld [vmem:[%s9987_s23 + $0x9a0] sm:$0xf0]  ;;  %v7981_v57 = vor.u32 %v9265_v10, %v7980_v11  ;;  %v7362_v11 = vld [vmem:[%s9987_s23 + $0x10c] sm:$0xf0] }
 0x21d   : > { %5646 = vmatpush.bf16.msrb.mxu1 %v7781_v18  ;;  %5565 = vmatpush.bf16.msrb.mxu3 %v8357_v45  ;;  %v7480_v18 = vld [vmem:[%s9987_s23 + $0x1e8] sm:$0xf]  ;;  %v8461_v55 = vor.u32 %v9385_v35, %v8460_v17  ;;  %v9260_v45 = vld [vmem:[%s9987_s23 + $0x5b8] sm:$0xf0]  ;;  %v9365_v17 = vld [vmem:[%s9987_s23 + $0x900] sm:$0xf0] }
 0x21e   : > { %5636 = vmatmul.bf16.vlgmr.msrb.gmra.mxu0 %v10664_v0  ;;  %v7481_v44 = vor.u32 %v9140_v15, %v7480_v18  ;;  %v7961_v21 = vor.u32 %v9260_v45, %v7960_v40  ;;  %v7900_v18 = vld [vmem:[%s9987_s23 + $0x530] sm:$0xf]  ;;  %v8180_v15 = vld [vmem:[%s9987_s23 + $0x760] sm:$0xf]  ;;  %v9103_v45 = vld [vmem:[%s9987_s23 + $0xd4] sm:$0xf] }
 0x21f   : > { %5684 = vmatpush.bf16.msra.mxu0 %v8341_v22  ;;  %v8261_v22 = vor.u32 %v9335_v31, %v8260_v29  ;;  %v9245_v31 = vld [vmem:[%s9987_s23 + $0x540] sm:$0xf0]  ;;  %v8660_v40 = vld [vmem:[%s9987_s23 + $0xb20] sm:$0xf] }
 0x220   : > { %5606 = vmatpush.bf16.msra.mxu2 %v7261_v36  ;;  %5566 = vmatmul.bf16.vlgmr.msrb.gmra.mxu3 %v11150_v14  ;;  %v7440_v36 = vld [vmem:[%s9987_s23 + $0x198] sm:$0xf]  ;;  %v7901_v42 = vor.u32 %v9245_v31, %v7900_v18  ;;  %v8100_v18 = vld [vmem:[%s9987_s23 + $0x6c0] sm:$0xf]  ;;  %v7282_v31 = vld [vmem:[%s9987_s23 + $0x6c] sm:$0xf0] }
 0x221   : > { %5647 = vmatpush.bf16.msrb.mxu1 %v7761_v46  ;;  %5614 = vmatpush.bf16.msra.mxu3 %v7541_v50  ;;  %v8240_v46 = vld [vmem:[%s9987_s23 + $0x7d8] sm:$0xf]  ;;  %v9380_v50 = vld [vmem:[%s9987_s23 + $0x978] sm:$0xf0] }
 0x222   : > { %v8241_v25 = vor.u32 %v9330_v56, %v8240_v46  ;;  %v8160_v46 = vld [vmem:[%s9987_s23 + $0x738] sm:$0xf]  ;;  %v9310_v56 = vld [vmem:[%s9987_s23 + $0x748] sm:$0xf0] }
 0x223   : > { %5685 = vmatpush.bf16.msra.mxu0 %v8321_v9  ;;  %v9130_v9 = vld [vmem:[%s9987_s23 + $0x1a8] sm:$0xf0] }
 0x224   : > { %5607 = vmatpush.bf16.msra.mxu2 %v7241_v19  ;;  %v7441_v23 = vor.u32 %v9130_v9, %v7440_v36  ;;  %v7920_v19 = vld [vmem:[%s9987_s23 + $0x558] sm:$0xf]  ;;  %v8161_v36 = vor.u32 %v9310_v56, %v8160_v46  ;;  %v9153_v9 = vld [vmem:[%s9987_s23 + $0x264] sm:$0xf]  ;;  %v9083_v46 = vld [vmem:[%s9987_s23 + $0x34] sm:$0xf] }
 0x225   : > { %5648 = vmatpush.bf16.msrb.mxu1 %v7741_v3  ;;  %5615 = vmatpush.bf16.msra.mxu3 %v7521_v51  ;;  %v8441_v3 = vor.u32 %v9380_v50, %v8440_v53  ;;  %v7420_v51 = vld [vmem:[%s9987_s23 + $0x170] sm:$0xf]  ;;  %v9435_v53 = vld [vmem:[%s9987_s23 + $0xb30] sm:$0xf0]  ;;  %v8360_v50 = vld [vmem:[%s9987_s23 + $0x8c8] sm:$0xf] }
 0x226   : > { %v7421_v30 = vor.u32 %v9125_v7, %v7420_v51  ;;  %v8661_v49 = vor.u32 %v9435_v53, %v8660_v40  ;;  %v8640_v51 = vld [vmem:[%s9987_s23 + $0xaf8] sm:$0xf]  ;;  %v9430_v7 = vld [vmem:[%s9987_s23 + $0xb08] sm:$0xf0]  ;;  %v7262_v56 = vld [vmem:[%s9987_s23 + $0x44] sm:$0xf0] }
 0x227   : > { %5686 = vmatpush.bf16.msra.mxu0 %v8301_v2  ;;  %5608 = vmatmul.bf16.vlgmr.msra.gmra.mxu2 %v10429_v5  ;;  %v8200_v2 = vld [vmem:[%s9987_s23 + $0x788] sm:$0xf]  ;;  %v8580_v40 = vld [vmem:[%s9987_s23 + $0xa80] sm:$0xf]  ;;  %v9133_v53 = vld [vmem:[%s9987_s23 + $0x1c4] sm:$0xf] }
 0x228   : > { %5656 = vmatpush.bf16.msrb.mxu2 %v8021_v26  ;;  %v9250_v26 = vld [vmem:[%s9987_s23 + $0x568] sm:$0xf0]  ;;  %v8201_v28 = vor.u32 %v9320_v59, %v8200_v2  ;;  %v7522_v2 = vld [vmem:[%s9987_s23 + $0x24c] sm:$0xf0]  ;;  %v7325_v59 = vor.u32 %v9098_v8, %v7322_v34  ;;  %v8022_v8 = vld [vmem:[%s9987_s23 + $0x634] sm:$0xf0] }
 0x229   : > { %5649 = vmatpush.bf16.msrb.mxu1 %v7721_v38  ;;  %5616 = vmatpush.bf16.msra.mxu3 %v7501_v52  ;;  %v9113_v38 = vld [vmem:[%s9987_s23 + $0x124] sm:$0xf]  ;;  %v7400_v52 = vld [vmem:[%s9987_s23 + $0x148] sm:$0xf]  ;;  %v7921_v41 = vor.u32 %v9250_v26, %v7920_v19  ;;  %v9148_v19 = vld [vmem:[%s9987_s23 + $0x23c] sm:$0xf] }
 0x22a   : > { %v7401_v10 = vor.u32 %v9120_v32, %v7400_v52  ;;  %v9300_v26 = vld [vmem:[%s9987_s23 + $0x6f8] sm:$0xf0]  ;;  %v9143_v32 = vld [vmem:[%s9987_s23 + $0x214] sm:$0xf] }
 0x22b   : > { %5687 = vmatpush.bf16.msra.mxu0 %v8281_v33  ;;  %v7385_v33 = vor.u32 %v9113_v38, %v7382_v27  ;;  %v8641_v38 = vor.u32 %v9430_v7, %v8640_v51  ;;  %v9093_v27 = vld [vmem:[%s9987_s23 + $0x84] sm:$0xf]  ;;  %v7442_v51 = vld [vmem:[%s9987_s23 + $0x1ac] sm:$0xf0] }
 0x22c   : > { %5650 = vmatmul.bf16.vlgmr.msrb.gmra.mxu1 %v10685_v58  ;;  %5657 = vmatpush.bf16.msrb.mxu2 %v8001_v39  ;;  %v9315_v39 = vld [vmem:[%s9987_s23 + $0x770] sm:$0xf0] }
 0x22d   : > { %5698 = vmatpush.bf16.msra.mxu1 %v8501_v61  ;;  %5617 = vmatpush.bf16.msra.mxu3 %v7481_v44  ;;  %v8400_v61 = vld [vmem:[%s9987_s23 + $0x918] sm:$0xf]  ;;  %v8380_v44 = vld [vmem:[%s9987_s23 + $0x8f0] sm:$0xf]  ;;  %v8181_v35 = vor.u32 %v9315_v39, %v8180_v15  ;;  %v9295_v15 = vld [vmem:[%s9987_s23 + $0x6d0] sm:$0xf0] }
 0x22e   : > { %v8401_v29 = vor.u32 %v9370_v60, %v8400_v61  ;;  %v7525_v61 = vor.u32 %v9148_v19, %v7522_v2  ;;  %v8620_v60 = vld [vmem:[%s9987_s23 + $0xad0] sm:$0xf]  ;;  %v9280_v19 = vld [vmem:[%s9987_s23 + $0x658] sm:$0xf0] }
 0x22f   : > { %5688 = vmatpush.bf16.msra.mxu0 %v8261_v22  ;;  %v7880_v22 = vld [vmem:[%s9987_s23 + $0x508] sm:$0xf] }
 0x230   : > { %5658 = vmatpush.bf16.msrb.mxu2 %v7981_v57  ;;  %v9240_v57 = vld [vmem:[%s9987_s23 + $0x518] sm:$0xf0] }
 0x231   : > { %5699 = vmatpush.bf16.msra.mxu1 %v8481_v48  ;;  %5618 = vmatpush.bf16.msra.mxu3 %v7461_v6  ;;  %v9108_v48 = vld [vmem:[%s9987_s23 + $0xfc] sm:$0xf]  ;;  %v7342_v6 = vld [vmem:[%s9987_s23 + $0xe4] sm:$0xf0]  ;;  %v7881_v63 = vor.u32 %v9240_v57, %v7880_v22 }
 0x232   : > { %v7365_v37 = vor.u32 %v9108_v48, %v7362_v11  ;;  %v7345_v43 = vor.u32 %v9103_v45, %v7342_v6  ;;  %v8600_v11 = vld [vmem:[%s9987_s23 + $0xaa8] sm:$0xf]  ;;  %v9415_v45 = vld [vmem:[%s9987_s23 + $0xa90] sm:$0xf0] }
 0x233   : > { %5689 = vmatpush.bf16.msra.mxu0 %v8241_v25  ;;  %v9360_v25 = vld [vmem:[%s9987_s23 + $0x8d8] sm:$0xf0] }
 0x234   : > { %5659 = vmatpush.bf16.msrb.mxu2 %v7961_v21  ;;  %v7542_v21 = vld [vmem:[%s9987_s23 + $0x274] sm:$0xf0] }
 0x235   : > { %5700 = vmatpush.bf16.msra.mxu1 %v8461_v55  ;;  %5619 = vmatpush.bf16.msra.mxu3 %v7441_v23  ;;  %v8381_v55 = vor.u32 %v9365_v17, %v8380_v44  ;;  %v8361_v23 = vor.u32 %v9360_v25, %v8360_v50  ;;  %v8101_v44 = vor.u32 %v9295_v15, %v8100_v18  ;;  %v9138_v17 = vld [vmem:[%s9987_s23 + $0x1ec] sm:$0xf]  ;;  %v7462_v50 = vld [vmem:[%s9987_s23 + $0x1d4] sm:$0xf0]  ;;  %v8520_v18 = vld [vmem:[%s9987_s23 + $0xa08] sm:$0xf] }
 0x236   : > { %v7265_v25 = vor.u32 %v9083_v46, %v7262_v56  ;;  %v9313_v46 = vld [vmem:[%s9987_s23 + $0x764] sm:$0xf]  ;;  %v8182_v56 = vld [vmem:[%s9987_s23 + $0x774] sm:$0xf0] }
 0x237   : > { %5690 = vmatpush.bf16.msra.mxu0 %v8221_v62  ;;  %v7545_v62 = vor.u32 %v9153_v9, %v7542_v21  ;;  %v9285_v9 = vld [vmem:[%s9987_s23 + $0x680] sm:$0xf0]  ;;  %v8581_v21 = vor.u32 %v9415_v45, %v8580_v40 }
 0x238   : > { %5660 = vmatpush.bf16.msrb.mxu2 %v7941_v4 }
 0x239   : > { %5701 = vmatpush.bf16.msra.mxu1 %v8441_v3  ;;  %5620 = vmatpush.bf16.msra.mxu3 %v7421_v30  ;;  %v8140_v3 = vld [vmem:[%s9987_s23 + $0x710] sm:$0xf]  ;;  %v7302_v30 = vld [vmem:[%s9987_s23 + $0x94] sm:$0xf0] }
 0x23a   : > { %v8141_v4 = vor.u32 %v9305_v16, %v8140_v3  ;;  %v7242_v3 = vld [vmem:[%s9987_s23 + $0x1c] sm:$0xf0]  ;;  %v7465_v16 = vor.u32 %v9133_v53, %v7462_v50  ;;  %v9465_v53 = vld [vmem:[%s9987_s23 + $0xc20] sm:$0xf0] }
 0x23b   : > { %5691 = vmatpush.bf16.msra.mxu0 %v8201_v28  ;;  %v9425_v28 = vld [vmem:[%s9987_s23 + $0xae0] sm:$0xf0] }
 0x23c   : > { %5661 = vmatpush.bf16.msrb.mxu2 %v7921_v41  ;;  %v7502_v41 = vld [vmem:[%s9987_s23 + $0x224] sm:$0xf0]  ;;  %v8621_v39 = vor.u32 %v9425_v28, %v8620_v60  ;;  %v8002_v60 = vld [vmem:[%s9987_s23 + $0x60c] sm:$0xf0]  ;;  %v11528_v28 = vpop.f32.mrf.mxu2 }
 0x23d   : > { %5702 = vmatpush.bf16.msra.mxu1 %v8421_v24  ;;  %5621 = vmatpush.bf16.msra.mxu3 %v7401_v10  ;;  %v8120_v24 = vld [vmem:[%s9987_s23 + $0x6e8] sm:$0xf]  ;;  %v7505_v48 = vor.u32 %v9143_v32, %v7502_v41  ;;  %v9420_v10 = vld [vmem:[%s9987_s23 + $0xab8] sm:$0xf0]  ;;  %v9123_v32 = vld [vmem:[%s9987_s23 + $0x174] sm:$0xf] }
 0x23e   : > { %5692 = vmatmul.bf16.vlgmr.msra.gmra.mxu0 %v11090_v47  ;;  %v8121_v52 = vor.u32 %v9300_v26, %v8120_v24  ;;  %v8601_v57 = vor.u32 %v9420_v10, %v8600_v11  ;;  %v8540_v24 = vld [vmem:[%s9987_s23 + $0xa30] sm:$0xf]  ;;  %v8820_v26 = vld [vmem:[%s9987_s23 + $0xc60] sm:$0xf]  ;;  %v7422_v41 = vld [vmem:[%s9987_s23 + $0x184] sm:$0xf0] }
 0x23f   : > { %5740 = vmatpush.bf16.msrb.mxu0 %v7385_v33  ;;  %v7305_v33 = vor.u32 %v9093_v27, %v7302_v30  ;;  %v9405_v30 = vld [vmem:[%s9987_s23 + $0xa40] sm:$0xf0]  ;;  %v7425_v11 = vor.u32 %v9123_v32, %v7422_v41  ;;  %v9248_v41 = vld [vmem:[%s9987_s23 + $0x55c] sm:$0xf] }
 0x240   : > { %5662 = vmatpush.bf16.msrb.mxu2 %v7901_v42  ;;  %5622 = vmatmul.bf16.vlgmr.msra.gmra.mxu3 %v10431_v20  ;;  %v8080_v42 = vld [vmem:[%s9987_s23 + $0x698] sm:$0xf]  ;;  %v8541_v15 = vor.u32 %v9405_v30, %v8540_v24  ;;  %v9193_v10 = vld [vmem:[%s9987_s23 + $0x3a4] sm:$0xf]  ;;  %v7662_v24 = vld [vmem:[%s9987_s23 + $0x364] sm:$0xf0] }
 0x241   : > { %5703 = vmatpush.bf16.msra.mxu1 %v8401_v29  ;;  %5670 = vmatpush.bf16.msrb.mxu3 %v8181_v35  ;;  %v9088_v29 = vld [vmem:[%s9987_s23 + $0x5c] sm:$0xf]  ;;  %v7482_v35 = vld [vmem:[%s9987_s23 + $0x1fc] sm:$0xf0] }
 0x242   : > { %v7285_v22 = vor.u32 %v9088_v29, %v7282_v31  ;;  %v9400_v29 = vld [vmem:[%s9987_s23 + $0xa18] sm:$0xf0]  ;;  %v8800_v31 = vld [vmem:[%s9987_s23 + $0xc38] sm:$0xf] }
 0x243   : > { %5741 = vmatpush.bf16.msrb.mxu0 %v7365_v37  ;;  %v9290_v37 = vld [vmem:[%s9987_s23 + $0x6a8] sm:$0xf0]  ;;  %v8521_v40 = vor.u32 %v9400_v29, %v8520_v18  ;;  %v7642_v29 = vld [vmem:[%s9987_s23 + $0x33c] sm:$0xf0] }
 0x244   : > { %5663 = vmatpush.bf16.msrb.mxu2 %v7881_v63  ;;  %v8081_v6 = vor.u32 %v9290_v37, %v8080_v42  ;;  %v8560_v63 = vld [vmem:[%s9987_s23 + $0xa58] sm:$0xf]  ;;  %v9118_v42 = vld [vmem:[%s9987_s23 + $0x14c] sm:$0xf]  ;;  %v7402_v37 = vld [vmem:[%s9987_s23 + $0x15c] sm:$0xf0] }
 0x245   : > { %5704 = vmatpush.bf16.msra.mxu1 %v8381_v55  ;;  %5671 = vmatpush.bf16.msrb.mxu3 %v8161_v36  ;;  %v7485_v55 = vor.u32 %v9138_v17, %v7482_v35  ;;  %v8060_v36 = vld [vmem:[%s9987_s23 + $0x670] sm:$0xf]  ;;  %v7982_v17 = vld [vmem:[%s9987_s23 + $0x5e4] sm:$0xf0]  ;;  %v11539_v35 = vpop.f32.mrf.mxu0 }
 0x246   : > { %v8061_v34 = vor.u32 %v9285_v9, %v8060_v36  ;;  %v9258_v36 = vld [vmem:[%s9987_s23 + $0x5ac] sm:$0xf]  ;;  %v7962_v9 = vld [vmem:[%s9987_s23 + $0x5bc] sm:$0xf0] }
 0x247   : > { %5742 = vmatpush.bf16.msrb.mxu0 %v7345_v43  ;;  %5664 = vmatmul.bf16.vlgmr.msrb.gmra.mxu2 %v10802_v1  ;;  %v9078_v43 = vld [vmem:[%s9987_s23 + $0xc] sm:$0xf] }
 0x248   : > { %5712 = vmatpush.bf16.msra.mxu2 %v8661_v49  ;;  %v9410_v49 = vld [vmem:[%s9987_s23 + $0xa68] sm:$0xf0]  ;;  %v7245_v7 = vor.u32 %v9078_v43, %v7242_v3  ;;  %v7682_v43 = vld [vmem:[%s9987_s23 + $0x38c] sm:$0xf0] }
 0x249   : > { %5705 = vmatpush.bf16.msra.mxu1 %v8361_v23  ;;  %5672 = vmatpush.bf16.msrb.mxu3 %v8141_v4  ;;  %v9273_v23 = vld [vmem:[%s9987_s23 + $0x624] sm:$0xf]  ;;  %v8040_v4 = vld [vmem:[%s9987_s23 + $0x648] sm:$0xf]  ;;  %v8561_v2 = vor.u32 %v9410_v49, %v8560_v63  ;;  %v9188_v63 = vld [vmem:[%s9987_s23 + $0x37c] sm:$0xf] }
 0x24a   : > { %v8162_v49 = vld [vmem:[%s9987_s23 + $0x74c] sm:$0xf0] }
 0x24b   : > { %5743 = vmatpush.bf16.msrb.mxu0 %v7325_v59  ;;  %v8025_v59 = vor.u32 %v9273_v23, %v8022_v8  ;;  %v11558_v23 = vpop.f32.mrf.mxu2  ;;  %v7965_v8 = vor.u32 %v9258_v36, %v7962_v9  ;;  %v8700_v9 = vld [vmem:[%s9987_s23 + $0xb70] sm:$0xf] }
 0x24c   : > { %5706 = vmatmul.bf16.vlgmr.msra.gmra.mxu1 %v11150_v14  ;;  %5713 = vmatpush.bf16.msra.mxu2 %v8641_v38  ;;  %v9475_v38 = vld [vmem:[%s9987_s23 + $0xc70] sm:$0xf0] }
 0x24d   : > { %5754 = vmatpush.bf16.msrb.mxu1 %v7545_v62  ;;  %5673 = vmatpush.bf16.msrb.mxu3 %v8121_v52  ;;  %v9128_v62 = vld [vmem:[%s9987_s23 + $0x19c] sm:$0xf]  ;;  %v8041_v52 = vor.u32 %v9280_v19, %v8040_v4  ;;  %v7942_v4 = vld [vmem:[%s9987_s23 + $0x594] sm:$0xf0]  ;;  %v11564_v19 = vpop.f32.mrf.mxu3  ;;  %v11571_v30 = vpop.f32.mrf.mxu0 }
 0x24e   : > { %v7445_v27 = vor.u32 %v9128_v62, %v7442_v51  ;;  %v9460_v62 = vld [vmem:[%s9987_s23 + $0xbf8] sm:$0xf0]  ;;  %v7685_v51 = vor.u32 %v9188_v63, %v7682_v43 }
 0x24f   : > { %5744 = vmatpush.bf16.msrb.mxu0 %v7305_v33  ;;  %v8821_v33 = vor.u32 %v9475_v38, %v8820_v26  ;;  %v9303_v38 = vld [vmem:[%s9987_s23 + $0x714] sm:$0xf]  ;;  %v9168_v43 = vld [vmem:[%s9987_s23 + $0x2dc] sm:$0xf] }
 0x250   : > { %5714 = vmatpush.bf16.msra.mxu2 %v8621_v39 }
 0x251   : > { %5755 = vmatpush.bf16.msrb.mxu1 %v7525_v61  ;;  %5674 = vmatpush.bf16.msrb.mxu3 %v8101_v44  ;;  %v9268_v61 = vld [vmem:[%s9987_s23 + $0x5fc] sm:$0xf]  ;;  %v9263_v44 = vld [vmem:[%s9987_s23 + $0x5d4] sm:$0xf] }
 0x252   : > { %v8005_v39 = vor.u32 %v9268_v61, %v8002_v60  ;;  %v7985_v45 = vor.u32 %v9263_v44, %v7982_v17  ;;  %v8740_v60 = vld [vmem:[%s9987_s23 + $0xbc0] sm:$0xf]  ;;  %v8720_v17 = vld [vmem:[%s9987_s23 + $0xb98] sm:$0xf] }
 0x253   : > { %5745 = vmatpush.bf16.msrb.mxu0 %v7285_v22  ;;  %v7702_v22 = vld [vmem:[%s9987_s23 + $0x3b4] sm:$0xf0] }
 0x254   : > { %5715 = vmatpush.bf16.msra.mxu2 %v8601_v57  ;;  %v7705_v50 = vor.u32 %v9193_v10, %v7702_v22  ;;  %v11584_v10 = vpop.f32.mrf.mxu2  ;;  %v9450_v22 = vld [vmem:[%s9987_s23 + $0xba8] sm:$0xf0] }
 0x255   : > { %5756 = vmatpush.bf16.msrb.mxu1 %v7505_v48  ;;  %5675 = vmatpush.bf16.msrb.mxu3 %v8081_v6  ;;  %v9470_v48 = vld [vmem:[%s9987_s23 + $0xc48] sm:$0xf0]  ;;  %v8780_v6 = vld [vmem:[%s9987_s23 + $0xc10] sm:$0xf] }
 0x256   : > { %v8801_v57 = vor.u32 %v9470_v48, %v8800_v31  ;;  %v8781_v3 = vor.u32 %v9465_v53, %v8780_v6  ;;  %v9298_v48 = vld [vmem:[%s9987_s23 + $0x6ec] sm:$0xf]  ;;  %v9293_v6 = vld [vmem:[%s9987_s23 + $0x6c4] sm:$0xf]  ;;  %v8102_v53 = vld [vmem:[%s9987_s23 + $0x6d4] sm:$0xf0] }
 0x257   : > { %5746 = vmatpush.bf16.msrb.mxu0 %v7265_v25  ;;  %v7405_v25 = vor.u32 %v9118_v42, %v7402_v37  ;;  %v9243_v37 = vld [vmem:[%s9987_s23 + $0x534] sm:$0xf] }
 0x258   : > { %5716 = vmatpush.bf16.msra.mxu2 %v8581_v21  ;;  %v8185_v21 = vor.u32 %v9313_v46, %v8182_v56  ;;  %v9173_v56 = vld [vmem:[%s9987_s23 + $0x304] sm:$0xf] }
 0x259   : > { %5757 = vmatpush.bf16.msrb.mxu1 %v7485_v55  ;;  %5676 = vmatpush.bf16.msrb.mxu3 %v8061_v34  ;;  %v11547_v55 = vpop.f32.mrf.mxu1  ;;  %v8760_v34 = vld [vmem:[%s9987_s23 + $0xbe8] sm:$0xf] }
 0x25a   : > { %v8761_v26 = vor.u32 %v9460_v62, %v8760_v34  ;;  %v7602_v34 = vld [vmem:[%s9987_s23 + $0x2ec] sm:$0xf0]  ;;  %v9433_v62 = vld [vmem:[%s9987_s23 + $0xb24] sm:$0xf] }
 0x25b   : > { %5747 = vmatpush.bf16.msrb.mxu0 %v7245_v7  ;;  %v9253_v7 = vld [vmem:[%s9987_s23 + $0x584] sm:$0xf] }
 0x25c   : > { %5717 = vmatpush.bf16.msra.mxu2 %v8561_v2  ;;  %v7945_v61 = vor.u32 %v9253_v7, %v7942_v4  ;;  %v9288_v4 = vld [vmem:[%s9987_s23 + $0x69c] sm:$0xf] }
 0x25d   : > { %5758 = vmatpush.bf16.msrb.mxu1 %v7465_v16  ;;  %5677 = vmatpush.bf16.msrb.mxu3 %v8041_v52  ;;  %v9308_v16 = vld [vmem:[%s9987_s23 + $0x73c] sm:$0xf]  ;;  %v9455_v52 = vld [vmem:[%s9987_s23 + $0xbd0] sm:$0xf0] }
 0x25e   : > { %5748 = vmatmul.bf16.vlgmr.msrb.gmra.mxu0 %v10429_v5  ;;  %v8165_v2 = vor.u32 %v9308_v16, %v8162_v49  ;;  %v8741_v31 = vor.u32 %v9455_v52, %v8740_v60  ;;  %v7882_v16 = vld [vmem:[%s9987_s23 + $0x51c] sm:$0xf0]  ;;  %v9233_v60 = vld [vmem:[%s9987_s23 + $0x4e4] sm:$0xf]  ;;  %v7862_v52 = vld [vmem:[%s9987_s23 + $0x4f4] sm:$0xf0] }
 0x25f   : > { %5796 = vmatpush.bf16.msra.mxu0 %v8025_v59  ;;  %v9183_v59 = vld [vmem:[%s9987_s23 + $0x354] sm:$0xf] }
 0x260   : > { %5718 = vmatpush.bf16.msra.mxu2 %v8541_v15  ;;  %5678 = vmatmul.bf16.vlgmr.msrb.gmra.mxu3 %v10932_v12  ;;  %v7665_v32 = vor.u32 %v9183_v59, %v7662_v24  ;;  %v8680_v24 = vld [vmem:[%s9987_s23 + $0xb48] sm:$0xf] }
 0x261   : > { %5759 = vmatpush.bf16.msrb.mxu1 %v7445_v27  ;;  %5726 = vmatpush.bf16.msra.mxu3 %v8821_v33  ;;  %v8142_v27 = vld [vmem:[%s9987_s23 + $0x724] sm:$0xf0]  ;;  %v7922_v33 = vld [vmem:[%s9987_s23 + $0x56c] sm:$0xf0]  ;;  %v11578_v18 = vpop.f32.mrf.mxu1 }
 0x262   : > { %v8145_v15 = vor.u32 %v9303_v38, %v8142_v27  ;;  %v7925_v44 = vor.u32 %v9248_v41, %v7922_v33  ;;  %v7605_v38 = vor.u32 %v9168_v43, %v7602_v34  ;;  %v7582_v33 = vld [vmem:[%s9987_s23 + $0x2c4] sm:$0xf0] }
 0x263   : > { %5797 = vmatpush.bf16.msra.mxu0 %v8005_v39  ;;  %v9178_v39 = vld [vmem:[%s9987_s23 + $0x32c] sm:$0xf] }
 0x264   : > { %5719 = vmatpush.bf16.msra.mxu2 %v8521_v40  ;;  %v7645_v42 = vor.u32 %v9178_v39, %v7642_v29  ;;  %v7622_v40 = vld [vmem:[%s9987_s23 + $0x314] sm:$0xf0]  ;;  %v8642_v39 = vld [vmem:[%s9987_s23 + $0xb0c] sm:$0xf0] }
 0x265   : > { %5760 = vmatpush.bf16.msrb.mxu1 %v7425_v11  ;;  %5727 = vmatpush.bf16.msra.mxu3 %v8801_v57  ;;  %v8122_v11 = vld [vmem:[%s9987_s23 + $0x6fc] sm:$0xf0]  ;;  %v7902_v57 = vld [vmem:[%s9987_s23 + $0x544] sm:$0xf0]  ;;  %v7625_v63 = vor.u32 %v9173_v56, %v7622_v40 }
 0x266   : > { %v8125_v46 = vor.u32 %v9298_v48, %v8122_v11  ;;  %v7905_v36 = vor.u32 %v9243_v37, %v7902_v57  ;;  %v8062_v48 = vld [vmem:[%s9987_s23 + $0x684] sm:$0xf0]  ;;  %v7562_v37 = vld [vmem:[%s9987_s23 + $0x29c] sm:$0xf0]  ;;  %v9228_v57 = vld [vmem:[%s9987_s23 + $0x4bc] sm:$0xf] }
 0x267   : > { %5798 = vmatpush.bf16.msra.mxu0 %v7985_v45  ;;  %5720 = vmatmul.bf16.vlgmr.msra.gmra.mxu2 %v11251_v54  ;;  %v8721_v45 = vor.u32 %v9450_v22, %v8720_v17  ;;  %v9158_v17 = vld [vmem:[%s9987_s23 + $0x28c] sm:$0xf] }
 0x268   : > { %5768 = vmatpush.bf16.msrb.mxu2 %v7705_v50  ;;  %v11594_v50 = vpop.f32.mrf.mxu3 }
 0x269   : > { %5761 = vmatpush.bf16.msrb.mxu1 %v7405_v25  ;;  %5728 = vmatpush.bf16.msra.mxu3 %v8781_v3  ;;  %v11596_v25 = vpop.f32.mrf.mxu0  ;;  %v9238_v3 = vld [vmem:[%s9987_s23 + $0x50c] sm:$0xf]  ;;  %v11603_v49 = vpop.f32.mrf.mxu1 }
 0x26a   : > { %v7885_v59 = vor.u32 %v9238_v3, %v7882_v16  ;;  %v9473_v16 = vld [vmem:[%s9987_s23 + $0xc64] sm:$0xf] }
 0x26b   : > { %5799 = vmatpush.bf16.msra.mxu0 %v7965_v8  ;;  %v8105_v8 = vor.u32 %v9293_v6, %v8102_v53  ;;  %v9423_v6 = vld [vmem:[%s9987_s23 + $0xad4] sm:$0xf]  ;;  %v8622_v53 = vld [vmem:[%s9987_s23 + $0xae4] sm:$0xf0] }
 0x26c   : > { %5762 = vmatmul.bf16.vlgmr.msrb.gmra.mxu1 %v10431_v20  ;;  %5769 = vmatpush.bf16.msrb.mxu2 %v7685_v51  ;;  %v8662_v51 = vld [vmem:[%s9987_s23 + $0xb34] sm:$0xf0] }
 0x26d   : > { %5810 = vmatpush.bf16.msra.mxu1 %v8185_v21  ;;  %5729 = vmatpush.bf16.msra.mxu3 %v8761_v26  ;;  %v9445_v21 = vld [vmem:[%s9987_s23 + $0xb80] sm:$0xf0]  ;;  %v9440_v26 = vld [vmem:[%s9987_s23 + $0xb58] sm:$0xf0]  ;;  %v8665_v27 = vor.u32 %v9433_v62, %v8662_v51  ;;  %v9223_v62 = vld [vmem:[%s9987_s23 + $0x494] sm:$0xf] }
 0x26e   : > { %v8701_v7 = vor.u32 %v9445_v21, %v8700_v9  ;;  %v8681_v29 = vor.u32 %v9440_v26, %v8680_v24  ;;  %v8342_v9 = vld [vmem:[%s9987_s23 + $0x8b4] sm:$0xf0]  ;;  %v9278_v21 = vld [vmem:[%s9987_s23 + $0x64c] sm:$0xf]  ;;  %v7822_v51 = vld [vmem:[%s9987_s23 + $0x4a4] sm:$0xf0] }
 0x26f   : > { %5800 = vmatpush.bf16.msra.mxu0 %v7945_v61  ;;  %v9163_v61 = vld [vmem:[%s9987_s23 + $0x2b4] sm:$0xf] }
 0x270   : > { %5770 = vmatpush.bf16.msrb.mxu2 %v7665_v32  ;;  %v11616_v32 = vpop.f32.mrf.mxu2  ;;  %v11623_v11 = vpop.f32.mrf.mxu3  ;;  %v7585_v22 = vor.u32 %v9163_v61, %v7582_v33  ;;  %v7825_v61 = vor.u32 %v9223_v62, %v7822_v51  ;;  %v8762_v62 = vld [vmem:[%s9987_s23 + $0xbfc] sm:$0xf0] }
 0x271   : > { %5811 = vmatpush.bf16.msra.mxu1 %v8165_v2  ;;  %5730 = vmatpush.bf16.msra.mxu3 %v8741_v31  ;;  %v8082_v2 = vld [vmem:[%s9987_s23 + $0x6ac] sm:$0xf0]  ;;  %v9283_v31 = vld [vmem:[%s9987_s23 + $0x674] sm:$0xf]  ;;  %v11635_v56 = vpop.f32.mrf.mxu0  ;;  %v11646_v43 = vpop.f32.mrf.mxu1 }
 0x272   : > { %v8085_v41 = vor.u32 %v9288_v4, %v8082_v2  ;;  %v8065_v40 = vor.u32 %v9283_v31, %v8062_v48  ;;  %v9413_v31 = vld [vmem:[%s9987_s23 + $0xa84] sm:$0xf]  ;;  %v8582_v48 = vld [vmem:[%s9987_s23 + $0xa94] sm:$0xf0] }
 0x273   : > { %5801 = vmatpush.bf16.msra.mxu0 %v7925_v44  ;;  %v7865_v44 = vor.u32 %v9233_v60, %v7862_v52  ;;  %v9468_v60 = vld [vmem:[%s9987_s23 + $0xc3c] sm:$0xf]  ;;  %v8802_v52 = vld [vmem:[%s9987_s23 + $0xc4c] sm:$0xf0] }
 0x274   : > { %5771 = vmatpush.bf16.msrb.mxu2 %v7645_v42 }
 0x275   : > { %5812 = vmatpush.bf16.msra.mxu1 %v8145_v15  ;;  %5731 = vmatpush.bf16.msra.mxu3 %v8721_v45  ;;  %v9428_v15 = vld [vmem:[%s9987_s23 + $0xafc] sm:$0xf]  ;;  %v9353_v45 = vld [vmem:[%s9987_s23 + $0x8a4] sm:$0xf] }
 0x276   : > { %v8645_v42 = vor.u32 %v9428_v15, %v8642_v39  ;;  %v8345_v4 = vor.u32 %v9353_v45, %v8342_v9  ;;  %v7802_v15 = vld [vmem:[%s9987_s23 + $0x47c] sm:$0xf0]  ;;  %v9213_v45 = vld [vmem:[%s9987_s23 + $0x444] sm:$0xf]  ;;  %v11696_v9 = vld [vmem:[%s11681_s22] sm:$0x1f] }
 0x277   : > { %5802 = vmatpush.bf16.msra.mxu0 %v7905_v36  ;;  %v5344_v36 = vadd.f32 %v11564_v19, %v11528_v28  ;;  %v7565_v28 = vor.u32 %v9158_v17, %v7562_v37  ;;  %v8625_v19 = vor.u32 %v9423_v6, %v8622_v53  ;;  %v8805_v17 = vor.u32 %v9468_v60, %v8802_v52  ;;  %v7782_v6 = vld [vmem:[%s9987_s23 + $0x454] sm:$0xf0]  ;;  %v9333_v52 = vld [vmem:[%s9987_s23 + $0x804] sm:$0xf] }
 0x278   : > { %5772 = vmatpush.bf16.msrb.mxu2 %v7625_v63  ;;  %v8042_v63 = vld [vmem:[%s9987_s23 + $0x65c] sm:$0xf0]  ;;  %v5401_v39 = vpop.f32.mrf.mxu3 }
 0x279   : > { %5813 = vmatpush.bf16.msra.mxu1 %v8125_v46  ;;  %5732 = vmatpush.bf16.msra.mxu3 %v8701_v7  ;;  %v7842_v46 = vld [vmem:[%s9987_s23 + $0x4cc] sm:$0xf0]  ;;  %v5358_v34 = vadd.f32 %v11539_v35, %v5344_v36  ;;  %v11653_v7 = vpop.f32.mrf.mxu2  ;;  %v8045_v2 = vor.u32 %v9278_v21, %v8042_v63  ;;  %v9418_v35 = vld [vmem:[%s9987_s23 + $0xaac] sm:$0xf]  ;;  %v11683_v37 = vpop.f32.mrf.mxu0 }
 0x27a   : > { %v7845_v3 = vor.u32 %v9228_v57, %v7842_v46  ;;  %v11693_v53 = vpop.f32.mrf.mxu1  ;;  %v8562_v21 = vld [vmem:[%s9987_s23 + $0xa6c] sm:$0xf0] }
 0x27b   : > { %5803 = vmatpush.bf16.msra.mxu0 %v7885_v59  ;;  %v8602_v59 = vld [vmem:[%s9987_s23 + $0xabc] sm:$0xf0]  ;;  %v5372_v24 = vadd.f32 %v11547_v55, %v5358_v34  ;;  %v9218_v55 = vld [vmem:[%s9987_s23 + $0x46c] sm:$0xf] }
 0x27c   : > { %5773 = vmatpush.bf16.msrb.mxu2 %v7605_v38  ;;  %v9348_v38 = vld [vmem:[%s9987_s23 + $0x87c] sm:$0xf]  ;;  %v8605_v33 = vor.u32 %v9418_v35, %v8602_v59  ;;  %v7762_v59 = vld [vmem:[%s9987_s23 + $0x42c] sm:$0xf0] }
 0x27d   : > { %5814 = vmatpush.bf16.msra.mxu1 %v8105_v8  ;;  %5733 = vmatpush.bf16.msra.mxu3 %v8681_v29  ;;  %v8822_v8 = vld [vmem:[%s9987_s23 + $0xc74] sm:$0xf0]  ;;  %v9208_v35 = vld [vmem:[%s9987_s23 + $0x41c] sm:$0xf] }
 0x27e   : > { %5804 = vmatmul.bf16.vlgmr.msra.gmra.mxu0 %v10802_v1  ;;  %v8825_v26 = vor.u32 %v9473_v16, %v8822_v8  ;;  %v9338_v16 = vld [vmem:[%s9987_s23 + $0x82c] sm:$0xf]  ;;  %v8282_v8 = vld [vmem:[%s9987_s23 + $0x83c] sm:$0xf0] }
 0x27f   : > { %5852 = vmatpush.bf16.msrb.mxu0 %v8665_v27  ;;  %v8322_v27 = vld [vmem:[%s9987_s23 + $0x88c] sm:$0xf0] }
 0x280   : > { %5774 = vmatpush.bf16.msrb.mxu2 %v7585_v22  ;;  %5734 = vmatmul.bf16.vlgmr.msra.gmra.mxu3 %v11324_v13  ;;  %v8325_v29 = vor.u32 %v9348_v38, %v8322_v27  ;;  %v9343_v22 = vld [vmem:[%s9987_s23 + $0x854] sm:$0xf]  ;;  %v8542_v27 = vld [vmem:[%s9987_s23 + $0xa44] sm:$0xf0] }
 0x281   : > { %5815 = vmatpush.bf16.msra.mxu1 %v8085_v41  ;;  %5782 = vmatpush.bf16.msrb.mxu3 %v7865_v44  ;;  %v5386_v41 = vadd.f32 %v11584_v10, %v5372_v24  ;;  %v5346_v44 = vadd.f32 %v11594_v50, %v11558_v23  ;;  %v7805_v23 = vor.u32 %v9218_v55, %v7802_v15  ;;  %v9463_v50 = vld [vmem:[%s9987_s23 + $0xc14] sm:$0xf]  ;;  %v5443_v34 = vpop.f32.mrf.mxu2  ;;  %v9453_v55 = vld [vmem:[%s9987_s23 + $0xbc4] sm:$0xf]  ;;  %v8742_v15 = vld [vmem:[%s9987_s23 + $0xbd4] sm:$0xf0] }
 0x282   : > { %v5455_v24 = vpop.f32.mrf.mxu3  ;;  %v9403_v38 = vld [vmem:[%s9987_s23 + $0xa34] sm:$0xf] }
 0x283   : > { %5853 = vmatpush.bf16.msrb.mxu0 %v8645_v42  ;;  %v5400_v10 = vadd.f32 %v11623_v11, %v5386_v41  ;;  %v8302_v42 = vld [vmem:[%s9987_s23 + $0x864] sm:$0xf0]  ;;  %v5360_v57 = vadd.f32 %v11571_v30, %v5346_v44  ;;  %v9408_v30 = vld [vmem:[%s9987_s23 + $0xa5c] sm:$0xf]  ;;  %v8262_v41 = vld [vmem:[%s9987_s23 + $0x814] sm:$0xf0] }
 0x284   : > { %5775 = vmatpush.bf16.msrb.mxu2 %v7565_v28  ;;  %v8782_v11 = vld [vmem:[%s9987_s23 + $0xc24] sm:$0xf0]  ;;  %v8305_v36 = vor.u32 %v9343_v22, %v8302_v42  ;;  %v9328_v22 = vld [vmem:[%s9987_s23 + $0x7dc] sm:$0xf]  ;;  %v9398_v42 = vld [vmem:[%s9987_s23 + $0xa0c] sm:$0xf] }
 0x285   : > { %5816 = vmatpush.bf16.msra.mxu1 %v8065_v40  ;;  %5783 = vmatpush.bf16.msrb.mxu3 %v7845_v3  ;;  %v5414_v46 = vadd.f32 %v11596_v25, %v5400_v10  ;;  %v8585_v40 = vor.u32 %v9413_v31, %v8582_v48  ;;  %v5374_v25 = vadd.f32 %v11578_v18, %v5360_v57  ;;  %v11709_v28 = vld [vmem:[%s11706_s14] sm:$0x1f]  ;;  %v9203_v48 = vld [vmem:[%s9987_s23 + $0x3f4] sm:$0xf]  ;;  %v11731_v10 = vpop.f32.mrf.mxu0  ;;  %v8242_v57 = vld [vmem:[%s9987_s23 + $0x7ec] sm:$0xf0] }
 0x286   : > { %v8785_v3 = vor.u32 %v9463_v50, %v8782_v11  ;;  %v7785_v18 = vor.u32 %v9213_v45, %v7782_v6  ;;  %v8545_v31 = vor.u32 %v9403_v38, %v8542_v27  ;;  %v7742_v44 = vld [vmem:[%s9987_s23 + $0x404] sm:$0xf0]  ;;  %v8745_v11 = vor.u32 %v9453_v55, %v8742_v15  ;;  %v11742_v45 = vpop.f32.mrf.mxu1  ;;  %v8482_v55 = vld [vmem:[%s9987_s23 + $0x9cc] sm:$0xf0] }
 0x287   : > { %5854 = vmatpush.bf16.msrb.mxu0 %v8625_v19  ;;  %5776 = vmatmul.bf16.vlgmr.msrb.gmra.mxu2 %v10664_v0  ;;  %v5428_v63 = vadd.f32 %v11603_v49, %v5414_v46  ;;  %v9458_v19 = vld [vmem:[%s9987_s23 + $0xbec] sm:$0xf]  ;;  %v5388_v49 = vadd.f32 %v11616_v32, %v5374_v25  ;;  %v7708_v46 = vld [vmem:[%s9987_s23 + $0x3a8] sm:$0xf]  ;;  %v7745_v6 = vor.u32 %v9203_v48, %v7742_v44  ;;  %v9116_v44 = vld [vmem:[%s9987_s23 + $0x138] sm:$0xf0] }
 0x288   : > { %5824 = vmatpush.bf16.msra.mxu2 %v8345_v4  ;;  %v6022_v4 = vperm.slane %v11696_v9, 0  ;;  %v8765_v60 = vor.u32 %v9458_v19, %v8762_v62  ;;  %v9198_v25 = vld [vmem:[%s9987_s23 + $0x3cc] sm:$0xf]  ;;  %v9393_v19 = vld [vmem:[%s9987_s23 + $0x9e4] sm:$0xf] }
 0x289   : > { %5817 = vmatpush.bf16.msra.mxu1 %v8045_v2  ;;  %5784 = vmatpush.bf16.msrb.mxu3 %v7825_v61  ;;  %v5442_v51 = vadd.f32 %v11653_v7, %v5428_v63  ;;  %v8565_v2 = vor.u32 %v9408_v30, %v8562_v21  ;;  %v5402_v32 = vadd.f32 %v5401_v39, %v5388_v49  ;;  %v6044_v61 = vperm.slane %v11709_v28, 0  ;;  %v8722_v30 = vld [vmem:[%s9987_s23 + $0xbac] sm:$0xf0]  ;;  %v7722_v63 = vld [vmem:[%s9987_s23 + $0x3dc] sm:$0xf0] }
 0x28a   : > { %v8502_v62 = vld [vmem:[%s9987_s23 + $0x9f4] sm:$0xf0]  ;;  %v8702_v38 = vld [vmem:[%s9987_s23 + $0xb84] sm:$0xf0] }
 0x28b   : > { %5855 = vmatpush.bf16.msrb.mxu0 %v8605_v33  ;;  %v5456_v7 = vadd.f32 %v5455_v24, %v5442_v51  ;;  %v7765_v33 = vor.u32 %v9208_v35, %v7762_v59  ;;  %v7688_v35 = vld [vmem:[%s9987_s23 + $0x380] sm:$0xf]  ;;  %v9191_v59 = vld [vmem:[%s9987_s23 + $0x390] sm:$0xf0]  ;;  %v7725_v24 = vor.u32 %v9198_v25, %v7722_v63 }
 0x28c   : > { %5818 = vmatmul.bf16.vlgmr.msra.gmra.mxu1 %v10932_v12  ;;  %5825 = vmatpush.bf16.msra.mxu2 %v8325_v29  ;;  %v5416_v29 = vadd.f32 %v11635_v56, %v5402_v32  ;;  %v8522_v56 = vld [vmem:[%s9987_s23 + $0xa1c] sm:$0xf0]  ;;  %v8505_v32 = vor.u32 %v9393_v19, %v8502_v62  ;;  %v9378_v62 = vld [vmem:[%s9987_s23 + $0x96c] sm:$0xf] }
 0x28d   : > { %5866 = vmatpush.bf16.msrb.mxu1 %v8825_v26  ;;  %5785 = vmatpush.bf16.msrb.mxu3 %v7805_v23  ;;  %v8285_v26 = vor.u32 %v9338_v16, %v8282_v8  ;;  %v6032_v39 = vmul.f32 %v6022_v4, %v5456_v7  ;;  %v8525_v21 = vor.u32 %v9398_v42, %v8522_v56  ;;  %v5457_v16 = vpop.f32.mrf.mxu3  ;;  %v9318_v7 = vld [vmem:[%s9987_s23 + $0x78c] sm:$0xf]  ;;  %v5525_v48 = vpop.f32.mrf.mxu0  ;;  %v7868_v56 = vld [vmem:[%s9987_s23 + $0x4e8] sm:$0xf]  ;;  %v7368_v63 = vld [vmem:[%s9987_s23 + $0x100] sm:$0xf] }
 0x28e   : > { %v5430_v23 = vadd.f32 %v11646_v43, %v5416_v29  ;;  %v8245_v8 = vor.u32 %v9328_v22, %v8242_v57  ;;  %v7388_v29 = vld [vmem:[%s9987_s23 + $0x128] sm:$0xf]  ;;  %v8682_v22 = vld [vmem:[%s9987_s23 + $0xb5c] sm:$0xf0]  ;;  %v5484_v42 = vadd.f32 %v11693_v53, %v11683_v37 }
 0x28f   : > { %5856 = vmatpush.bf16.msrb.mxu0 %v8585_v40  ;;  %v6054_v50 = vadd.f32 %v6044_v61, %v6032_v39  ;;  %v9196_v40 = vld [vmem:[%s9987_s23 + $0x3b8] sm:$0xf0]  ;;  %v7668_v39 = vld [vmem:[%s9987_s23 + $0x358] sm:$0xf]  ;;  %v7389_v53 = vor.u32 %v9116_v44, %v7388_v29  ;;  %v9171_v29 = vld [vmem:[%s9987_s23 + $0x2f0] sm:$0xf0] }
 0x290   : > { %5826 = vmatpush.bf16.msra.mxu2 %v8305_v36  ;;  %v9448_v36 = vld [vmem:[%s9987_s23 + $0xb9c] sm:$0xf]  ;;  %v5444_v43 = vadd.f32 %v5443_v34, %v5430_v23  ;;  %v9323_v34 = vld [vmem:[%s9987_s23 + $0x7b4] sm:$0xf]  ;;  %v9101_v44 = vld [vmem:[%s9987_s23 + $0xc0] sm:$0xf0] }
 0x291   : > { %5867 = vmatpush.bf16.msrb.mxu1 %v8805_v17  ;;  %5786 = vmatpush.bf16.msrb.mxu3 %v7785_v18  ;;  %v8265_v17 = vor.u32 %v9333_v52, %v8262_v41  ;;  %6064 = vst [vmem:[%s11748_s18] sm:$0xff] %v6054_v50  ;;  %v7709_v18 = vor.u32 %v9196_v40, %v7708_v46  ;;  %v8202_v41 = vld [vmem:[%s9987_s23 + $0x79c] sm:$0xf0]  ;;  %v9236_v23 = vld [vmem:[%s9987_s23 + $0x4f8] sm:$0xf0]  ;;  %v11781_v50 = vpop.f32.mrf.mxu1  ;;  %v9383_v40 = vld [vmem:[%s9987_s23 + $0x994] sm:$0xf] }
 0x292   : > { %v5458_v49 = vadd.f32 %v5457_v16, %v5444_v43  ;;  %v8725_v51 = vor.u32 %v9448_v36, %v8722_v30  ;;  %v7689_v52 = vor.u32 %v9191_v59, %v7688_v35  ;;  %v8205_v57 = vor.u32 %v9318_v7, %v8202_v41  ;;  %v7648_v30 = vld [vmem:[%s9987_s23 + $0x330] sm:$0xf]  ;;  %v9181_v43 = vld [vmem:[%s9987_s23 + $0x340] sm:$0xf0]  ;;  %v9111_v16 = vld [vmem:[%s9987_s23 + $0x110] sm:$0xf0] }
 0x293   : > { %5857 = vmatpush.bf16.msrb.mxu0 %v8565_v2  ;;  %v8222_v2 = vld [vmem:[%s9987_s23 + $0x7c4] sm:$0xf0]  ;;  %v7869_v25 = vor.u32 %v9236_v23, %v7868_v56  ;;  %v7649_v19 = vor.u32 %v9181_v43, %v7648_v30  ;;  %v9176_v35 = vld [vmem:[%s9987_s23 + $0x318] sm:$0xf0]  ;;  %v7828_v7 = vld [vmem:[%s9987_s23 + $0x498] sm:$0xf] }
 0x294   : > { %5827 = vmatpush.bf16.msra.mxu2 %v8285_v26  ;;  %v9443_v26 = vld [vmem:[%s9987_s23 + $0xb74] sm:$0xf]  ;;  %v6037_v27 = vmul.f32 %v6022_v4, %v5458_v49  ;;  %v8442_v49 = vld [vmem:[%s9987_s23 + $0x97c] sm:$0xf0]  ;;  %v9221_v56 = vld [vmem:[%s9987_s23 + $0x480] sm:$0xf0] }
 0x295   : > { %5868 = vmatpush.bf16.msrb.mxu1 %v8785_v3  ;;  %5787 = vmatpush.bf16.msrb.mxu3 %v7765_v33  ;;  %v5497_v3 = vpop.f32.mrf.mxu2  ;;  %v9388_v33 = vld [vmem:[%s9987_s23 + $0x9bc] sm:$0xf]  ;;  %v8705_v4 = vor.u32 %v9443_v26, %v8702_v38  ;;  %v9106_v26 = vld [vmem:[%s9987_s23 + $0xe8] sm:$0xf0]  ;;  %v5486_v38 = vadd.f32 %v11742_v45, %v11731_v10  ;;  %v8422_v10 = vld [vmem:[%s9987_s23 + $0x954] sm:$0xf0] }
 0x296   : > { %v6059_v15 = vadd.f32 %v6044_v61, %v6037_v27  ;;  %v8485_v61 = vor.u32 %v9388_v33, %v8482_v55  ;;  %v5498_v37 = vadd.f32 %v5497_v3, %v5484_v42  ;;  %v7848_v3 = vld [vmem:[%s9987_s23 + $0x4c0] sm:$0xf]  ;;  %v9373_v55 = vld [vmem:[%s9987_s23 + $0x944] sm:$0xf]  ;;  %v9096_v30 = vld [vmem:[%s9987_s23 + $0x98] sm:$0xf0] }
 0x297   : > { %5858 = vmatpush.bf16.msrb.mxu0 %v8545_v31  ;;  %v9186_v31 = vld [vmem:[%s9987_s23 + $0x368] sm:$0xf0] }
 0x298   : > { %5828 = vmatpush.bf16.msra.mxu2 %v8265_v17  ;;  %v9438_v17 = vld [vmem:[%s9987_s23 + $0xb4c] sm:$0xf]  ;;  %6069 = vst [vmem:[%s11748_s18 + $0x28] sm:$0xff] %v6059_v15  ;;  %v7669_v46 = vor.u32 %v9186_v31, %v7668_v39 }
 0x299   : > { %5869 = vmatpush.bf16.msrb.mxu1 %v8765_v60  ;;  %5788 = vmatpush.bf16.msrb.mxu3 %v7745_v6  ;;  %v8225_v60 = vor.u32 %v9323_v34, %v8222_v2  ;;  %v8462_v6 = vld [vmem:[%s9987_s23 + $0x9a4] sm:$0xf0]  ;;  %v8685_v36 = vor.u32 %v9438_v17, %v8682_v22  ;;  %v9231_v34 = vld [vmem:[%s9987_s23 + $0x4d0] sm:$0xf0]  ;;  %v5541_v39 = vpop.f32.mrf.mxu1  ;;  %v8425_v22 = vor.u32 %v9373_v55, %v8422_v10  ;;  %v9358_v10 = vld [vmem:[%s9987_s23 + $0x8cc] sm:$0xf] }
 0x29a   : > { %v7628_v2 = vld [vmem:[%s9987_s23 + $0x308] sm:$0xf]  ;;  %v7849_v59 = vor.u32 %v9231_v34, %v7848_v3  ;;  %v9363_v34 = vld [vmem:[%s9987_s23 + $0x8f4] sm:$0xf] }
 0x29b   : > { %5859 = vmatpush.bf16.msrb.mxu0 %v8525_v21  ;;  %v7629_v33 = vor.u32 %v9176_v35, %v7628_v2  ;;  %v7568_v2 = vld [vmem:[%s9987_s23 + $0x290] sm:$0xf]  ;;  %v9161_v35 = vld [vmem:[%s9987_s23 + $0x2a0] sm:$0xf0] }
 0x29c   : > { %5829 = vmatpush.bf16.msra.mxu2 %v8245_v8  ;;  %v7569_v55 = vor.u32 %v9161_v35, %v7568_v2 }
 0x29d   : > { %5870 = vmatpush.bf16.msrb.mxu1 %v8745_v11  ;;  %5789 = vmatpush.bf16.msrb.mxu3 %v7725_v24  ;;  %v5511_v11 = vpop.f32.mrf.mxu3  ;;  %v5499_v21 = vpop.f32.mrf.mxu2  ;;  %v7348_v24 = vld [vmem:[%s9987_s23 + $0xd8] sm:$0xf] }
 0x29e   : > { %5860 = vmatmul.bf16.vlgmr.msrb.gmra.mxu0 %v11251_v54  ;;  %v5512_v8 = vadd.f32 %v5511_v11, %v5498_v37  ;;  %v5500_v45 = vadd.f32 %v5499_v21, %v5486_v38  ;;  %v7349_v15 = vor.u32 %v9106_v26, %v7348_v24  ;;  %v9166_v37 = vld [vmem:[%s9987_s23 + $0x2c8] sm:$0xf0]  ;;  %v9091_v26 = vld [vmem:[%s9987_s23 + $0x70] sm:$0xf0]  ;;  %v8348_v38 = vld [vmem:[%s9987_s23 + $0x8a8] sm:$0xf] }
 0x29f   : > { %5908 = vmatpush.bf16.msra.mxu0 %v7709_v18  ;;  %v8465_v18 = vor.u32 %v9383_v40, %v8462_v6  ;;  %v7588_v6 = vld [vmem:[%s9987_s23 + $0x2b8] sm:$0xf] }
 0x2a0   : > { %5830 = vmatpush.bf16.msra.mxu2 %v8225_v60  ;;  %5790 = vmatmul.bf16.vlgmr.msrb.gmra.mxu3 %v10685_v58  ;;  %v5526_v27 = vadd.f32 %v5525_v48, %v5512_v8  ;;  %v9226_v60 = vld [vmem:[%s9987_s23 + $0x4a8] sm:$0xf0]  ;;  %v7328_v48 = vld [vmem:[%s9987_s23 + $0xb0] sm:$0xf]  ;;  %v7589_v3 = vor.u32 %v9166_v37, %v7588_v6 }
 0x2a1   : > { %5871 = vmatpush.bf16.msrb.mxu1 %v8725_v51  ;;  %5838 = vmatpush.bf16.msra.mxu3 %v8505_v32  ;;  %v7369_v51 = vor.u32 %v9111_v16, %v7368_v63  ;;  %v8445_v32 = vor.u32 %v9378_v62, %v8442_v49  ;;  %v7829_v31 = vor.u32 %v9226_v60, %v7828_v7  ;;  %v9216_v63 = vld [vmem:[%s9987_s23 + $0x458] sm:$0xf0]  ;;  %v6045_v7 = vperm.slane %v11709_v28, 1 }
 0x2a2   : > { %v5540_v42 = vadd.f32 %v11781_v50, %v5526_v27  ;;  %v7329_v40 = vor.u32 %v9101_v44, %v7328_v48  ;;  %v9356_v27 = vld [vmem:[%s9987_s23 + $0x8b8] sm:$0xf0]  ;;  %v9086_v48 = vld [vmem:[%s9987_s23 + $0x48] sm:$0xf0]  ;;  %v7548_v44 = vld [vmem:[%s9987_s23 + $0x268] sm:$0xf] }
 0x2a3   : > { %5909 = vmatpush.bf16.msra.mxu0 %v7689_v52  ;;  %v5527_v52 = vpop.f32.mrf.mxu0 }
 0x2a4   : > { %5831 = vmatpush.bf16.msra.mxu2 %v8205_v57  ;;  %v9368_v57 = vld [vmem:[%s9987_s23 + $0x91c] sm:$0xf] }
 0x2a5   : > { %5872 = vmatpush.bf16.msrb.mxu1 %v8705_v4  ;;  %5839 = vmatpush.bf16.msra.mxu3 %v8485_v61  ;;  %v5513_v41 = vpop.f32.mrf.mxu3  ;;  %v7608_v4 = vld [vmem:[%s9987_s23 + $0x2e0] sm:$0xf]  ;;  %v7808_v61 = vld [vmem:[%s9987_s23 + $0x470] sm:$0xf]  ;;  %v5553_v23 = vpop.f32.mrf.mxu2 }
 0x2a6   : > { %v5514_v17 = vadd.f32 %v5513_v41, %v5500_v45  ;;  %v7609_v11 = vor.u32 %v9171_v29, %v7608_v4  ;;  %v5554_v43 = vadd.f32 %v5553_v23, %v5540_v42  ;;  %v7768_v41 = vld [vmem:[%s9987_s23 + $0x420] sm:$0xf] }
 0x2a7   : > { %5910 = vmatpush.bf16.msra.mxu0 %v7669_v46  ;;  %5832 = vmatmul.bf16.vlgmr.msra.gmra.mxu2 %v11090_v47  ;;  %v8402_v46 = vld [vmem:[%s9987_s23 + $0x92c] sm:$0xf0]  ;;  %v8362_v45 = vld [vmem:[%s9987_s23 + $0x8dc] sm:$0xf0] }
 0x2a8   : > { %5880 = vmatpush.bf16.msrb.mxu2 %v7389_v53  ;;  %v7809_v53 = vor.u32 %v9221_v56, %v7808_v61  ;;  %v5528_v50 = vadd.f32 %v5527_v52, %v5514_v17  ;;  %v8405_v21 = vor.u32 %v9368_v57, %v8402_v46  ;;  %v9156_v17 = vld [vmem:[%s9987_s23 + $0x278] sm:$0xf0]  ;;  %v8328_v42 = vld [vmem:[%s9987_s23 + $0x880] sm:$0xf]  ;;  %v9351_v61 = vld [vmem:[%s9987_s23 + $0x890] sm:$0xf0] }
 0x2a9   : > { %5873 = vmatpush.bf16.msrb.mxu1 %v8685_v36  ;;  %5840 = vmatpush.bf16.msra.mxu3 %v8465_v18  ;;  %v7308_v36 = vld [vmem:[%s9987_s23 + $0x88] sm:$0xf]  ;;  %v6023_v18 = vperm.slane %v11696_v9, 1  ;;  %v7748_v57 = vld [vmem:[%s9987_s23 + $0x3f8] sm:$0xf]  ;;  %v7549_v37 = vor.u32 %v9156_v17, %v7548_v44 }
 0x2aa   : > { %v7309_v49 = vor.u32 %v9096_v30, %v7308_v36  ;;  %v5542_v52 = vadd.f32 %v5541_v39, %v5528_v50  ;;  %v9206_v46 = vld [vmem:[%s9987_s23 + $0x408] sm:$0xf0]  ;;  %v9081_v36 = vld [vmem:[%s9987_s23 + $0x20] sm:$0xf0]  ;;  %v7488_v9 = vld [vmem:[%s9987_s23 + $0x1f0] sm:$0xf] }
 0x2ab   : > { %5911 = vmatpush.bf16.msra.mxu0 %v7649_v19  ;;  %v5581_v16 = vpop.f32.mrf.mxu0  ;;  %v8382_v19 = vld [vmem:[%s9987_s23 + $0x904] sm:$0xf0] }
 0x2ac   : > { %5874 = vmatmul.bf16.vlgmr.msrb.gmra.mxu1 %v11324_v13  ;;  %5881 = vmatpush.bf16.msrb.mxu2 %v7369_v51  ;;  %v7288_v51 = vld [vmem:[%s9987_s23 + $0x60] sm:$0xf]  ;;  %v8385_v60 = vor.u32 %v9363_v34, %v8382_v19  ;;  %v8308_v34 = vld [vmem:[%s9987_s23 + $0x858] sm:$0xf]  ;;  %v9346_v19 = vld [vmem:[%s9987_s23 + $0x868] sm:$0xf0] }
 0x2ad   : > { %5922 = vmatpush.bf16.msra.mxu1 %v7869_v25  ;;  %5841 = vmatpush.bf16.msra.mxu3 %v8445_v32  ;;  %v7788_v25 = vld [vmem:[%s9987_s23 + $0x448] sm:$0xf]  ;;  %v5567_v8 = vpop.f32.mrf.mxu3  ;;  %v7289_v29 = vor.u32 %v9091_v26, %v7288_v51  ;;  %v5555_v39 = vpop.f32.mrf.mxu2  ;;  %v9201_v51 = vld [vmem:[%s9987_s23 + $0x3e0] sm:$0xf0] }
 0x2ae   : > { %v5568_v62 = vadd.f32 %v5567_v8, %v5554_v43  ;;  %v7789_v24 = vor.u32 %v9216_v63, %v7788_v25  ;;  %v5556_v23 = vadd.f32 %v5555_v39, %v5542_v52  ;;  %v8329_v43 = vor.u32 %v9351_v61, %v8328_v42  ;;  %v9151_v25 = vld [vmem:[%s9987_s23 + $0x250] sm:$0xf0]  ;;  %v8028_v63 = vld [vmem:[%s9987_s23 + $0x628] sm:$0xf]  ;;  %v9266_v42 = vld [vmem:[%s9987_s23 + $0x5e8] sm:$0xf0] }
 0x2af   : > { %5912 = vmatpush.bf16.msra.mxu0 %v7629_v33  ;;  %v9211_v33 = vld [vmem:[%s9987_s23 + $0x430] sm:$0xf0]  ;;  %v7749_v8 = vor.u32 %v9206_v46, %v7748_v57  ;;  %v8268_v39 = vld [vmem:[%s9987_s23 + $0x808] sm:$0xf]  ;;  %v9136_v46 = vld [vmem:[%s9987_s23 + $0x1d8] sm:$0xf0] }
 0x2b0   : > { %5882 = vmatpush.bf16.msrb.mxu2 %v7349_v15  ;;  %v5582_v32 = vadd.f32 %v5581_v16, %v5568_v62  ;;  %v7268_v15 = vld [vmem:[%s9987_s23 + $0x38] sm:$0xf]  ;;  %v7468_v57 = vld [vmem:[%s9987_s23 + $0x1c8] sm:$0xf] }
 0x2b1   : > { %5923 = vmatpush.bf16.msra.mxu1 %v7849_v59  ;;  %5842 = vmatpush.bf16.msra.mxu3 %v8425_v22  ;;  %v5595_v59 = vpop.f32.mrf.mxu1  ;;  %v7769_v22 = vor.u32 %v9211_v33, %v7768_v41  ;;  %v7269_v6 = vor.u32 %v9086_v48, %v7268_v15  ;;  %v8288_v41 = vld [vmem:[%s9987_s23 + $0x830] sm:$0xf]  ;;  %v9341_v33 = vld [vmem:[%s9987_s23 + $0x840] sm:$0xf0]  ;;  %v9271_v15 = vld [vmem:[%s9987_s23 + $0x610] sm:$0xf0] }
 0x2b2   : > { %v5596_v4 = vadd.f32 %v5595_v59, %v5582_v32  ;;  %v8508_v59 = vld [vmem:[%s9987_s23 + $0x9e8] sm:$0xf]  ;;  %v7508_v32 = vld [vmem:[%s9987_s23 + $0x218] sm:$0xf]  ;;  %v8289_v44 = vor.u32 %v9341_v33, %v8288_v41  ;;  %v9371_v41 = vld [vmem:[%s9987_s23 + $0x930] sm:$0xf0] }
 0x2b3   : > { %5913 = vmatpush.bf16.msra.mxu0 %v7609_v11  ;;  %v8365_v11 = vor.u32 %v9358_v10, %v8362_v45  ;;  %v5583_v16 = vpop.f32.mrf.mxu0  ;;  %v8008_v45 = vld [vmem:[%s9987_s23 + $0x600] sm:$0xf] }
 0x2b4   : > { %5883 = vmatpush.bf16.msrb.mxu2 %v7329_v40  ;;  %v6033_v56 = vmul.f32 %v6023_v18, %v5596_v4  ;;  %v8009_v17 = vor.u32 %v9271_v15, %v8008_v45  ;;  %v8188_v15 = vld [vmem:[%s9987_s23 + $0x768] sm:$0xf] }
 0x2b5   : > { %5924 = vmatpush.bf16.msra.mxu1 %v7829_v31  ;;  %5843 = vmatpush.bf16.msra.mxu3 %v8405_v21  ;;  %v8349_v31 = vor.u32 %v9356_v27, %v8348_v38  ;;  %v5569_v40 = vpop.f32.mrf.mxu3  ;;  %v7528_v21 = vld [vmem:[%s9987_s23 + $0x240] sm:$0xf]  ;;  %v8309_v27 = vor.u32 %v9346_v19, %v8308_v34  ;;  %v7948_v34 = vld [vmem:[%s9987_s23 + $0x588] sm:$0xf]  ;;  %v9256_v19 = vld [vmem:[%s9987_s23 + $0x598] sm:$0xf0] }
 0x2b6   : > { %v6055_v30 = vadd.f32 %v6045_v7, %v6033_v56  ;;  %v5570_v50 = vadd.f32 %v5569_v40, %v5556_v23  ;;  %v7529_v35 = vor.u32 %v9151_v25, %v7528_v21  ;;  %v8468_v56 = vld [vmem:[%s9987_s23 + $0x998] sm:$0xf]  ;;  %v9386_v23 = vld [vmem:[%s9987_s23 + $0x9a8] sm:$0xf0]  ;;  %v7448_v21 = vld [vmem:[%s9987_s23 + $0x1a0] sm:$0xf] }
 0x2b7   : > { %5914 = vmatpush.bf16.msra.mxu0 %v7589_v3  ;;  %v9276_v3 = vld [vmem:[%s9987_s23 + $0x638] sm:$0xf0]  ;;  %v9131_v25 = vld [vmem:[%s9987_s23 + $0x1b0] sm:$0xf0] }
 0x2b8   : > { %5884 = vmatpush.bf16.msrb.mxu2 %v7309_v49  ;;  %6065 = vst [vmem:[%s11748_s18 + $0x8] sm:$0xff] %v6055_v30  ;;  %v5584_v62 = vadd.f32 %v5583_v16, %v5570_v50  ;;  %v7728_v49 = vld [vmem:[%s9987_s23 + $0x3d0] sm:$0xf]  ;;  %v9381_v50 = vld [vmem:[%s9987_s23 + $0x980] sm:$0xf0] }
 0x2b9   : > { %5925 = vmatpush.bf16.msra.mxu1 %v7809_v53  ;;  %5844 = vmatpush.bf16.msra.mxu3 %v8385_v60  ;;  %v7248_v53 = vld [vmem:[%s9987_s23 + $0x10] sm:$0xf]  ;;  %v5597_v2 = vpop.f32.mrf.mxu1  ;;  %v8029_v60 = vor.u32 %v9276_v3, %v8028_v63  ;;  %v7729_v52 = vor.u32 %v9201_v51, %v7728_v49  ;;  %v8228_v16 = vld [vmem:[%s9987_s23 + $0x7b8] sm:$0xf]  ;;  %v8428_v49 = vld [vmem:[%s9987_s23 + $0x948] sm:$0xf] }
 0x2ba   : > { %v5598_v26 = vadd.f32 %v5597_v2, %v5584_v62  ;;  %v7249_v38 = vor.u32 %v9081_v36, %v7248_v53  ;;  %v7968_v53 = vld [vmem:[%s9987_s23 + $0x5b0] sm:$0xf]  ;;  %v9261_v36 = vld [vmem:[%s9987_s23 + $0x5c0] sm:$0xf0]  ;;  %v7449_v62 = vor.u32 %v9131_v25, %v7448_v21  ;;  %v9376_v51 = vld [vmem:[%s9987_s23 + $0x958] sm:$0xf0] }
 0x2bb   : > { %5915 = vmatpush.bf16.msra.mxu0 %v7569_v55  ;;  %v8448_v30 = vld [vmem:[%s9987_s23 + $0x970] sm:$0xf]  ;;  %v7969_v63 = vor.u32 %v9261_v36, %v7968_v53  ;;  %v8648_v36 = vld [vmem:[%s9987_s23 + $0xb00] sm:$0xf]  ;;  %v8628_v25 = vld [vmem:[%s9987_s23 + $0xad8] sm:$0xf] }
 0x2bc   : > { %5885 = vmatpush.bf16.msrb.mxu2 %v7289_v29  ;;  %v6038_v55 = vmul.f32 %v6023_v18, %v5598_v26  ;;  %v8488_v29 = vld [vmem:[%s9987_s23 + $0x9c0] sm:$0xf]  ;;  %v9141_v18 = vld [vmem:[%s9987_s23 + $0x200] sm:$0xf0]  ;;  %v8449_v3 = vor.u32 %v9381_v50, %v8448_v30  ;;  %v8208_v26 = vld [vmem:[%s9987_s23 + $0x790] sm:$0xf] }
 0x2bd   : > { %5926 = vmatpush.bf16.msra.mxu1 %v7789_v24  ;;  %5845 = vmatpush.bf16.msra.mxu3 %v8365_v11  ;;  %v9396_v24 = vld [vmem:[%s9987_s23 + $0x9f8] sm:$0xf0]  ;;  %v7489_v61 = vor.u32 %v9141_v18, %v7488_v9  ;;  %v8388_v9 = vld [vmem:[%s9987_s23 + $0x8f8] sm:$0xf]  ;;  %v9366_v18 = vld [vmem:[%s9987_s23 + $0x908] sm:$0xf0] }
 0x2be   : > { %5916 = vmatmul.bf16.vlgmr.msra.gmra.mxu0 %v10664_v0  ;;  %v9146_v0 = vld [vmem:[%s9987_s23 + $0x228] sm:$0xf0]  ;;  %v8509_v10 = vor.u32 %v9396_v24, %v8508_v59  ;;  %v6060_v48 = vadd.f32 %v6045_v7, %v6038_v55  ;;  %v7988_v7 = vld [vmem:[%s9987_s23 + $0x5d8] sm:$0xf]  ;;  %v7949_v24 = vor.u32 %v9256_v19, %v7948_v34  ;;  %v7408_v55 = vld [vmem:[%s9987_s23 + $0x150] sm:$0xf] }
 0x2bf   : > { %5964 = vmatpush.bf16.msrb.mxu0 %v8349_v31  ;;  %v7509_v4 = vor.u32 %v9146_v0, %v7508_v32  ;;  %v9391_v31 = vld [vmem:[%s9987_s23 + $0x9d0] sm:$0xf0]  ;;  %v7989_v40 = vor.u32 %v9266_v42, %v7988_v7  ;;  %v9126_v59 = vld [vmem:[%s9987_s23 + $0x188] sm:$0xf0]  ;;  %v7928_v32 = vld [vmem:[%s9987_s23 + $0x560] sm:$0xf]  ;;  %v8389_v7 = vor.u32 %v9366_v18, %v8388_v9 }
 0x2c0   : > { %5886 = vmatpush.bf16.msrb.mxu2 %v7269_v6  ;;  %5846 = vmatmul.bf16.vlgmr.msra.gmra.mxu3 %v11150_v14  ;;  %6070 = vst [vmem:[%s11748_s18 + $0x30] sm:$0xff] %v6060_v48  ;;  %v8489_v28 = vor.u32 %v9391_v31, %v8488_v29  ;;  %v8248_v6 = vld [vmem:[%s9987_s23 + $0x7e0] sm:$0xf]  ;;  %v9251_v0 = vld [vmem:[%s9987_s23 + $0x570] sm:$0xf0] }
 0x2c1   : > { %5927 = vmatpush.bf16.msra.mxu1 %v7769_v22  ;;  %5894 = vmatpush.bf16.msrb.mxu3 %v7549_v37  ;;  %v9336_v22 = vld [vmem:[%s9987_s23 + $0x818] sm:$0xf0]  ;;  %v8469_v37 = vor.u32 %v9386_v23, %v8468_v56  ;;  %v7929_v45 = vor.u32 %v9251_v0, %v7928_v32  ;;  %v7908_v31 = vld [vmem:[%s9987_s23 + $0x538] sm:$0xf]  ;;  %v9246_v48 = vld [vmem:[%s9987_s23 + $0x548] sm:$0xf0] }
 0x2c2   : > { %v8269_v11 = vor.u32 %v9336_v22, %v8268_v39  ;;  %v7909_v39 = vor.u32 %v9246_v48, %v7908_v31  ;;  %v8168_v22 = vld [vmem:[%s9987_s23 + $0x740] sm:$0xf]  ;;  %v7888_v42 = vld [vmem:[%s9987_s23 + $0x510] sm:$0xf]  ;;  %v8668_v56 = vld [vmem:[%s9987_s23 + $0xb28] sm:$0xf] }
 0x2c3   : > { %5965 = vmatpush.bf16.msrb.mxu0 %v8329_v43  ;;  %v9436_v23 = vld [vmem:[%s9987_s23 + $0xb38] sm:$0xf0]  ;;  %v8128_v30 = vld [vmem:[%s9987_s23 + $0x6f0] sm:$0xf]  ;;  %v9301_v50 = vld [vmem:[%s9987_s23 + $0x700] sm:$0xf0] }
 0x2c4   : > { %5887 = vmatpush.bf16.msrb.mxu2 %v7249_v38  ;;  %v9321_v38 = vld [vmem:[%s9987_s23 + $0x7a0] sm:$0xf0]  ;;  %v8608_v19 = vld [vmem:[%s9987_s23 + $0xab0] sm:$0xf]  ;;  %v8548_v48 = vld [vmem:[%s9987_s23 + $0xa38] sm:$0xf] }
 0x2c5   : > { %5928 = vmatpush.bf16.msra.mxu1 %v7749_v8  ;;  %5895 = vmatpush.bf16.msrb.mxu3 %v7529_v35  ;;  %v9326_v8 = vld [vmem:[%s9987_s23 + $0x7c8] sm:$0xf0]  ;;  %v7428_v35 = vld [vmem:[%s9987_s23 + $0x178] sm:$0xf]  ;;  %v8209_v33 = vor.u32 %v9321_v38, %v8208_v26 }
 0x2c6   : > { %v8229_v2 = vor.u32 %v9326_v8, %v8228_v16  ;;  %v8108_v16 = vld [vmem:[%s9987_s23 + $0x6c8] sm:$0xf]  ;;  %v9296_v8 = vld [vmem:[%s9987_s23 + $0x6d8] sm:$0xf0]  ;;  %v8068_v38 = vld [vmem:[%s9987_s23 + $0x678] sm:$0xf] }
 0x2c7   : > { %5966 = vmatpush.bf16.msrb.mxu0 %v8309_v27  ;;  %5888 = vmatmul.bf16.vlgmr.msrb.gmra.mxu2 %v10429_v5  ;;  %v9331_v5 = vld [vmem:[%s9987_s23 + $0x7f0] sm:$0xf0]  ;;  %v8429_v27 = vor.u32 %v9376_v51, %v8428_v49  ;;  %v8109_v49 = vor.u32 %v9296_v8, %v8108_v16  ;;  %v8088_v51 = vld [vmem:[%s9987_s23 + $0x6a0] sm:$0xf]  ;;  %v8748_v16 = vld [vmem:[%s9987_s23 + $0xbc8] sm:$0xf] }
 0x2c8   : > { %5936 = vmatpush.bf16.msra.mxu2 %v8029_v60  ;;  %v8249_v43 = vor.u32 %v9331_v5, %v8248_v6  ;;  %v7429_v60 = vor.u32 %v9126_v59, %v7428_v35  ;;  %v8148_v6 = vld [vmem:[%s9987_s23 + $0x718] sm:$0xf]  ;;  %v9306_v5 = vld [vmem:[%s9987_s23 + $0x728] sm:$0xf0]  ;;  %v8588_v35 = vld [vmem:[%s9987_s23 + $0xa88] sm:$0xf] }
 0x2c9   : > { %5929 = vmatpush.bf16.msra.mxu1 %v7729_v52  ;;  %5896 = vmatpush.bf16.msrb.mxu3 %v7509_v4  ;;  %v8408_v52 = vld [vmem:[%s9987_s23 + $0x920] sm:$0xf]  ;;  %v9316_v4 = vld [vmem:[%s9987_s23 + $0x778] sm:$0xf0] }
 0x2ca   : > { %v8409_v29 = vor.u32 %v9371_v41, %v8408_v52  ;;  %v9416_v59 = vld [vmem:[%s9987_s23 + $0xa98] sm:$0xf0]  ;;  %v9411_v52 = vld [vmem:[%s9987_s23 + $0xa70] sm:$0xf0]  ;;  %v5651_v41 = vpop.f32.mrf.mxu1 }
 0x2cb   : > { %5967 = vmatpush.bf16.msrb.mxu0 %v8289_v44  ;;  %v8589_v32 = vor.u32 %v9416_v59, %v8588_v35  ;;  %v9456_v8 = vld [vmem:[%s9987_s23 + $0xbd8] sm:$0xf0]  ;;  %v11970_v59 = vld [vmem:[%s11681_s22] sm:$0x1f] }
 0x2cc   : > { %5930 = vmatmul.bf16.vlgmr.msra.gmra.mxu1 %v10685_v58  ;;  %5937 = vmatpush.bf16.msra.mxu2 %v8009_v17  ;;  %v7469_v58 = vor.u32 %v9136_v46, %v7468_v57  ;;  %v8189_v17 = vor.u32 %v9316_v4, %v8188_v15  ;;  %v9361_v57 = vld [vmem:[%s9987_s23 + $0x8e0] sm:$0xf0]  ;;  %v8828_v4 = vld [vmem:[%s9987_s23 + $0xc68] sm:$0xf] }
 0x2cd   : > { %5978 = vmatpush.bf16.msrb.mxu1 %v8509_v10  ;;  %5897 = vmatpush.bf16.msrb.mxu3 %v7489_v61  ;;  %v9121_v10 = vld [vmem:[%s9987_s23 + $0x160] sm:$0xf0] }
 0x2ce   : > { %v7409_v44 = vor.u32 %v9121_v10, %v7408_v55  ;;  %v9241_v61 = vld [vmem:[%s9987_s23 + $0x520] sm:$0xf0]  ;;  %v8048_v10 = vld [vmem:[%s9987_s23 + $0x650] sm:$0xf] }
 0x2cf   : > { %5968 = vmatpush.bf16.msrb.mxu0 %v8269_v11  ;;  %v8368_v11 = vld [vmem:[%s9987_s23 + $0x8d0] sm:$0xf] }
 0x2d0   : > { %5938 = vmatpush.bf16.msra.mxu2 %v7989_v40  ;;  %v7889_v40 = vor.u32 %v9241_v61, %v7888_v42  ;;  %v8369_v53 = vor.u32 %v9361_v57, %v8368_v11 }
 0x2d1   : > { %5979 = vmatpush.bf16.msrb.mxu1 %v8489_v28  ;;  %5898 = vmatpush.bf16.msrb.mxu3 %v7469_v58  ;;  %v9311_v28 = vld [vmem:[%s9987_s23 + $0x750] sm:$0xf0]  ;;  %v8149_v58 = vor.u32 %v9306_v5, %v8148_v6  ;;  %v8788_v6 = vld [vmem:[%s9987_s23 + $0xc18] sm:$0xf]  ;;  %v9466_v5 = vld [vmem:[%s9987_s23 + $0xc28] sm:$0xf0] }
 0x2d2   : > { %v8169_v46 = vor.u32 %v9311_v28, %v8168_v22  ;;  %v8808_v28 = vld [vmem:[%s9987_s23 + $0xc40] sm:$0xf] }
 0x2d3   : > { %5969 = vmatpush.bf16.msrb.mxu0 %v8249_v43  ;;  %v5609_v43 = vpop.f32.mrf.mxu2 }
 0x2d4   : > { %5939 = vmatpush.bf16.msra.mxu2 %v7969_v63  ;;  %v8129_v63 = vor.u32 %v9301_v50, %v8128_v30  ;;  %v8768_v50 = vld [vmem:[%s9987_s23 + $0xbf0] sm:$0xf] }
 0x2d5   : > { %5980 = vmatpush.bf16.msrb.mxu1 %v8469_v37  ;;  %5899 = vmatpush.bf16.msrb.mxu3 %v7449_v62  ;;  %v8669_v37 = vor.u32 %v9436_v23, %v8668_v56  ;;  %v9421_v62 = vld [vmem:[%s9987_s23 + $0xac0] sm:$0xf0]  ;;  %v8528_v56 = vld [vmem:[%s9987_s23 + $0xa10] sm:$0xf] }
 0x2d6   : > { %v9401_v23 = vld [vmem:[%s9987_s23 + $0xa20] sm:$0xf0] }
 0x2d7   : > { %5970 = vmatpush.bf16.msrb.mxu0 %v8229_v2  ;;  %v8609_v2 = vor.u32 %v9421_v62, %v8608_v19  ;;  %v8749_v62 = vor.u32 %v9456_v8, %v8748_v16  ;;  %v6025_v16 = vperm.slane %v11970_v59, 3 }
 0x2d8   : > { %5940 = vmatpush.bf16.msra.mxu2 %v7949_v24 }
 0x2d9   : > { %5981 = vmatpush.bf16.msrb.mxu1 %v8449_v3  ;;  %5900 = vmatpush.bf16.msrb.mxu3 %v7429_v60  ;;  %v5623_v3 = vpop.f32.mrf.mxu3  ;;  %v8568_v60 = vld [vmem:[%s9987_s23 + $0xa60] sm:$0xf] }
 0x2da   : > { %v5624_v0 = vadd.f32 %v5623_v3, %v5609_v43  ;;  %v8569_v15 = vor.u32 %v9411_v52, %v8568_v60  ;;  %v9461_v43 = vld [vmem:[%s9987_s23 + $0xc00] sm:$0xf0] }
 0x2db   : > { %5971 = vmatpush.bf16.msrb.mxu0 %v8209_v33  ;;  %v5611_v24 = vpop.f32.mrf.mxu2 }
 0x2dc   : > { %5941 = vmatpush.bf16.msra.mxu2 %v7929_v45  ;;  %v9281_v45 = vld [vmem:[%s9987_s23 + $0x660] sm:$0xf0] }
 0x2dd   : > { %5982 = vmatpush.bf16.msrb.mxu1 %v8429_v27  ;;  %5901 = vmatpush.bf16.msrb.mxu3 %v7409_v44  ;;  %v9286_v27 = vld [vmem:[%s9987_s23 + $0x688] sm:$0xf0]  ;;  %v8049_v18 = vor.u32 %v9281_v45, %v8048_v10  ;;  %v8688_v10 = vld [vmem:[%s9987_s23 + $0xb50] sm:$0xf]  ;;  %v9441_v45 = vld [vmem:[%s9987_s23 + $0xb60] sm:$0xf0] }
 0x2de   : > { %5972 = vmatmul.bf16.vlgmr.msrb.gmra.mxu0 %v11090_v47  ;;  %v9431_v47 = vld [vmem:[%s9987_s23 + $0xb10] sm:$0xf0]  ;;  %v8069_v55 = vor.u32 %v9286_v27, %v8068_v38  ;;  %v9406_v44 = vld [vmem:[%s9987_s23 + $0xa48] sm:$0xf0]  ;;  %v8708_v38 = vld [vmem:[%s9987_s23 + $0xb78] sm:$0xf] }
 0x2df   : > { %v8649_v21 = vor.u32 %v9431_v47, %v8648_v36  ;;  %v8549_v22 = vor.u32 %v9406_v44, %v8548_v48  ;;  %v8789_v47 = vor.u32 %v9466_v5, %v8788_v6  ;;  %v9446_v27 = vld [vmem:[%s9987_s23 + $0xb88] sm:$0xf0] }
 0x2e0   : > { %5942 = vmatpush.bf16.msra.mxu2 %v7909_v39  ;;  %5902 = vmatmul.bf16.vlgmr.msrb.gmra.mxu3 %v10431_v20  ;;  %v9426_v20 = vld [vmem:[%s9987_s23 + $0xae8] sm:$0xf0] }
 0x2e1   : > { %5983 = vmatpush.bf16.msrb.mxu1 %v8409_v29  ;;  %5950 = vmatpush.bf16.msra.mxu3 %v8189_v17  ;;  %v8629_v34 = vor.u32 %v9426_v20, %v8628_v25  ;;  %v5625_v33 = vpop.f32.mrf.mxu3  ;;  %v9476_v29 = vld [vmem:[%s9987_s23 + $0xc78] sm:$0xf0]  ;;  %v8769_v20 = vor.u32 %v9461_v43, %v8768_v50 }
 0x2e2   : > { %v8829_v17 = vor.u32 %v9476_v29, %v8828_v4  ;;  %v5626_v61 = vadd.f32 %v5625_v33, %v5611_v24 }
 0x2e3   : > { %v5665_v9 = vpop.f32.mrf.mxu2 }
 0x2e4   : > { %5943 = vmatpush.bf16.msra.mxu2 %v7889_v40  ;;  %v8529_v40 = vor.u32 %v9401_v23, %v8528_v56 }
 0x2e5   : > { %5984 = vmatpush.bf16.msrb.mxu1 %v8389_v7  ;;  %5951 = vmatpush.bf16.msra.mxu3 %v8169_v46  ;;  %v9471_v7 = vld [vmem:[%s9987_s23 + $0xc50] sm:$0xf0]  ;;  %v5653_v46 = vpop.f32.mrf.mxu1 }
 0x2e6   : > { %v8809_v57 = vor.u32 %v9471_v7, %v8808_v28 }
 0x2e7   : > { %5944 = vmatmul.bf16.vlgmr.msra.gmra.mxu2 %v10802_v1  ;;  %v9291_v1 = vld [vmem:[%s9987_s23 + $0x6b0] sm:$0xf0] }
 0x2e8   : > { %5992 = vmatpush.bf16.msrb.mxu2 %v8669_v37  ;;  %v8089_v26 = vor.u32 %v9291_v1, %v8088_v51  ;;  %v8728_v51 = vld [vmem:[%s9987_s23 + $0xba0] sm:$0xf]  ;;  %v9451_v1 = vld [vmem:[%s9987_s23 + $0xbb0] sm:$0xf0]  ;;  %s9477_s23 = smul.u32 (%p9894_p10), 40, %s9865_s28 }
 0x2e9   : > { %5985 = vmatpush.bf16.msrb.mxu1 %v8369_v53  ;;  %5952 = vmatpush.bf16.msra.mxu3 %v8149_v58  ;;  %v5679_v11 = vpop.f32.mrf.mxu3  ;;  %v8729_v24 = vor.u32 %v9451_v1, %v8728_v51 }
 0x2ea   : > { %s6083_s1 = scalar_lea.vmem (%p9894_p10), %s12117_s8, %s9477_s23 }
 0x2eb   : > { %v5667_v30 = vpop.f32.mrf.mxu2 }
 0x2ec   : > { %5986 = vmatmul.bf16.vlgmr.msrb.gmra.mxu1 %v11150_v14  ;;  %5993 = vmatpush.bf16.msrb.mxu2 %v8649_v21  ;;  %v5637_v14 = vpop.f32.mrf.mxu0 }
 0x2ed   : > { %5953 = vmatpush.bf16.msra.mxu3 %v8129_v63  ;;  %v5638_v31 = vadd.f32 %v5637_v14, %v5624_v0  ;;  %v5707_v63 = vpop.f32.mrf.mxu1  ;;  %v6024_v14 = vperm.slane %v11970_v59, 2  ;;  %v11976_v0 = vld [vmem:[%s11706_s14] sm:$0x1f] }
 0x2ee   : > { %v6046_v60 = vperm.slane %v11976_v0, 2 }
 0x2ef   : > { %v5652_v42 = vadd.f32 %v5651_v41, %v5638_v31  ;;  %v8689_v31 = vor.u32 %v9441_v45, %v8688_v10 }
 0x2f0   : > { %5994 = vmatpush.bf16.msrb.mxu2 %v8629_v34 }
 0x2f1   : > { %5954 = vmatpush.bf16.msra.mxu3 %v8109_v49  ;;  %v5666_v37 = vadd.f32 %v5665_v9, %v5652_v42 }
 0x2f3   : > { %v5680_v36 = vadd.f32 %v5679_v11, %v5666_v37  ;;  %v5721_v49 = vpop.f32.mrf.mxu2 }
 0x2f4   : > { %5995 = vmatpush.bf16.msrb.mxu2 %v8609_v2  ;;  %v5639_v39 = vpop.f32.mrf.mxu0 }
 0x2f5   : > { %5955 = vmatpush.bf16.msra.mxu3 %v8089_v26  ;;  %v5640_v53 = vadd.f32 %v5639_v39, %v5626_v61  ;;  %v5709_v52 = vpop.f32.mrf.mxu1 }
 0x2f7   : > { %v5654_v21 = vadd.f32 %v5653_v46, %v5640_v53 }
 0x2f8   : > { %5996 = vmatpush.bf16.msrb.mxu2 %v8589_v32 }
 0x2f9   : > { %5956 = vmatpush.bf16.msra.mxu3 %v8069_v55  ;;  %v5668_v3 = vadd.f32 %v5667_v30, %v5654_v21  ;;  %v8709_v55 = vor.u32 %v9446_v27, %v8708_v38 }
 0x2fb   : > { %v5723_v4 = vpop.f32.mrf.mxu2 }
 0x2fc   : > { %5997 = vmatpush.bf16.msrb.mxu2 %v8569_v15  ;;  %v5693_v58 = vpop.f32.mrf.mxu0 }
 0x2fd   : > { %5957 = vmatpush.bf16.msra.mxu3 %v8049_v18  ;;  %v5694_v25 = vadd.f32 %v5693_v58, %v5680_v36  ;;  %v5763_v39 = vpop.f32.mrf.mxu1 }
 0x2ff   : > { %v5708_v34 = vadd.f32 %v5707_v63, %v5694_v25 }
 0x300   : > { %5998 = vmatpush.bf16.msrb.mxu2 %v8549_v22  ;;  %5958 = vmatmul.bf16.vlgmr.msra.gmra.mxu3 %v10932_v12  ;;  %v5681_v12 = vpop.f32.mrf.mxu3 }
 0x301   : > { %6006 = vmatpush.bf16.msrb.mxu3 %v8829_v17  ;;  %v5682_v19 = vadd.f32 %v5681_v12, %v5668_v3  ;;  %v6047_v3 = vperm.slane %v11976_v0, 3 }
 0x304   : > { %5999 = vmatpush.bf16.msrb.mxu2 %v8529_v40  ;;  %v5695_v2 = vpop.f32.mrf.mxu0 }
 0x305   : > { %6007 = vmatpush.bf16.msrb.mxu3 %v8809_v57  ;;  %v5696_v35 = vadd.f32 %v5695_v2, %v5682_v19  ;;  %v5765_v28 = vpop.f32.mrf.mxu1 }
 0x307   : > { %6000 = vmatmul.bf16.vlgmr.msrb.gmra.mxu2 %v11251_v54  ;;  %v5722_v54 = vadd.f32 %v5721_v49, %v5708_v34  ;;  %v5710_v41 = vadd.f32 %v5709_v52, %v5696_v35 }
 0x308   : > { %v5735_v26 = vpop.f32.mrf.mxu3 }
 0x309   : > { %6008 = vmatpush.bf16.msrb.mxu3 %v8789_v47  ;;  %v5736_v32 = vadd.f32 %v5735_v26, %v5722_v54  ;;  %v5724_v29 = vadd.f32 %v5723_v4, %v5710_v41 }
 0x30a   : > { %v5777_v7 = vpop.f32.mrf.mxu2 }
 0x30b   : > { %v6034_v33 = vmul.f32 %v6024_v14, %v5736_v32 }
 0x30c   : > { %v5749_v17 = vpop.f32.mrf.mxu0 }
 0x30d   : > { %6009 = vmatpush.bf16.msrb.mxu3 %v8769_v20  ;;  %v6056_v15 = vadd.f32 %v6046_v60, %v6034_v33  ;;  %v5764_v56 = vadd.f32 %v5763_v39, %v5749_v17  ;;  %v5819_v23 = vpop.f32.mrf.mxu1 }
 0x30f   : > { %6066 = vst [vmem:[%s11748_s18 + $0x10] sm:$0xff] %v6056_v15  ;;  %v5778_v11 = vadd.f32 %v5777_v7, %v5764_v56 }
 0x310   : > { %v5737_v48 = vpop.f32.mrf.mxu3 }
 0x311   : > { %6010 = vmatpush.bf16.msrb.mxu3 %v8749_v62  ;;  %v5738_v44 = vadd.f32 %v5737_v48, %v5724_v29 }
 0x312   : > { %v5779_v46 = vpop.f32.mrf.mxu2 }
 0x313   : > { %v6039_v9 = vmul.f32 %v6024_v14, %v5738_v44 }
 0x314   : > { %v5751_v22 = vpop.f32.mrf.mxu0 }
 0x315   : > { %6011 = vmatpush.bf16.msrb.mxu3 %v8729_v24  ;;  %v6061_v18 = vadd.f32 %v6046_v60, %v6039_v9  ;;  %v5766_v40 = vadd.f32 %v5765_v28, %v5751_v22  ;;  %v5821_v36 = vpop.f32.mrf.mxu1 }
 0x317   : > { %6071 = vst [vmem:[%s11748_s18 + $0x38] sm:$0xff] %v6061_v18  ;;  %v5780_v53 = vadd.f32 %v5779_v46, %v5766_v40  ;;  %v6026_v40 = vperm.slane %v11970_v59, 4  ;;  %v6096_v59 = vld [vmem:[%s11748_s18] sm:$0xff] (%p9894_p10) }
 0x318   : > { %6097 = vst [vmem:[%s6083_s1] sm:$0xff] (%p9894_p10), %v6096_v59 }
 0x319   : > { %6012 = vmatpush.bf16.msrb.mxu3 %v8709_v55 }
 0x31c   : > { %v5805_v42 = vpop.f32.mrf.mxu0 }
 0x31d   : > { %6013 = vmatpush.bf16.msrb.mxu3 %v8689_v31 }
 0x320   : > { %6014 = vmatmul.bf16.vlgmr.msrb.gmra.mxu3 %v11324_v13 }
 0x323   : > { %v5791_v61 = vpop.f32.mrf.mxu3 }
 0x324   : > { %v5792_v57 = vadd.f32 %v5791_v61, %v5778_v11  ;;  %v5807_v5 = vpop.f32.mrf.mxu0 }
 0x326   : > { %v5806_v6 = vadd.f32 %v5805_v42, %v5792_v57 }
 0x328   : > { %v5820_v13 = vadd.f32 %v5819_v23, %v5806_v6 }
 0x329   : > { %v5875_v20 = vpop.f32.mrf.mxu1 }
 0x32a   : > { %v5833_v58 = vpop.f32.mrf.mxu2 }
 0x32b   : > { %v5793_v37 = vpop.f32.mrf.mxu3  ;;  %v5834_v30 = vadd.f32 %v5833_v58, %v5820_v13 }
 0x32c   : > { %v5794_v47 = vadd.f32 %v5793_v37, %v5780_v53  ;;  %v5861_v43 = vpop.f32.mrf.mxu0  ;;  %v6048_v37 = vperm.slane %v11976_v0, 4  ;;  %v6098_v0 = vld [vmem:[%s11748_s18 + $0x8] sm:$0xff] (%p9894_p10) }
 0x32d   : > { %6099 = vst [vmem:[%s6083_s1 + $0x8] sm:$0xff] (%p9894_p10), %v6098_v0 }
 0x32e   : > { %v5808_v50 = vadd.f32 %v5807_v5, %v5794_v47 }
 0x330   : > { %v5822_v63 = vadd.f32 %v5821_v36, %v5808_v50 }
 0x331   : > { %v5877_v35 = vpop.f32.mrf.mxu1 }
 0x332   : > { %v5835_v34 = vpop.f32.mrf.mxu2 }
 0x333   : > { %v5836_v19 = vadd.f32 %v5835_v34, %v5822_v63 }
 0x334   : > { %v5863_v2 = vpop.f32.mrf.mxu0 }
 0x33c   : > { %v5917_v32 = vpop.f32.mrf.mxu0 }
 0x343   : > { %v5847_v21 = vpop.f32.mrf.mxu3 }
 0x344   : > { %v5848_v25 = vadd.f32 %v5847_v21, %v5834_v30  ;;  %v5919_v45 = vpop.f32.mrf.mxu0 }
 0x346   : > { %v5862_v12 = vadd.f32 %v5861_v43, %v5848_v25 }
 0x348   : > { %v5876_v8 = vadd.f32 %v5875_v20, %v5862_v12  ;;  %v6100_v20 = vld [vmem:[%s11748_s18 + $0x10] sm:$0xff] (%p9894_p10) }
 0x349   : > { %v5931_v41 = vpop.f32.mrf.mxu1  ;;  %6101 = vst [vmem:[%s6083_s1 + $0x10] sm:$0xff] (%p9894_p10), %v6100_v20 }
 0x34a   : > { %v6035_v62 = vmul.f32 %v6025_v16, %v5876_v8  ;;  %v5889_v38 = vpop.f32.mrf.mxu2  ;;  %v6108_v8 = vld [vmem:[%s11748_s18 + $0x30] sm:$0xff] (%p9894_p10) }
 0x34b   : > { %v5849_v49 = vpop.f32.mrf.mxu3  ;;  %6109 = vst [vmem:[%s6083_s1 + $0x58] sm:$0xff] (%p9894_p10), %v6108_v8 }
 0x34c   : > { %v6057_v51 = vadd.f32 %v6047_v3, %v6035_v62  ;;  %v5850_v1 = vadd.f32 %v5849_v49, %v5836_v19 }
 0x34e   : > { %6067 = vst [vmem:[%s11748_s18 + $0x18] sm:$0xff] %v6057_v51  ;;  %v5864_v54 = vadd.f32 %v5863_v2, %v5850_v1 }
 0x350   : > { %v5878_v14 = vadd.f32 %v5877_v35, %v5864_v54 }
 0x351   : > { %v5933_v31 = vpop.f32.mrf.mxu1 }
 0x352   : > { %v6040_v24 = vmul.f32 %v6025_v16, %v5878_v14  ;;  %v5891_v60 = vpop.f32.mrf.mxu2  ;;  %v6106_v16 = vld [vmem:[%s11748_s18 + $0x28] sm:$0xff] (%p9894_p10) }
 0x353   : > { %6107 = vst [vmem:[%s6083_s1 + $0x50] sm:$0xff] (%p9894_p10), %v6106_v16 }
 0x354   : > { %v6062_v26 = vadd.f32 %v6047_v3, %v6040_v24  ;;  %v6110_v3 = vld [vmem:[%s11748_s18 + $0x38] sm:$0xff] (%p9894_p10) }
 0x355   : > { %v6102_v63 = vld [vmem:[%s11748_s18 + $0x18] sm:$0xff] (%p9894_p10)  ;;  %6111 = vst [vmem:[%s6083_s1 + $0x60] sm:$0xff] (%p9894_p10), %v6110_v3 }
 0x356   : > { %6072 = vst [vmem:[%s11748_s18 + $0x40] sm:$0xff] %v6062_v26 }
 0x357   : > { %6103 = vst [vmem:[%s6083_s1 + $0x18] sm:$0xff] (%p9894_p10), %v6102_v63 }
 0x35b   : > { %v5973_v18 = vpop.f32.mrf.mxu0 }
 0x35d   : > { %v6112_v34 = vld [vmem:[%s11748_s18 + $0x40] sm:$0xff] (%p9894_p10) }
 0x35e   : > { %6113 = vst [vmem:[%s6083_s1 + $0x68] sm:$0xff] (%p9894_p10), %v6112_v34 }
 0x363   : > { %v5903_v27 = vpop.f32.mrf.mxu3  ;;  %v5975_v11 = vpop.f32.mrf.mxu0 }
 0x364   : > { %v5904_v52 = vadd.f32 %v5903_v27, %v5889_v38 }
 0x366   : > { %v5918_v55 = vadd.f32 %v5917_v32, %v5904_v52 }
 0x368   : > { %v5932_v15 = vadd.f32 %v5931_v41, %v5918_v55 }
 0x369   : > { %v5987_v28 = vpop.f32.mrf.mxu1 }
 0x36a   : > { %v5945_v10 = vpop.f32.mrf.mxu2 }
 0x36b   : > { %v5905_v33 = vpop.f32.mrf.mxu3  ;;  %v5946_v48 = vadd.f32 %v5945_v10, %v5932_v15 }
 0x36c   : > { %v5906_v4 = vadd.f32 %v5905_v33, %v5891_v60 }
 0x36e   : > { %v5920_v44 = vadd.f32 %v5919_v45, %v5906_v4 }
 0x370   : > { %v5934_v39 = vadd.f32 %v5933_v31, %v5920_v44 }
 0x371   : > { %v5989_v53 = vpop.f32.mrf.mxu1 }
 0x372   : > { %v5947_v17 = vpop.f32.mrf.mxu2 }
 0x373   : > { %v5948_v42 = vadd.f32 %v5947_v17, %v5934_v39 }
 0x383   : > { %v5959_v29 = vpop.f32.mrf.mxu3 }
 0x384   : > { %v5960_v9 = vadd.f32 %v5959_v29, %v5946_v48 }
 0x386   : > { %v5974_v22 = vadd.f32 %v5973_v18, %v5960_v9 }
 0x388   : > { %v5988_v61 = vadd.f32 %v5987_v28, %v5974_v22 }
 0x38a   : > { %v6001_v23 = vpop.f32.mrf.mxu2 }
 0x38b   : > { %v5961_v7 = vpop.f32.mrf.mxu3  ;;  %v6002_v57 = vadd.f32 %v6001_v23, %v5988_v61 }
 0x38c   : > { %v5962_v56 = vadd.f32 %v5961_v7, %v5948_v42 }
 0x38e   : > { %v5976_v46 = vadd.f32 %v5975_v11, %v5962_v56 }
 0x390   : > { %v5990_v36 = vadd.f32 %v5989_v53, %v5976_v46 }
 0x392   : > { %v6003_v58 = vpop.f32.mrf.mxu2 }
 0x393   : > { %v6004_v30 = vadd.f32 %v6003_v58, %v5990_v36 }
 0x3a3   : > { %v6015_v6 = vpop.f32.mrf.mxu3 }
 0x3a4   : > { %v6016_v5 = vadd.f32 %v6015_v6, %v6002_v57 }
 0x3a6   : > { %v6036_v13 = vmul.f32 %v6026_v40, %v6016_v5 }
 0x3a8   : > { %v6058_v47 = vadd.f32 %v6048_v37, %v6036_v13 }
 0x3aa   : > { %6068 = vst [vmem:[%s11748_s18 + $0x20] sm:$0xff] %v6058_v47 }
 0x3ab   : > { %v6017_v50 = vpop.f32.mrf.mxu3 }
 0x3ac   : > { %v6018_v43 = vadd.f32 %v6017_v50, %v6004_v30 }
 0x3ae   : > { %v6041_v21 = vmul.f32 %v6026_v40, %v6018_v43  ;;  %6080 = sbr.rel (!%p9894_p10) target bundleno = 955 (0x3bb), region = 68 }
 0x3b0   : > { %v6063_v25 = vadd.f32 %v6048_v37, %v6041_v21 }
 0x3b1   : > { %v6104_v12 = vld [vmem:[%s11748_s18 + $0x20] sm:$0xff] (%p9894_p10) }
 0x3b2   : > { %6073 = vst [vmem:[%s11748_s18 + $0x48] sm:$0xff] %v6063_v25 }
 0x3b3   : > { %6105 = vst [vmem:[%s6083_s1 + $0x20] sm:$0xff] %v6104_v12 }
 0x3b9   : > { %v6114_v19 = vld [vmem:[%s11748_s18 + $0x48] sm:$0xff] }
 0x3ba   : > { %6115 = vst [vmem:[%s6083_s1 + $0x70] sm:$0xff] %v6114_v19 }
 0x3bb PF: > { %s12118_s27 = sld [smem:[#allocation12_spill]]  ;;  %s12120_s24 = smov %s9790_s25 }
 0x3bc   : > { %s12119_s28 = sld [smem:[#allocation13_spill]]  ;;  %s12121_s25 = smov %s9794_s26 }
 0x3c1   : > { %p16_p8 = scmp.ge.s32.totalorder %s12118_s27, 4  }
 0x3c2   : > { %s12122_s26 = smov %s12119_s28 }
 0x3c3   :  { %18 = sbr.rel (!%p16_p8) target bundleno = 7 (0x7), region = 132 }
 0x3c8   :  { %6131 = vsyncpa [#allocation3], 1 }
 0x3c9   :  { %6133 = vsyncpa [#allocation3 + $0x1], 1 }
 0x3ca   :  { %6134 = vsyncpa [#allocation5], 1 }

</bundles_post_ra>
